<compile_context>
chip_gen: v5e
topology: v5e:2x2
jax: 0.10.0
libtpu: 0.0.40
codegen_flags: <defaults>
</compile_context>

<pallas_src>
import functools

import jax
import jax.numpy as jnp
from jax.experimental import pallas as pl
from jax.experimental.pallas import tpu as pltpu

EMBED_NDIM = 32
GATE_PAD = 128          # per-gate lane padding for the GRU (vreg-aligned gate slices)
BATCH_PAD = 8           # GRU batch rows padded to one full sublane group


# ----------------------------------------------------------------------------
# In-kernel helpers (operate on VMEM-resident values inside the fused kernel)
# ----------------------------------------------------------------------------

def _conv3x3_relu(x, w_fold, b):
    """3x3 same-padding conv + bias + ReLU on a VMEM-resident (H, W, Cin) value.

    w_fold : (9*Cin, Cout) bf16, K-block order p = di*3 + dj (row offset di, column offset dj)
    b      : (1, Cout) f32
    returns: (H, W, Cout) f32
    """
    h, w, cin = x.shape
    # In-kernel halo: zero rows along H (cheap leading-axis concat), then pre-build the three
    # column-shifted planes once (instead of nine strided W slices per conv).
    zrow = jnp.zeros((1, w, cin), x.dtype)
    xh = jnp.concatenate([zrow, x, zrow], axis=0)                 # (H+2, W, Cin)
    zcol = jnp.zeros((h + 2, 1, cin), x.dtype)
    p0 = jnp.concatenate([zcol, xh[:, :w - 1, :]], axis=1)        # columns shifted right (dj=0)
    p2 = jnp.concatenate([xh[:, 1:, :], zcol], axis=1)            # columns shifted left  (dj=2)
    planes = jnp.concatenate([p0, xh, p2], axis=-1)               # (H+2, W, 3*Cin), ch = dj*Cin + c
    # The three row offsets are free leading-axis slices; all 9 taps fold into the matmul K dim.
    patch = jnp.concatenate([planes[di:di + h] for di in range(3)], axis=-1)   # (H, W, 9*Cin)
    patch = patch.reshape(h * w, 9 * cin).astype(jnp.bfloat16)
    acc = jnp.dot(patch, w_fold, preferred_element_type=jnp.float32)           # one MXU push
    y = jnp.maximum(acc + b, 0.0)                                 # bias + ReLU in f32
    return y.reshape(h, w, w_fold.shape[-1])


def _maxpool2x2(y):
    """2x2 / stride-2 max pool on a VMEM-resident (H, W, C) value (W a multiple of 8)."""
    h, w, c = y.shape
    y = y.reshape(h // 2, 2 * w, c)                               # merge H pairs into sublanes
    y = jnp.maximum(y[:, :w, :], y[:, w:, :])                     # H-direction max, aligned slices
    cols = [jnp.maximum(y[:, 2 * q:2 * q + 1, :], y[:, 2 * q + 1:2 * q + 2, :])
            for q in range(w // 2)]                               # W-direction max per column pair
    return jnp.concatenate(cols, axis=1)                          # (H/2, W/2, C)


# ----------------------------------------------------------------------------
# Fused image-path kernel: conv stack + classifier head + W projection
# ----------------------------------------------------------------------------

def _img_path_kernel(x_ref, c1w_ref, c1b_ref, c2w_ref, c2b_ref, c3w_ref, c3b_ref,
                     fc1w_ref, fc1b_ref, fc2w_ref, fc2b_ref, w3_ref, o_ref):
    x = x_ref[0]                                                  # (16, 16, 4) f32
    y = _conv3x3_relu(x, c1w_ref[...], c1b_ref[...])              # (16, 16,  8)
    y = _conv3x3_relu(y, c2w_ref[...], c2b_ref[...])              # (16, 16,  8)
    y = _maxpool2x2(y)                                            # ( 8,  8,  8)
    y = _conv3x3_relu(y, c3w_ref[...], c3b_ref[...])              # ( 8,  8, 16)
    y = _maxpool2x2(y)                                            # ( 4,  4, 16)

    # Flatten to one lane-major row in natural (h, w, c) order.  fc1's input axis was permuted at
    # prepare time so this matches PyTorch's NCHW .view(B, -1) flatten feeding classifier[0].
    h4, w4, _ = y.shape
    fw = jnp.concatenate([y[:, j:j + 1, :] for j in range(w4)], axis=-1)      # (4, 1, 64)
    feat = jnp.concatenate([fw[i:i + 1] for i in range(h4)], axis=-1)         # (1, 1, 256)
    feat = feat.reshape(1, feat.shape[-1]).astype(jnp.bfloat16)

    h1 = jnp.dot(feat, fc1w_ref[...], preferred_element_type=jnp.float32) + fc1b_ref[...]
    h1 = jnp.maximum(h1, 0.0)
    h2 = jnp.dot(h1.astype(jnp.bfloat16), fc2w_ref[...],
                 preferred_element_type=jnp.float32) + fc2b_ref[...]
    h2 = jnp.maximum(h2, 0.0)
    emb = jnp.dot(h2.astype(jnp.bfloat16), w3_ref[...], preferred_element_type=jnp.float32)
    o_ref[0] = emb.astype(o_ref.dtype)                            # (1, 32)


def image_path(img_nchw, kp):
    """Full image branch in ONE pallas_call.  Returns (N, EMBED_NDIM)."""
    x = jnp.transpose(img_nchw, (0, 2, 3, 1))                     # NCHW -> NHWC (one-time, tiny)
    n, h, w, cin = x.shape

    def full(a):
        return pl.BlockSpec(a.shape, lambda i: (0,) * a.ndim)

    weights = (kp["conv1_w"], kp["conv1_b"], kp["conv2_w"], kp["conv2_b"],
               kp["conv3_w"], kp["conv3_b"], kp["fc1_w"], kp["fc1_b"],
               kp["fc2_w"], kp["fc2_b"], kp["W_w"])
    out = pl.pallas_call(
        _img_path_kernel,
        out_shape=jax.ShapeDtypeStruct((n, 1, EMBED_NDIM), jnp.float32),
        grid=(n,),
        in_specs=[pl.BlockSpec((1, h, w, cin), lambda i: (i, 0, 0, 0))]
                 + [full(a) for a in weights],
        out_specs=pl.BlockSpec((1, 1, EMBED_NDIM), lambda i: (i, 0, 0)),
        compiler_params=pltpu.CompilerParams(dimension_semantics=("parallel",)),
    )(x, *weights)
    return out.reshape(n, EMBED_NDIM)


# ----------------------------------------------------------------------------
# GRU kernel (single call over the whole sequence; returns the final hidden state)
# ----------------------------------------------------------------------------

def _sigmoid(v):
    return 1.0 / (1.0 + jnp.exp(-v))     # exact (EUP exp); no approx-reciprocal drift


def _gru_kernel(txt_ref, wih_ref, bih_ref, whh_ref, bhh_ref, o_ref, *, seq_len, batch_pad):
    T, BP = seq_len, batch_pad
    G = whh_ref.shape[1] // 3             # lane-padded gate width (128)

    # Hoisted input-side projection: one (T*BP, E) x (E, 3G) matmul for all timesteps.
    gx = jnp.dot(txt_ref[...].astype(jnp.bfloat16), wih_ref[...],
                 preferred_element_type=jnp.float32) + bih_ref[...]

    whh = whh_ref[...]
    bhh = bhh_ref[...]
    h = jnp.zeros((BP, G), jnp.float32)
    for t in range(T):                    # statically unrolled; one MXU push per step
        gh = jnp.dot(h.astype(jnp.bfloat16), whh, preferred_element_type=jnp.float32) + bhh
        gxt = gx[t * BP:(t + 1) * BP, :]                          # sublane-aligned row slice
        r = _sigmoid(gxt[:, 0:G] + gh[:, 0:G])                    # vreg-aligned 128-lane gates
        z = _sigmoid(gxt[:, G:2 * G] + gh[:, G:2 * G])
        n = jnp.tanh(gxt[:, 2 * G:3 * G] + r * gh[:, 2 * G:3 * G])
        h = (1.0 - z) * n + z * h
    o_ref[...] = h[:o_ref.shape[0], :o_ref.shape[1]].astype(o_ref.dtype)


def gru_last_hidden(txt, wih, bih, whh, bhh):
    """txt: (T, B, E).  Returns the last hidden state (B, EMBED_NDIM)."""
    T, B, E = txt.shape
    txt_p = jnp.zeros((T, BATCH_PAD, E), txt.dtype).at[:, :B, :].set(txt)
    kernel = functools.partial(_gru_kernel, seq_len=T, batch_pad=BATCH_PAD)
    return pl.pallas_call(
        kernel,
        out_shape=jax.ShapeDtypeStruct((B, EMBED_NDIM), jnp.float32),
    )(txt_p.reshape(T * BATCH_PAD, E), wih, bih, whh, bhh)


# ----------------------------------------------------------------------------
# Full forward
# ----------------------------------------------------------------------------

@jax.jit
def visual_semantic_embedding(img_nchw, txt, kp):
    img_feat = image_path(img_nchw, kp)
    txt_feat = gru_last_hidden(txt, kp["gru_wih"], kp["gru_bih"], kp["gru_whh"], kp["gru_bhh"])
    return img_feat, txt_feat


# ----------------------------------------------------------------------------
# Parameters: PyTorch-layout init + one-time conversion to kernel-ready layouts
# ----------------------------------------------------------------------------

def init_params(key):
    ks = jax.random.split(key, 16)

    def rnd(k, shape, scale=0.1):
        return scale * jax.random.normal(k, shape, jnp.float32)

    h = EMBED_NDIM
    return {
        # conv stack (stand-in for the frozen pretrained VGG16 features), PyTorch (O, I, kh, kw)
        "conv1_w": rnd(ks[0], (8, 4, 3, 3)),   "conv1_b": rnd(ks[1], (8,)),
        "conv2_w": rnd(ks[2], (8, 8, 3, 3)),   "conv2_b": rnd(ks[3], (8,)),
        "conv3_w": rnd(ks[4], (16, 8, 3, 3)),  "conv3_b": rnd(ks[5], (16,)),
        # classifier (stand-in for 25088->4096->4096), PyTorch (out, in)
        "fc1_w": rnd(ks[6], (64, 256)), "fc1_b": rnd(ks[7], (64,)),
        "fc2_w": rnd(ks[8], (64, 64)),  "fc2_b": rnd(ks[9], (64,)),
        # W: Linear(4096 -> embed_ndim, bias=False), scaled down to 64 -> 32
        "W_w": rnd(ks[10], (h, 64)),
        # GRU(embed_ndim, embed_ndim, 1), PyTorch shapes / gate order (r, z, n)
        "gru_w_ih": rnd(ks[11], (3 * h, h)),
        "gru_w_hh": rnd(ks[12], (3 * h, h)),
        "gru_b_ih": rnd(ks[13], (3 * h,)),
        "gru_b_hh": rnd(ks[14], (3 * h,)),
    }


def prepare_params(p):
    """One-time conversion: tap-folded bf16 conv weights, flatten-order-permuted bf16 fc1,
    bf16 matmul operands, f32 biases, and 128-lane-padded GRU gate blocks (pad entries are
    exactly zero, so padded lanes/rows never contaminate real outputs)."""

    def conv_fold(w_oihw):            # (O, I, 3, 3) -> (9*I, O); K-block order p = di*3 + dj
        blocks = [w_oihw[:, :, di, dj].T for di in range(3) for dj in range(3)]
        return jnp.concatenate(blocks, axis=0).astype(jnp.bfloat16)

    def row(b):
        return b.reshape(1, -1).astype(jnp.float32)

    # fc1 consumed a PyTorch NCHW flatten (c*16 + h*4 + w); the kernel flattens in (h, w, c) order,
    # so permute fc1's input axis once here instead of transposing activations in-kernel.
    c3, h3, w3 = 16, 4, 4
    fc1_nat = jnp.transpose(p["fc1_w"].reshape(-1, c3, h3, w3), (0, 2, 3, 1))
    fc1_nat = fc1_nat.reshape(p["fc1_w"].shape[0], -1).T          # (256, 64), rows = h*64 + w*16 + c

    def gru_in(w):                    # (3H, E) -> (E, 3*GATE_PAD), gate blocks lane-padded
        hh = w.shape[0] // 3
        out = jnp.zeros((w.shape[1], 3 * GATE_PAD), jnp.float32)
        for g in range(3):
            out = out.at[:, g * GATE_PAD:g * GATE_PAD + hh].set(w[g * hh:(g + 1) * hh, :].T)
        return out.astype(jnp.bfloat16)

    def gru_rec(w):                   # (3H, H) -> (GATE_PAD, 3*GATE_PAD)
        hh = w.shape[0] // 3
        out = jnp.zeros((GATE_PAD, 3 * GATE_PAD), jnp.float32)
        for g in range(3):
            out = out.at[:hh, g * GATE_PAD:g * GATE_PAD + hh].set(w[g * hh:(g + 1) * hh, :].T)
        return out.astype(jnp.bfloat16)

    def gru_bias(b):                  # (3H,) -> (1, 3*GATE_PAD)
        hh = b.shape[0] // 3
        out = jnp.zeros((1, 3 * GATE_PAD), jnp.float32)
        for g in range(3):
            out = out.at[0, g * GATE_PAD:g * GATE_PAD + hh].set(b[g * hh:(g + 1) * hh])
        return out

    return {
        "conv1_w": conv_fold(p["conv1_w"]), "conv1_b": row(p["conv1_b"]),
        "conv2_w": conv_fold(p["conv2_w"]), "conv2_b": row(p["conv2_b"]),
        "conv3_w": conv_fold(p["conv3_w"]), "conv3_b": row(p["conv3_b"]),
        "fc1_w": fc1_nat.astype(jnp.bfloat16), "fc1_b": row(p["fc1_b"]),
        "fc2_w": p["fc2_w"].T.astype(jnp.bfloat16), "fc2_b": row(p["fc2_b"]),
        "W_w": p["W_w"].T.astype(jnp.bfloat16),
        "gru_wih": gru_in(p["gru_w_ih"]), "gru_bih": gru_bias(p["gru_b_ih"]),
        "gru_whh": gru_rec(p["gru_w_hh"]), "gru_bhh": gru_bias(p["gru_b_hh"]),
    }


if __name__ == "__main__":
    key = jax.random.PRNGKey(0)
    k_img, k_txt, k_par = jax.random.split(key, 3)

    img = jax.random.normal(k_img, (2, 4, 16, 16), jnp.float32)      # NCHW
    txt = jax.random.normal(k_txt, (8, 2, EMBED_NDIM), jnp.float32)  # (seq, batch, embed)
    kp = prepare_params(init_params(k_par))                          # one-time weight prep

    img_feat, txt_feat = visual_semantic_embedding(img, txt, kp)
    jax.block_until_ready((img_feat, txt_feat))

    assert img_feat.shape == (2, EMBED_NDIM), img_feat.shape
    assert txt_feat.shape == (2, EMBED_NDIM), txt_feat.shape
    print("KERNEL_OK")
</pallas_src>

<mosaic_0001>
module attributes {stable_mosaic.version = 11 : i64} {
  func.func @_img_path_kernel(%arg0: i32, %arg1: memref<1x16x16x4xf32, #tpu.memory_space<vmem>>, %arg2: memref<36x8xbf16, #tpu.memory_space<vmem>>, %arg3: memref<1x8xf32, #tpu.memory_space<vmem>>, %arg4: memref<72x8xbf16, #tpu.memory_space<vmem>>, %arg5: memref<1x8xf32, #tpu.memory_space<vmem>>, %arg6: memref<72x16xbf16, #tpu.memory_space<vmem>>, %arg7: memref<1x16xf32, #tpu.memory_space<vmem>>, %arg8: memref<256x64xbf16, #tpu.memory_space<vmem>>, %arg9: memref<1x64xf32, #tpu.memory_space<vmem>>, %arg10: memref<64x64xbf16, #tpu.memory_space<vmem>>, %arg11: memref<1x64xf32, #tpu.memory_space<vmem>>, %arg12: memref<64x32xbf16, #tpu.memory_space<vmem>>, %arg13: memref<1x1x32xf32, #tpu.memory_space<vmem>>) attributes {dimension_semantics = [#tpu.dimension_semantics<parallel>], iteration_bounds = array<i64: 2>, scalar_prefetch = 0 : i64, scratch_operands = 0 : i64, tpu.core_type = #tpu.core_type<tc>, window_params = [{transform_indices = @transform_0, window_bounds = array<i64: 1, 16, 16, 4>}, {pipeline_mode = #tpu.pipeline_mode<synchronous>, transform_indices = @transform_1, window_bounds = array<i64: 36, 8>}, {pipeline_mode = #tpu.pipeline_mode<synchronous>, transform_indices = @transform_2, window_bounds = array<i64: 1, 8>}, {pipeline_mode = #tpu.pipeline_mode<synchronous>, transform_indices = @transform_3, window_bounds = array<i64: 72, 8>}, {pipeline_mode = #tpu.pipeline_mode<synchronous>, transform_indices = @transform_4, window_bounds = array<i64: 1, 8>}, {pipeline_mode = #tpu.pipeline_mode<synchronous>, transform_indices = @transform_5, window_bounds = array<i64: 72, 16>}, {pipeline_mode = #tpu.pipeline_mode<synchronous>, transform_indices = @transform_6, window_bounds = array<i64: 1, 16>}, {pipeline_mode = #tpu.pipeline_mode<synchronous>, transform_indices = @transform_7, window_bounds = array<i64: 256, 64>}, {pipeline_mode = #tpu.pipeline_mode<synchronous>, transform_indices = @transform_8, window_bounds = array<i64: 1, 64>}, {pipeline_mode = #tpu.pipeline_mode<synchronous>, transform_indices = @transform_9, window_bounds = array<i64: 64, 64>}, {pipeline_mode = #tpu.pipeline_mode<synchronous>, transform_indices = @transform_10, window_bounds = array<i64: 1, 64>}, {pipeline_mode = #tpu.pipeline_mode<synchronous>, transform_indices = @transform_11, window_bounds = array<i64: 64, 32>}, {transform_indices = @transform_12, window_bounds = array<i64: 1, 1, 32>}]} {
    %c0 = arith.constant 0 : index
    %c0_0 = arith.constant 0 : index
    %c0_1 = arith.constant 0 : index
    %c0_2 = arith.constant 0 : index
    %0 = vector.load %arg1[%c0, %c0_0, %c0_1, %c0_2] : memref<1x16x16x4xf32, #tpu.memory_space<vmem>>, vector<1x16x16x4xf32>
    %1 = vector.shape_cast %0 : vector<1x16x16x4xf32> to vector<16x16x4xf32>
    %c0_3 = arith.constant 0 : index
    %c0_4 = arith.constant 0 : index
    %2 = vector.load %arg2[%c0_3, %c0_4] : memref<36x8xbf16, #tpu.memory_space<vmem>>, vector<36x8xbf16>
    %c0_5 = arith.constant 0 : index
    %c0_6 = arith.constant 0 : index
    %3 = vector.load %arg3[%c0_5, %c0_6] : memref<1x8xf32, #tpu.memory_space<vmem>>, vector<1x8xf32>
    %cst = arith.constant 0.000000e+00 : f32
    %4 = vector.broadcast %cst : f32 to vector<1x16x4xf32>
    %5 = tpu.concatenate %4, %1, %4 in 0 : vector<1x16x4xf32>, vector<16x16x4xf32>, vector<1x16x4xf32> -> vector<18x16x4xf32>
    %cst_7 = arith.constant 0.000000e+00 : f32
    %6 = vector.broadcast %cst_7 : f32 to vector<18x1x4xf32>
    %7 = vector.extract_strided_slice %5 {offsets = [0, 0, 0], sizes = [18, 15, 4], strides = [1, 1, 1]} : vector<18x16x4xf32> to vector<18x15x4xf32>
    %8 = tpu.concatenate %6, %7 in 1 : vector<18x1x4xf32>, vector<18x15x4xf32> -> vector<18x16x4xf32>
    %9 = vector.extract_strided_slice %5 {offsets = [0, 1, 0], sizes = [18, 15, 4], strides = [1, 1, 1]} : vector<18x16x4xf32> to vector<18x15x4xf32>
    %10 = tpu.concatenate %9, %6 in 1 : vector<18x15x4xf32>, vector<18x1x4xf32> -> vector<18x16x4xf32>
    %11 = tpu.concatenate %8, %5, %10 in 2 : vector<18x16x4xf32>, vector<18x16x4xf32>, vector<18x16x4xf32> -> vector<18x16x12xf32>
    %12 = vector.extract_strided_slice %11 {offsets = [0, 0, 0], sizes = [16, 16, 12], strides = [1, 1, 1]} : vector<18x16x12xf32> to vector<16x16x12xf32>
    %13 = vector.extract_strided_slice %11 {offsets = [1, 0, 0], sizes = [16, 16, 12], strides = [1, 1, 1]} : vector<18x16x12xf32> to vector<16x16x12xf32>
    %14 = vector.extract_strided_slice %11 {offsets = [2, 0, 0], sizes = [16, 16, 12], strides = [1, 1, 1]} : vector<18x16x12xf32> to vector<16x16x12xf32>
    %15 = tpu.concatenate %12, %13, %14 in 2 : vector<16x16x12xf32>, vector<16x16x12xf32>, vector<16x16x12xf32> -> vector<16x16x36xf32>
    %16 = vector.shape_cast %15 : vector<16x16x36xf32> to vector<256x36xf32>
    %17 = arith.truncf %16 : vector<256x36xf32> to vector<256x36xbf16>
    %cst_8 = arith.constant dense<0.000000e+00> : vector<256x8xf32>
    %18 = tpu.matmul %17, %2, %cst_8 {dimension_numbers = #tpu.dot_dimension_numbers<[1], [0], [0], [1], [0, 0, 1, 1], [], []>} : vector<256x36xbf16>, vector<36x8xbf16>, vector<256x8xf32> -> vector<256x8xf32>
    %19 = vector.broadcast %3 : vector<1x8xf32> to vector<256x8xf32>
    %20 = arith.addf %18, %19 : vector<256x8xf32>
    %cst_9 = arith.constant 0.000000e+00 : f32
    %21 = vector.broadcast %cst_9 : f32 to vector<256x8xf32>
    %22 = arith.maximumf %20, %21 : vector<256x8xf32>
    %23 = vector.shape_cast %22 : vector<256x8xf32> to vector<16x16x8xf32>
    %c0_10 = arith.constant 0 : index
    %c0_11 = arith.constant 0 : index
    %24 = vector.load %arg4[%c0_10, %c0_11] : memref<72x8xbf16, #tpu.memory_space<vmem>>, vector<72x8xbf16>
    %c0_12 = arith.constant 0 : index
    %c0_13 = arith.constant 0 : index
    %25 = vector.load %arg5[%c0_12, %c0_13] : memref<1x8xf32, #tpu.memory_space<vmem>>, vector<1x8xf32>
    %cst_14 = arith.constant 0.000000e+00 : f32
    %26 = vector.broadcast %cst_14 : f32 to vector<1x16x8xf32>
    %27 = tpu.concatenate %26, %23, %26 in 0 : vector<1x16x8xf32>, vector<16x16x8xf32>, vector<1x16x8xf32> -> vector<18x16x8xf32>
    %cst_15 = arith.constant 0.000000e+00 : f32
    %28 = vector.broadcast %cst_15 : f32 to vector<18x1x8xf32>
    %29 = vector.extract_strided_slice %27 {offsets = [0, 0, 0], sizes = [18, 15, 8], strides = [1, 1, 1]} : vector<18x16x8xf32> to vector<18x15x8xf32>
    %30 = tpu.concatenate %28, %29 in 1 : vector<18x1x8xf32>, vector<18x15x8xf32> -> vector<18x16x8xf32>
    %31 = vector.extract_strided_slice %27 {offsets = [0, 1, 0], sizes = [18, 15, 8], strides = [1, 1, 1]} : vector<18x16x8xf32> to vector<18x15x8xf32>
    %32 = tpu.concatenate %31, %28 in 1 : vector<18x15x8xf32>, vector<18x1x8xf32> -> vector<18x16x8xf32>
    %33 = tpu.concatenate %30, %27, %32 in 2 : vector<18x16x8xf32>, vector<18x16x8xf32>, vector<18x16x8xf32> -> vector<18x16x24xf32>
    %34 = vector.extract_strided_slice %33 {offsets = [0, 0, 0], sizes = [16, 16, 24], strides = [1, 1, 1]} : vector<18x16x24xf32> to vector<16x16x24xf32>
    %35 = vector.extract_strided_slice %33 {offsets = [1, 0, 0], sizes = [16, 16, 24], strides = [1, 1, 1]} : vector<18x16x24xf32> to vector<16x16x24xf32>
    %36 = vector.extract_strided_slice %33 {offsets = [2, 0, 0], sizes = [16, 16, 24], strides = [1, 1, 1]} : vector<18x16x24xf32> to vector<16x16x24xf32>
    %37 = tpu.concatenate %34, %35, %36 in 2 : vector<16x16x24xf32>, vector<16x16x24xf32>, vector<16x16x24xf32> -> vector<16x16x72xf32>
    %38 = vector.shape_cast %37 : vector<16x16x72xf32> to vector<256x72xf32>
    %39 = arith.truncf %38 : vector<256x72xf32> to vector<256x72xbf16>
    %cst_16 = arith.constant dense<0.000000e+00> : vector<256x8xf32>
    %40 = tpu.matmul %39, %24, %cst_16 {dimension_numbers = #tpu.dot_dimension_numbers<[1], [0], [0], [1], [0, 0, 1, 1], [], []>} : vector<256x72xbf16>, vector<72x8xbf16>, vector<256x8xf32> -> vector<256x8xf32>
    %41 = vector.broadcast %25 : vector<1x8xf32> to vector<256x8xf32>
    %42 = arith.addf %40, %41 : vector<256x8xf32>
    %cst_17 = arith.constant 0.000000e+00 : f32
    %43 = vector.broadcast %cst_17 : f32 to vector<256x8xf32>
    %44 = arith.maximumf %42, %43 : vector<256x8xf32>
    %45 = vector.shape_cast %44 : vector<256x8xf32> to vector<16x16x8xf32>
    %46 = vector.shape_cast %45 : vector<16x16x8xf32> to vector<8x32x8xf32>
    %47 = vector.extract_strided_slice %46 {offsets = [0, 0, 0], sizes = [8, 16, 8], strides = [1, 1, 1]} : vector<8x32x8xf32> to vector<8x16x8xf32>
    %48 = vector.extract_strided_slice %46 {offsets = [0, 16, 0], sizes = [8, 16, 8], strides = [1, 1, 1]} : vector<8x32x8xf32> to vector<8x16x8xf32>
    %49 = arith.maximumf %47, %48 : vector<8x16x8xf32>
    %50 = vector.extract_strided_slice %49 {offsets = [0, 0, 0], sizes = [8, 1, 8], strides = [1, 1, 1]} : vector<8x16x8xf32> to vector<8x1x8xf32>
    %51 = vector.extract_strided_slice %49 {offsets = [0, 1, 0], sizes = [8, 1, 8], strides = [1, 1, 1]} : vector<8x16x8xf32> to vector<8x1x8xf32>
    %52 = arith.maximumf %50, %51 : vector<8x1x8xf32>
    %53 = vector.extract_strided_slice %49 {offsets = [0, 2, 0], sizes = [8, 1, 8], strides = [1, 1, 1]} : vector<8x16x8xf32> to vector<8x1x8xf32>
    %54 = vector.extract_strided_slice %49 {offsets = [0, 3, 0], sizes = [8, 1, 8], strides = [1, 1, 1]} : vector<8x16x8xf32> to vector<8x1x8xf32>
    %55 = arith.maximumf %53, %54 : vector<8x1x8xf32>
    %56 = vector.extract_strided_slice %49 {offsets = [0, 4, 0], sizes = [8, 1, 8], strides = [1, 1, 1]} : vector<8x16x8xf32> to vector<8x1x8xf32>
    %57 = vector.extract_strided_slice %49 {offsets = [0, 5, 0], sizes = [8, 1, 8], strides = [1, 1, 1]} : vector<8x16x8xf32> to vector<8x1x8xf32>
    %58 = arith.maximumf %56, %57 : vector<8x1x8xf32>
    %59 = vector.extract_strided_slice %49 {offsets = [0, 6, 0], sizes = [8, 1, 8], strides = [1, 1, 1]} : vector<8x16x8xf32> to vector<8x1x8xf32>
    %60 = vector.extract_strided_slice %49 {offsets = [0, 7, 0], sizes = [8, 1, 8], strides = [1, 1, 1]} : vector<8x16x8xf32> to vector<8x1x8xf32>
    %61 = arith.maximumf %59, %60 : vector<8x1x8xf32>
    %62 = vector.extract_strided_slice %49 {offsets = [0, 8, 0], sizes = [8, 1, 8], strides = [1, 1, 1]} : vector<8x16x8xf32> to vector<8x1x8xf32>
    %63 = vector.extract_strided_slice %49 {offsets = [0, 9, 0], sizes = [8, 1, 8], strides = [1, 1, 1]} : vector<8x16x8xf32> to vector<8x1x8xf32>
    %64 = arith.maximumf %62, %63 : vector<8x1x8xf32>
    %65 = vector.extract_strided_slice %49 {offsets = [0, 10, 0], sizes = [8, 1, 8], strides = [1, 1, 1]} : vector<8x16x8xf32> to vector<8x1x8xf32>
    %66 = vector.extract_strided_slice %49 {offsets = [0, 11, 0], sizes = [8, 1, 8], strides = [1, 1, 1]} : vector<8x16x8xf32> to vector<8x1x8xf32>
    %67 = arith.maximumf %65, %66 : vector<8x1x8xf32>
    %68 = vector.extract_strided_slice %49 {offsets = [0, 12, 0], sizes = [8, 1, 8], strides = [1, 1, 1]} : vector<8x16x8xf32> to vector<8x1x8xf32>
    %69 = vector.extract_strided_slice %49 {offsets = [0, 13, 0], sizes = [8, 1, 8], strides = [1, 1, 1]} : vector<8x16x8xf32> to vector<8x1x8xf32>
    %70 = arith.maximumf %68, %69 : vector<8x1x8xf32>
    %71 = vector.extract_strided_slice %49 {offsets = [0, 14, 0], sizes = [8, 1, 8], strides = [1, 1, 1]} : vector<8x16x8xf32> to vector<8x1x8xf32>
    %72 = vector.extract_strided_slice %49 {offsets = [0, 15, 0], sizes = [8, 1, 8], strides = [1, 1, 1]} : vector<8x16x8xf32> to vector<8x1x8xf32>
    %73 = arith.maximumf %71, %72 : vector<8x1x8xf32>
    %74 = tpu.concatenate %52, %55, %58, %61, %64, %67, %70, %73 in 1 : vector<8x1x8xf32>, vector<8x1x8xf32>, vector<8x1x8xf32>, vector<8x1x8xf32>, vector<8x1x8xf32>, vector<8x1x8xf32>, vector<8x1x8xf32>, vector<8x1x8xf32> -> vector<8x8x8xf32>
    %c0_18 = arith.constant 0 : index
    %c0_19 = arith.constant 0 : index
    %75 = vector.load %arg6[%c0_18, %c0_19] : memref<72x16xbf16, #tpu.memory_space<vmem>>, vector<72x16xbf16>
    %c0_20 = arith.constant 0 : index
    %c0_21 = arith.constant 0 : index
    %76 = vector.load %arg7[%c0_20, %c0_21] : memref<1x16xf32, #tpu.memory_space<vmem>>, vector<1x16xf32>
    %cst_22 = arith.constant 0.000000e+00 : f32
    %77 = vector.broadcast %cst_22 : f32 to vector<1x8x8xf32>
    %78 = tpu.concatenate %77, %74, %77 in 0 : vector<1x8x8xf32>, vector<8x8x8xf32>, vector<1x8x8xf32> -> vector<10x8x8xf32>
    %cst_23 = arith.constant 0.000000e+00 : f32
    %79 = vector.broadcast %cst_23 : f32 to vector<10x1x8xf32>
    %80 = vector.extract_strided_slice %78 {offsets = [0, 0, 0], sizes = [10, 7, 8], strides = [1, 1, 1]} : vector<10x8x8xf32> to vector<10x7x8xf32>
    %81 = tpu.concatenate %79, %80 in 1 : vector<10x1x8xf32>, vector<10x7x8xf32> -> vector<10x8x8xf32>
    %82 = vector.extract_strided_slice %78 {offsets = [0, 1, 0], sizes = [10, 7, 8], strides = [1, 1, 1]} : vector<10x8x8xf32> to vector<10x7x8xf32>
    %83 = tpu.concatenate %82, %79 in 1 : vector<10x7x8xf32>, vector<10x1x8xf32> -> vector<10x8x8xf32>
    %84 = tpu.concatenate %81, %78, %83 in 2 : vector<10x8x8xf32>, vector<10x8x8xf32>, vector<10x8x8xf32> -> vector<10x8x24xf32>
    %85 = vector.extract_strided_slice %84 {offsets = [0, 0, 0], sizes = [8, 8, 24], strides = [1, 1, 1]} : vector<10x8x24xf32> to vector<8x8x24xf32>
    %86 = vector.extract_strided_slice %84 {offsets = [1, 0, 0], sizes = [8, 8, 24], strides = [1, 1, 1]} : vector<10x8x24xf32> to vector<8x8x24xf32>
    %87 = vector.extract_strided_slice %84 {offsets = [2, 0, 0], sizes = [8, 8, 24], strides = [1, 1, 1]} : vector<10x8x24xf32> to vector<8x8x24xf32>
    %88 = tpu.concatenate %85, %86, %87 in 2 : vector<8x8x24xf32>, vector<8x8x24xf32>, vector<8x8x24xf32> -> vector<8x8x72xf32>
    %89 = vector.shape_cast %88 : vector<8x8x72xf32> to vector<64x72xf32>
    %90 = arith.truncf %89 : vector<64x72xf32> to vector<64x72xbf16>
    %cst_24 = arith.constant dense<0.000000e+00> : vector<64x16xf32>
    %91 = tpu.matmul %90, %75, %cst_24 {dimension_numbers = #tpu.dot_dimension_numbers<[1], [0], [0], [1], [0, 0, 1, 1], [], []>} : vector<64x72xbf16>, vector<72x16xbf16>, vector<64x16xf32> -> vector<64x16xf32>
    %92 = vector.broadcast %76 : vector<1x16xf32> to vector<64x16xf32>
    %93 = arith.addf %91, %92 : vector<64x16xf32>
    %cst_25 = arith.constant 0.000000e+00 : f32
    %94 = vector.broadcast %cst_25 : f32 to vector<64x16xf32>
    %95 = arith.maximumf %93, %94 : vector<64x16xf32>
    %96 = vector.shape_cast %95 : vector<64x16xf32> to vector<8x8x16xf32>
    %97 = vector.shape_cast %96 : vector<8x8x16xf32> to vector<4x16x16xf32>
    %98 = vector.extract_strided_slice %97 {offsets = [0, 0, 0], sizes = [4, 8, 16], strides = [1, 1, 1]} : vector<4x16x16xf32> to vector<4x8x16xf32>
    %99 = vector.extract_strided_slice %97 {offsets = [0, 8, 0], sizes = [4, 8, 16], strides = [1, 1, 1]} : vector<4x16x16xf32> to vector<4x8x16xf32>
    %100 = arith.maximumf %98, %99 : vector<4x8x16xf32>
    %101 = vector.extract_strided_slice %100 {offsets = [0, 0, 0], sizes = [4, 1, 16], strides = [1, 1, 1]} : vector<4x8x16xf32> to vector<4x1x16xf32>
    %102 = vector.extract_strided_slice %100 {offsets = [0, 1, 0], sizes = [4, 1, 16], strides = [1, 1, 1]} : vector<4x8x16xf32> to vector<4x1x16xf32>
    %103 = arith.maximumf %101, %102 : vector<4x1x16xf32>
    %104 = vector.extract_strided_slice %100 {offsets = [0, 2, 0], sizes = [4, 1, 16], strides = [1, 1, 1]} : vector<4x8x16xf32> to vector<4x1x16xf32>
    %105 = vector.extract_strided_slice %100 {offsets = [0, 3, 0], sizes = [4, 1, 16], strides = [1, 1, 1]} : vector<4x8x16xf32> to vector<4x1x16xf32>
    %106 = arith.maximumf %104, %105 : vector<4x1x16xf32>
    %107 = vector.extract_strided_slice %100 {offsets = [0, 4, 0], sizes = [4, 1, 16], strides = [1, 1, 1]} : vector<4x8x16xf32> to vector<4x1x16xf32>
    %108 = vector.extract_strided_slice %100 {offsets = [0, 5, 0], sizes = [4, 1, 16], strides = [1, 1, 1]} : vector<4x8x16xf32> to vector<4x1x16xf32>
    %109 = arith.maximumf %107, %108 : vector<4x1x16xf32>
    %110 = vector.extract_strided_slice %100 {offsets = [0, 6, 0], sizes = [4, 1, 16], strides = [1, 1, 1]} : vector<4x8x16xf32> to vector<4x1x16xf32>
    %111 = vector.extract_strided_slice %100 {offsets = [0, 7, 0], sizes = [4, 1, 16], strides = [1, 1, 1]} : vector<4x8x16xf32> to vector<4x1x16xf32>
    %112 = arith.maximumf %110, %111 : vector<4x1x16xf32>
    %113 = tpu.concatenate %103, %106, %109, %112 in 1 : vector<4x1x16xf32>, vector<4x1x16xf32>, vector<4x1x16xf32>, vector<4x1x16xf32> -> vector<4x4x16xf32>
    %114 = vector.extract_strided_slice %113 {offsets = [0, 0, 0], sizes = [4, 1, 16], strides = [1, 1, 1]} : vector<4x4x16xf32> to vector<4x1x16xf32>
    %115 = vector.extract_strided_slice %113 {offsets = [0, 1, 0], sizes = [4, 1, 16], strides = [1, 1, 1]} : vector<4x4x16xf32> to vector<4x1x16xf32>
    %116 = vector.extract_strided_slice %113 {offsets = [0, 2, 0], sizes = [4, 1, 16], strides = [1, 1, 1]} : vector<4x4x16xf32> to vector<4x1x16xf32>
    %117 = vector.extract_strided_slice %113 {offsets = [0, 3, 0], sizes = [4, 1, 16], strides = [1, 1, 1]} : vector<4x4x16xf32> to vector<4x1x16xf32>
    %118 = tpu.concatenate %114, %115, %116, %117 in 2 : vector<4x1x16xf32>, vector<4x1x16xf32>, vector<4x1x16xf32>, vector<4x1x16xf32> -> vector<4x1x64xf32>
    %119 = vector.extract_strided_slice %118 {offsets = [0, 0, 0], sizes = [1, 1, 64], strides = [1, 1, 1]} : vector<4x1x64xf32> to vector<1x1x64xf32>
    %120 = vector.extract_strided_slice %118 {offsets = [1, 0, 0], sizes = [1, 1, 64], strides = [1, 1, 1]} : vector<4x1x64xf32> to vector<1x1x64xf32>
    %121 = vector.extract_strided_slice %118 {offsets = [2, 0, 0], sizes = [1, 1, 64], strides = [1, 1, 1]} : vector<4x1x64xf32> to vector<1x1x64xf32>
    %122 = vector.extract_strided_slice %118 {offsets = [3, 0, 0], sizes = [1, 1, 64], strides = [1, 1, 1]} : vector<4x1x64xf32> to vector<1x1x64xf32>
    %123 = tpu.concatenate %119, %120, %121, %122 in 2 : vector<1x1x64xf32>, vector<1x1x64xf32>, vector<1x1x64xf32>, vector<1x1x64xf32> -> vector<1x1x256xf32>
    %124 = vector.shape_cast %123 : vector<1x1x256xf32> to vector<1x256xf32>
    %125 = arith.truncf %124 : vector<1x256xf32> to vector<1x256xbf16>
    %c0_26 = arith.constant 0 : index
    %c0_27 = arith.constant 0 : index
    %126 = vector.load %arg8[%c0_26, %c0_27] : memref<256x64xbf16, #tpu.memory_space<vmem>>, vector<256x64xbf16>
    %cst_28 = arith.constant dense<0.000000e+00> : vector<1x64xf32>
    %127 = tpu.matmul %125, %126, %cst_28 {dimension_numbers = #tpu.dot_dimension_numbers<[1], [0], [0], [1], [0, 0, 1, 1], [], []>} : vector<1x256xbf16>, vector<256x64xbf16>, vector<1x64xf32> -> vector<1x64xf32>
    %c0_29 = arith.constant 0 : index
    %c0_30 = arith.constant 0 : index
    %128 = vector.load %arg9[%c0_29, %c0_30] : memref<1x64xf32, #tpu.memory_space<vmem>>, vector<1x64xf32>
    %129 = arith.addf %127, %128 : vector<1x64xf32>
    %cst_31 = arith.constant 0.000000e+00 : f32
    %130 = vector.broadcast %cst_31 : f32 to vector<1x64xf32>
    %131 = arith.maximumf %129, %130 : vector<1x64xf32>
    %132 = arith.truncf %131 : vector<1x64xf32> to vector<1x64xbf16>
    %c0_32 = arith.constant 0 : index
    %c0_33 = arith.constant 0 : index
    %133 = vector.load %arg10[%c0_32, %c0_33] : memref<64x64xbf16, #tpu.memory_space<vmem>>, vector<64x64xbf16>
    %cst_34 = arith.constant dense<0.000000e+00> : vector<1x64xf32>
    %134 = tpu.matmul %132, %133, %cst_34 {dimension_numbers = #tpu.dot_dimension_numbers<[1], [0], [0], [1], [0, 0, 1, 1], [], []>} : vector<1x64xbf16>, vector<64x64xbf16>, vector<1x64xf32> -> vector<1x64xf32>
    %c0_35 = arith.constant 0 : index
    %c0_36 = arith.constant 0 : index
    %135 = vector.load %arg11[%c0_35, %c0_36] : memref<1x64xf32, #tpu.memory_space<vmem>>, vector<1x64xf32>
    %136 = arith.addf %134, %135 : vector<1x64xf32>
    %cst_37 = arith.constant 0.000000e+00 : f32
    %137 = vector.broadcast %cst_37 : f32 to vector<1x64xf32>
    %138 = arith.maximumf %136, %137 : vector<1x64xf32>
    %139 = arith.truncf %138 : vector<1x64xf32> to vector<1x64xbf16>
    %c0_38 = arith.constant 0 : index
    %c0_39 = arith.constant 0 : index
    %140 = vector.load %arg12[%c0_38, %c0_39] : memref<64x32xbf16, #tpu.memory_space<vmem>>, vector<64x32xbf16>
    %cst_40 = arith.constant dense<0.000000e+00> : vector<1x32xf32>
    %141 = tpu.matmul %139, %140, %cst_40 {dimension_numbers = #tpu.dot_dimension_numbers<[1], [0], [0], [1], [0, 0, 1, 1], [], []>} : vector<1x64xbf16>, vector<64x32xbf16>, vector<1x32xf32> -> vector<1x32xf32>
    %c0_41 = arith.constant 0 : index
    %c0_42 = arith.constant 0 : index
    %c0_43 = arith.constant 0 : index
    %142 = vector.load %arg13[%c0_41, %c0_42, %c0_43] : memref<1x1x32xf32, #tpu.memory_space<vmem>>, vector<1x1x32xf32>
    %143 = vector.shape_cast %142 : vector<1x1x32xf32> to vector<1x32xf32>
    %144 = vector.shape_cast %141 : vector<1x32xf32> to vector<1x1x32xf32>
    tpu.vector_store %arg13[%c0_41, %c0_42, %c0_43], %144 {strides = array<i32>} : memref<1x1x32xf32, #tpu.memory_space<vmem>>, vector<1x1x32xf32>,
    return
  }
  func.func @transform_0(%arg0: i32) -> (i32, i32, i32, i32) {
    %c0_i32 = arith.constant 0 : i32
    %c0_i32_0 = arith.constant 0 : i32
    %c0_i32_1 = arith.constant 0 : i32
    %c0_i32_2 = arith.constant 0 : i32
    return %arg0, %c0_i32, %c0_i32_0, %c0_i32_1 : i32, i32, i32, i32
  }
  func.func @transform_1(%arg0: i32) -> (i32, i32) {
    %c0_i32 = arith.constant 0 : i32
    %c0_i32_0 = arith.constant 0 : i32
    %c0_i32_1 = arith.constant 0 : i32
    return %c0_i32, %c0_i32_0 : i32, i32
  }
  func.func @transform_2(%arg0: i32) -> (i32, i32) {
    %c0_i32 = arith.constant 0 : i32
    %c0_i32_0 = arith.constant 0 : i32
    %c0_i32_1 = arith.constant 0 : i32
    return %c0_i32, %c0_i32_0 : i32, i32
  }
  func.func @transform_3(%arg0: i32) -> (i32, i32) {
    %c0_i32 = arith.constant 0 : i32
    %c0_i32_0 = arith.constant 0 : i32
    %c0_i32_1 = arith.constant 0 : i32
    return %c0_i32, %c0_i32_0 : i32, i32
  }
  func.func @transform_4(%arg0: i32) -> (i32, i32) {
    %c0_i32 = arith.constant 0 : i32
    %c0_i32_0 = arith.constant 0 : i32
    %c0_i32_1 = arith.constant 0 : i32
    return %c0_i32, %c0_i32_0 : i32, i32
  }
  func.func @transform_5(%arg0: i32) -> (i32, i32) {
    %c0_i32 = arith.constant 0 : i32
    %c0_i32_0 = arith.constant 0 : i32
    %c0_i32_1 = arith.constant 0 : i32
    return %c0_i32, %c0_i32_0 : i32, i32
  }
  func.func @transform_6(%arg0: i32) -> (i32, i32) {
    %c0_i32 = arith.constant 0 : i32
    %c0_i32_0 = arith.constant 0 : i32
    %c0_i32_1 = arith.constant 0 : i32
    return %c0_i32, %c0_i32_0 : i32, i32
  }
  func.func @transform_7(%arg0: i32) -> (i32, i32) {
    %c0_i32 = arith.constant 0 : i32
    %c0_i32_0 = arith.constant 0 : i32
    %c0_i32_1 = arith.constant 0 : i32
    return %c0_i32, %c0_i32_0 : i32, i32
  }
  func.func @transform_8(%arg0: i32) -> (i32, i32) {
    %c0_i32 = arith.constant 0 : i32
    %c0_i32_0 = arith.constant 0 : i32
    %c0_i32_1 = arith.constant 0 : i32
    return %c0_i32, %c0_i32_0 : i32, i32
  }
  func.func @transform_9(%arg0: i32) -> (i32, i32) {
    %c0_i32 = arith.constant 0 : i32
    %c0_i32_0 = arith.constant 0 : i32
    %c0_i32_1 = arith.constant 0 : i32
    return %c0_i32, %c0_i32_0 : i32, i32
  }
  func.func @transform_10(%arg0: i32) -> (i32, i32) {
    %c0_i32 = arith.constant 0 : i32
    %c0_i32_0 = arith.constant 0 : i32
    %c0_i32_1 = arith.constant 0 : i32
    return %c0_i32, %c0_i32_0 : i32, i32
  }
  func.func @transform_11(%arg0: i32) -> (i32, i32) {
    %c0_i32 = arith.constant 0 : i32
    %c0_i32_0 = arith.constant 0 : i32
    %c0_i32_1 = arith.constant 0 : i32
    return %c0_i32, %c0_i32_0 : i32, i32
  }
  func.func @transform_12(%arg0: i32) -> (i32, i32, i32) {
    %c0_i32 = arith.constant 0 : i32
    %c0_i32_0 = arith.constant 0 : i32
    %c0_i32_1 = arith.constant 0 : i32
    return %arg0, %c0_i32, %c0_i32_0 : i32, i32, i32
  }
}

module attributes {stable_mosaic.version = 11 : i64} {
  func.func @_gru_kernel(%arg0: memref<64x32xf32, #tpu.memory_space<vmem>>, %arg1: memref<32x384xbf16, #tpu.memory_space<vmem>>, %arg2: memref<1x384xf32, #tpu.memory_space<vmem>>, %arg3: memref<128x384xbf16, #tpu.memory_space<vmem>>, %arg4: memref<1x384xf32, #tpu.memory_space<vmem>>, %arg5: memref<2x32xf32, #tpu.memory_space<vmem>>) attributes {dimension_semantics = [], scalar_prefetch = 0 : i64, scratch_operands = 0 : i64, tpu.core_type = #tpu.core_type<tc>} {
    %c0 = arith.constant 0 : index
    %c0_0 = arith.constant 0 : index
    %0 = vector.load %arg0[%c0, %c0_0] : memref<64x32xf32, #tpu.memory_space<vmem>>, vector<64x32xf32>
    %1 = arith.truncf %0 : vector<64x32xf32> to vector<64x32xbf16>
    %c0_1 = arith.constant 0 : index
    %c0_2 = arith.constant 0 : index
    %2 = vector.load %arg1[%c0_1, %c0_2] : memref<32x384xbf16, #tpu.memory_space<vmem>>, vector<32x384xbf16>
    %cst = arith.constant dense<0.000000e+00> : vector<64x384xf32>
    %3 = tpu.matmul %1, %2, %cst {dimension_numbers = #tpu.dot_dimension_numbers<[1], [0], [0], [1], [0, 0, 1, 1], [], []>} : vector<64x32xbf16>, vector<32x384xbf16>, vector<64x384xf32> -> vector<64x384xf32>
    %c0_3 = arith.constant 0 : index
    %c0_4 = arith.constant 0 : index
    %4 = vector.load %arg2[%c0_3, %c0_4] : memref<1x384xf32, #tpu.memory_space<vmem>>, vector<1x384xf32>
    %5 = vector.broadcast %4 : vector<1x384xf32> to vector<64x384xf32>
    %6 = arith.addf %3, %5 : vector<64x384xf32>
    %c0_5 = arith.constant 0 : index
    %c0_6 = arith.constant 0 : index
    %7 = vector.load %arg3[%c0_5, %c0_6] : memref<128x384xbf16, #tpu.memory_space<vmem>>, vector<128x384xbf16>
    %c0_7 = arith.constant 0 : index
    %c0_8 = arith.constant 0 : index
    %8 = vector.load %arg4[%c0_7, %c0_8] : memref<1x384xf32, #tpu.memory_space<vmem>>, vector<1x384xf32>
    %cst_9 = arith.constant 0.000000e+00 : f32
    %9 = vector.broadcast %cst_9 : f32 to vector<8x128xf32>
    %10 = arith.truncf %9 : vector<8x128xf32> to vector<8x128xbf16>
    %cst_10 = arith.constant dense<0.000000e+00> : vector<8x384xf32>
    %11 = tpu.matmul %10, %7, %cst_10 {dimension_numbers = #tpu.dot_dimension_numbers<[1], [0], [0], [1], [0, 0, 1, 1], [], []>} : vector<8x128xbf16>, vector<128x384xbf16>, vector<8x384xf32> -> vector<8x384xf32>
    %12 = vector.broadcast %8 : vector<1x384xf32> to vector<8x384xf32>
    %13 = arith.addf %11, %12 : vector<8x384xf32>
    %14 = vector.extract_strided_slice %6 {offsets = [0, 0], sizes = [8, 384], strides = [1, 1]} : vector<64x384xf32> to vector<8x384xf32>
    %15 = vector.extract_strided_slice %14 {offsets = [0, 0], sizes = [8, 128], strides = [1, 1]} : vector<8x384xf32> to vector<8x128xf32>
    %16 = vector.extract_strided_slice %13 {offsets = [0, 0], sizes = [8, 128], strides = [1, 1]} : vector<8x384xf32> to vector<8x128xf32>
    %17 = arith.addf %15, %16 : vector<8x128xf32>
    %cst_11 = arith.constant 0.000000e+00 : f32
    %18 = vector.broadcast %cst_11 : f32 to vector<8x128xf32>
    %19 = arith.subf %18, %17 : vector<8x128xf32>
    %20 = math.exp %19 : vector<8x128xf32>
    %cst_12 = arith.constant 1.000000e+00 : f32
    %21 = vector.broadcast %cst_12 : f32 to vector<8x128xf32>
    %22 = arith.addf %21, %20 : vector<8x128xf32>
    %cst_13 = arith.constant 1.000000e+00 : f32
    %23 = vector.broadcast %cst_13 : f32 to vector<8x128xf32>
    %24 = arith.divf %23, %22 : vector<8x128xf32>
    %25 = vector.extract_strided_slice %14 {offsets = [0, 128], sizes = [8, 128], strides = [1, 1]} : vector<8x384xf32> to vector<8x128xf32>
    %26 = vector.extract_strided_slice %13 {offsets = [0, 128], sizes = [8, 128], strides = [1, 1]} : vector<8x384xf32> to vector<8x128xf32>
    %27 = arith.addf %25, %26 : vector<8x128xf32>
    %cst_14 = arith.constant 0.000000e+00 : f32
    %28 = vector.broadcast %cst_14 : f32 to vector<8x128xf32>
    %29 = arith.subf %28, %27 : vector<8x128xf32>
    %30 = math.exp %29 : vector<8x128xf32>
    %cst_15 = arith.constant 1.000000e+00 : f32
    %31 = vector.broadcast %cst_15 : f32 to vector<8x128xf32>
    %32 = arith.addf %31, %30 : vector<8x128xf32>
    %cst_16 = arith.constant 1.000000e+00 : f32
    %33 = vector.broadcast %cst_16 : f32 to vector<8x128xf32>
    %34 = arith.divf %33, %32 : vector<8x128xf32>
    %35 = vector.extract_strided_slice %14 {offsets = [0, 256], sizes = [8, 128], strides = [1, 1]} : vector<8x384xf32> to vector<8x128xf32>
    %36 = vector.extract_strided_slice %13 {offsets = [0, 256], sizes = [8, 128], strides = [1, 1]} : vector<8x384xf32> to vector<8x128xf32>
    %37 = arith.mulf %24, %36 : vector<8x128xf32>
    %38 = arith.addf %35, %37 : vector<8x128xf32>
    %39 = math.tanh %38 : vector<8x128xf32>
    %cst_17 = arith.constant 1.000000e+00 : f32
    %40 = vector.broadcast %cst_17 : f32 to vector<8x128xf32>
    %41 = arith.subf %40, %34 : vector<8x128xf32>
    %42 = arith.mulf %41, %39 : vector<8x128xf32>
    %43 = arith.mulf %34, %9 : vector<8x128xf32>
    %44 = arith.addf %42, %43 : vector<8x128xf32>
    %45 = arith.truncf %44 : vector<8x128xf32> to vector<8x128xbf16>
    %cst_18 = arith.constant dense<0.000000e+00> : vector<8x384xf32>
    %46 = tpu.matmul %45, %7, %cst_18 {dimension_numbers = #tpu.dot_dimension_numbers<[1], [0], [0], [1], [0, 0, 1, 1], [], []>} : vector<8x128xbf16>, vector<128x384xbf16>, vector<8x384xf32> -> vector<8x384xf32>
    %47 = vector.broadcast %8 : vector<1x384xf32> to vector<8x384xf32>
    %48 = arith.addf %46, %47 : vector<8x384xf32>
    %49 = vector.extract_strided_slice %6 {offsets = [8, 0], sizes = [8, 384], strides = [1, 1]} : vector<64x384xf32> to vector<8x384xf32>
    %50 = vector.extract_strided_slice %49 {offsets = [0, 0], sizes = [8, 128], strides = [1, 1]} : vector<8x384xf32> to vector<8x128xf32>
    %51 = vector.extract_strided_slice %48 {offsets = [0, 0], sizes = [8, 128], strides = [1, 1]} : vector<8x384xf32> to vector<8x128xf32>
    %52 = arith.addf %50, %51 : vector<8x128xf32>
    %cst_19 = arith.constant 0.000000e+00 : f32
    %53 = vector.broadcast %cst_19 : f32 to vector<8x128xf32>
    %54 = arith.subf %53, %52 : vector<8x128xf32>
    %55 = math.exp %54 : vector<8x128xf32>
    %cst_20 = arith.constant 1.000000e+00 : f32
    %56 = vector.broadcast %cst_20 : f32 to vector<8x128xf32>
    %57 = arith.addf %56, %55 : vector<8x128xf32>
    %cst_21 = arith.constant 1.000000e+00 : f32
    %58 = vector.broadcast %cst_21 : f32 to vector<8x128xf32>
    %59 = arith.divf %58, %57 : vector<8x128xf32>
    %60 = vector.extract_strided_slice %49 {offsets = [0, 128], sizes = [8, 128], strides = [1, 1]} : vector<8x384xf32> to vector<8x128xf32>
    %61 = vector.extract_strided_slice %48 {offsets = [0, 128], sizes = [8, 128], strides = [1, 1]} : vector<8x384xf32> to vector<8x128xf32>
    %62 = arith.addf %60, %61 : vector<8x128xf32>
    %cst_22 = arith.constant 0.000000e+00 : f32
    %63 = vector.broadcast %cst_22 : f32 to vector<8x128xf32>
    %64 = arith.subf %63, %62 : vector<8x128xf32>
    %65 = math.exp %64 : vector<8x128xf32>
    %cst_23 = arith.constant 1.000000e+00 : f32
    %66 = vector.broadcast %cst_23 : f32 to vector<8x128xf32>
    %67 = arith.addf %66, %65 : vector<8x128xf32>
    %cst_24 = arith.constant 1.000000e+00 : f32
    %68 = vector.broadcast %cst_24 : f32 to vector<8x128xf32>
    %69 = arith.divf %68, %67 : vector<8x128xf32>
    %70 = vector.extract_strided_slice %49 {offsets = [0, 256], sizes = [8, 128], strides = [1, 1]} : vector<8x384xf32> to vector<8x128xf32>
    %71 = vector.extract_strided_slice %48 {offsets = [0, 256], sizes = [8, 128], strides = [1, 1]} : vector<8x384xf32> to vector<8x128xf32>
    %72 = arith.mulf %59, %71 : vector<8x128xf32>
    %73 = arith.addf %70, %72 : vector<8x128xf32>
    %74 = math.tanh %73 : vector<8x128xf32>
    %cst_25 = arith.constant 1.000000e+00 : f32
    %75 = vector.broadcast %cst_25 : f32 to vector<8x128xf32>
    %76 = arith.subf %75, %69 : vector<8x128xf32>
    %77 = arith.mulf %76, %74 : vector<8x128xf32>
    %78 = arith.mulf %69, %44 : vector<8x128xf32>
    %79 = arith.addf %77, %78 : vector<8x128xf32>
    %80 = arith.truncf %79 : vector<8x128xf32> to vector<8x128xbf16>
    %cst_26 = arith.constant dense<0.000000e+00> : vector<8x384xf32>
    %81 = tpu.matmul %80, %7, %cst_26 {dimension_numbers = #tpu.dot_dimension_numbers<[1], [0], [0], [1], [0, 0, 1, 1], [], []>} : vector<8x128xbf16>, vector<128x384xbf16>, vector<8x384xf32> -> vector<8x384xf32>
    %82 = vector.broadcast %8 : vector<1x384xf32> to vector<8x384xf32>
    %83 = arith.addf %81, %82 : vector<8x384xf32>
    %84 = vector.extract_strided_slice %6 {offsets = [16, 0], sizes = [8, 384], strides = [1, 1]} : vector<64x384xf32> to vector<8x384xf32>
    %85 = vector.extract_strided_slice %84 {offsets = [0, 0], sizes = [8, 128], strides = [1, 1]} : vector<8x384xf32> to vector<8x128xf32>
    %86 = vector.extract_strided_slice %83 {offsets = [0, 0], sizes = [8, 128], strides = [1, 1]} : vector<8x384xf32> to vector<8x128xf32>
    %87 = arith.addf %85, %86 : vector<8x128xf32>
    %cst_27 = arith.constant 0.000000e+00 : f32
    %88 = vector.broadcast %cst_27 : f32 to vector<8x128xf32>
    %89 = arith.subf %88, %87 : vector<8x128xf32>
    %90 = math.exp %89 : vector<8x128xf32>
    %cst_28 = arith.constant 1.000000e+00 : f32
    %91 = vector.broadcast %cst_28 : f32 to vector<8x128xf32>
    %92 = arith.addf %91, %90 : vector<8x128xf32>
    %cst_29 = arith.constant 1.000000e+00 : f32
    %93 = vector.broadcast %cst_29 : f32 to vector<8x128xf32>
    %94 = arith.divf %93, %92 : vector<8x128xf32>
    %95 = vector.extract_strided_slice %84 {offsets = [0, 128], sizes = [8, 128], strides = [1, 1]} : vector<8x384xf32> to vector<8x128xf32>
    %96 = vector.extract_strided_slice %83 {offsets = [0, 128], sizes = [8, 128], strides = [1, 1]} : vector<8x384xf32> to vector<8x128xf32>
    %97 = arith.addf %95, %96 : vector<8x128xf32>
    %cst_30 = arith.constant 0.000000e+00 : f32
    %98 = vector.broadcast %cst_30 : f32 to vector<8x128xf32>
    %99 = arith.subf %98, %97 : vector<8x128xf32>
    %100 = math.exp %99 : vector<8x128xf32>
    %cst_31 = arith.constant 1.000000e+00 : f32
    %101 = vector.broadcast %cst_31 : f32 to vector<8x128xf32>
    %102 = arith.addf %101, %100 : vector<8x128xf32>
    %cst_32 = arith.constant 1.000000e+00 : f32
    %103 = vector.broadcast %cst_32 : f32 to vector<8x128xf32>
    %104 = arith.divf %103, %102 : vector<8x128xf32>
    %105 = vector.extract_strided_slice %84 {offsets = [0, 256], sizes = [8, 128], strides = [1, 1]} : vector<8x384xf32> to vector<8x128xf32>
    %106 = vector.extract_strided_slice %83 {offsets = [0, 256], sizes = [8, 128], strides = [1, 1]} : vector<8x384xf32> to vector<8x128xf32>
    %107 = arith.mulf %94, %106 : vector<8x128xf32>
    %108 = arith.addf %105, %107 : vector<8x128xf32>
    %109 = math.tanh %108 : vector<8x128xf32>
    %cst_33 = arith.constant 1.000000e+00 : f32
    %110 = vector.broadcast %cst_33 : f32 to vector<8x128xf32>
    %111 = arith.subf %110, %104 : vector<8x128xf32>
    %112 = arith.mulf %111, %109 : vector<8x128xf32>
    %113 = arith.mulf %104, %79 : vector<8x128xf32>
    %114 = arith.addf %112, %113 : vector<8x128xf32>
    %115 = arith.truncf %114 : vector<8x128xf32> to vector<8x128xbf16>
    %cst_34 = arith.constant dense<0.000000e+00> : vector<8x384xf32>
    %116 = tpu.matmul %115, %7, %cst_34 {dimension_numbers = #tpu.dot_dimension_numbers<[1], [0], [0], [1], [0, 0, 1, 1], [], []>} : vector<8x128xbf16>, vector<128x384xbf16>, vector<8x384xf32> -> vector<8x384xf32>
    %117 = vector.broadcast %8 : vector<1x384xf32> to vector<8x384xf32>
    %118 = arith.addf %116, %117 : vector<8x384xf32>
    %119 = vector.extract_strided_slice %6 {offsets = [24, 0], sizes = [8, 384], strides = [1, 1]} : vector<64x384xf32> to vector<8x384xf32>
    %120 = vector.extract_strided_slice %119 {offsets = [0, 0], sizes = [8, 128], strides = [1, 1]} : vector<8x384xf32> to vector<8x128xf32>
    %121 = vector.extract_strided_slice %118 {offsets = [0, 0], sizes = [8, 128], strides = [1, 1]} : vector<8x384xf32> to vector<8x128xf32>
    %122 = arith.addf %120, %121 : vector<8x128xf32>
    %cst_35 = arith.constant 0.000000e+00 : f32
    %123 = vector.broadcast %cst_35 : f32 to vector<8x128xf32>
    %124 = arith.subf %123, %122 : vector<8x128xf32>
    %125 = math.exp %124 : vector<8x128xf32>
    %cst_36 = arith.constant 1.000000e+00 : f32
    %126 = vector.broadcast %cst_36 : f32 to vector<8x128xf32>
    %127 = arith.addf %126, %125 : vector<8x128xf32>
    %cst_37 = arith.constant 1.000000e+00 : f32
    %128 = vector.broadcast %cst_37 : f32 to vector<8x128xf32>
    %129 = arith.divf %128, %127 : vector<8x128xf32>
    %130 = vector.extract_strided_slice %119 {offsets = [0, 128], sizes = [8, 128], strides = [1, 1]} : vector<8x384xf32> to vector<8x128xf32>
    %131 = vector.extract_strided_slice %118 {offsets = [0, 128], sizes = [8, 128], strides = [1, 1]} : vector<8x384xf32> to vector<8x128xf32>
    %132 = arith.addf %130, %131 : vector<8x128xf32>
    %cst_38 = arith.constant 0.000000e+00 : f32
    %133 = vector.broadcast %cst_38 : f32 to vector<8x128xf32>
    %134 = arith.subf %133, %132 : vector<8x128xf32>
    %135 = math.exp %134 : vector<8x128xf32>
    %cst_39 = arith.constant 1.000000e+00 : f32
    %136 = vector.broadcast %cst_39 : f32 to vector<8x128xf32>
    %137 = arith.addf %136, %135 : vector<8x128xf32>
    %cst_40 = arith.constant 1.000000e+00 : f32
    %138 = vector.broadcast %cst_40 : f32 to vector<8x128xf32>
    %139 = arith.divf %138, %137 : vector<8x128xf32>
    %140 = vector.extract_strided_slice %119 {offsets = [0, 256], sizes = [8, 128], strides = [1, 1]} : vector<8x384xf32> to vector<8x128xf32>
    %141 = vector.extract_strided_slice %118 {offsets = [0, 256], sizes = [8, 128], strides = [1, 1]} : vector<8x384xf32> to vector<8x128xf32>
    %142 = arith.mulf %129, %141 : vector<8x128xf32>
    %143 = arith.addf %140, %142 : vector<8x128xf32>
    %144 = math.tanh %143 : vector<8x128xf32>
    %cst_41 = arith.constant 1.000000e+00 : f32
    %145 = vector.broadcast %cst_41 : f32 to vector<8x128xf32>
    %146 = arith.subf %145, %139 : vector<8x128xf32>
    %147 = arith.mulf %146, %144 : vector<8x128xf32>
    %148 = arith.mulf %139, %114 : vector<8x128xf32>
    %149 = arith.addf %147, %148 : vector<8x128xf32>
    %150 = arith.truncf %149 : vector<8x128xf32> to vector<8x128xbf16>
    %cst_42 = arith.constant dense<0.000000e+00> : vector<8x384xf32>
    %151 = tpu.matmul %150, %7, %cst_42 {dimension_numbers = #tpu.dot_dimension_numbers<[1], [0], [0], [1], [0, 0, 1, 1], [], []>} : vector<8x128xbf16>, vector<128x384xbf16>, vector<8x384xf32> -> vector<8x384xf32>
    %152 = vector.broadcast %8 : vector<1x384xf32> to vector<8x384xf32>
    %153 = arith.addf %151, %152 : vector<8x384xf32>
    %154 = vector.extract_strided_slice %6 {offsets = [32, 0], sizes = [8, 384], strides = [1, 1]} : vector<64x384xf32> to vector<8x384xf32>
    %155 = vector.extract_strided_slice %154 {offsets = [0, 0], sizes = [8, 128], strides = [1, 1]} : vector<8x384xf32> to vector<8x128xf32>
    %156 = vector.extract_strided_slice %153 {offsets = [0, 0], sizes = [8, 128], strides = [1, 1]} : vector<8x384xf32> to vector<8x128xf32>
    %157 = arith.addf %155, %156 : vector<8x128xf32>
    %cst_43 = arith.constant 0.000000e+00 : f32
    %158 = vector.broadcast %cst_43 : f32 to vector<8x128xf32>
    %159 = arith.subf %158, %157 : vector<8x128xf32>
    %160 = math.exp %159 : vector<8x128xf32>
    %cst_44 = arith.constant 1.000000e+00 : f32
    %161 = vector.broadcast %cst_44 : f32 to vector<8x128xf32>
    %162 = arith.addf %161, %160 : vector<8x128xf32>
    %cst_45 = arith.constant 1.000000e+00 : f32
    %163 = vector.broadcast %cst_45 : f32 to vector<8x128xf32>
    %164 = arith.divf %163, %162 : vector<8x128xf32>
    %165 = vector.extract_strided_slice %154 {offsets = [0, 128], sizes = [8, 128], strides = [1, 1]} : vector<8x384xf32> to vector<8x128xf32>
    %166 = vector.extract_strided_slice %153 {offsets = [0, 128], sizes = [8, 128], strides = [1, 1]} : vector<8x384xf32> to vector<8x128xf32>
    %167 = arith.addf %165, %166 : vector<8x128xf32>
    %cst_46 = arith.constant 0.000000e+00 : f32
    %168 = vector.broadcast %cst_46 : f32 to vector<8x128xf32>
    %169 = arith.subf %168, %167 : vector<8x128xf32>
    %170 = math.exp %169 : vector<8x128xf32>
    %cst_47 = arith.constant 1.000000e+00 : f32
    %171 = vector.broadcast %cst_47 : f32 to vector<8x128xf32>
    %172 = arith.addf %171, %170 : vector<8x128xf32>
    %cst_48 = arith.constant 1.000000e+00 : f32
    %173 = vector.broadcast %cst_48 : f32 to vector<8x128xf32>
    %174 = arith.divf %173, %172 : vector<8x128xf32>
    %175 = vector.extract_strided_slice %154 {offsets = [0, 256], sizes = [8, 128], strides = [1, 1]} : vector<8x384xf32> to vector<8x128xf32>
    %176 = vector.extract_strided_slice %153 {offsets = [0, 256], sizes = [8, 128], strides = [1, 1]} : vector<8x384xf32> to vector<8x128xf32>
    %177 = arith.mulf %164, %176 : vector<8x128xf32>
    %178 = arith.addf %175, %177 : vector<8x128xf32>
    %179 = math.tanh %178 : vector<8x128xf32>
    %cst_49 = arith.constant 1.000000e+00 : f32
    %180 = vector.broadcast %cst_49 : f32 to vector<8x128xf32>
    %181 = arith.subf %180, %174 : vector<8x128xf32>
    %182 = arith.mulf %181, %179 : vector<8x128xf32>
    %183 = arith.mulf %174, %149 : vector<8x128xf32>
    %184 = arith.addf %182, %183 : vector<8x128xf32>
    %185 = arith.truncf %184 : vector<8x128xf32> to vector<8x128xbf16>
    %cst_50 = arith.constant dense<0.000000e+00> : vector<8x384xf32>
    %186 = tpu.matmul %185, %7, %cst_50 {dimension_numbers = #tpu.dot_dimension_numbers<[1], [0], [0], [1], [0, 0, 1, 1], [], []>} : vector<8x128xbf16>, vector<128x384xbf16>, vector<8x384xf32> -> vector<8x384xf32>
    %187 = vector.broadcast %8 : vector<1x384xf32> to vector<8x384xf32>
    %188 = arith.addf %186, %187 : vector<8x384xf32>
    %189 = vector.extract_strided_slice %6 {offsets = [40, 0], sizes = [8, 384], strides = [1, 1]} : vector<64x384xf32> to vector<8x384xf32>
    %190 = vector.extract_strided_slice %189 {offsets = [0, 0], sizes = [8, 128], strides = [1, 1]} : vector<8x384xf32> to vector<8x128xf32>
    %191 = vector.extract_strided_slice %188 {offsets = [0, 0], sizes = [8, 128], strides = [1, 1]} : vector<8x384xf32> to vector<8x128xf32>
    %192 = arith.addf %190, %191 : vector<8x128xf32>
    %cst_51 = arith.constant 0.000000e+00 : f32
    %193 = vector.broadcast %cst_51 : f32 to vector<8x128xf32>
    %194 = arith.subf %193, %192 : vector<8x128xf32>
    %195 = math.exp %194 : vector<8x128xf32>
    %cst_52 = arith.constant 1.000000e+00 : f32
    %196 = vector.broadcast %cst_52 : f32 to vector<8x128xf32>
    %197 = arith.addf %196, %195 : vector<8x128xf32>
    %cst_53 = arith.constant 1.000000e+00 : f32
    %198 = vector.broadcast %cst_53 : f32 to vector<8x128xf32>
    %199 = arith.divf %198, %197 : vector<8x128xf32>
    %200 = vector.extract_strided_slice %189 {offsets = [0, 128], sizes = [8, 128], strides = [1, 1]} : vector<8x384xf32> to vector<8x128xf32>
    %201 = vector.extract_strided_slice %188 {offsets = [0, 128], sizes = [8, 128], strides = [1, 1]} : vector<8x384xf32> to vector<8x128xf32>
    %202 = arith.addf %200, %201 : vector<8x128xf32>
    %cst_54 = arith.constant 0.000000e+00 : f32
    %203 = vector.broadcast %cst_54 : f32 to vector<8x128xf32>
    %204 = arith.subf %203, %202 : vector<8x128xf32>
    %205 = math.exp %204 : vector<8x128xf32>
    %cst_55 = arith.constant 1.000000e+00 : f32
    %206 = vector.broadcast %cst_55 : f32 to vector<8x128xf32>
    %207 = arith.addf %206, %205 : vector<8x128xf32>
    %cst_56 = arith.constant 1.000000e+00 : f32
    %208 = vector.broadcast %cst_56 : f32 to vector<8x128xf32>
    %209 = arith.divf %208, %207 : vector<8x128xf32>
    %210 = vector.extract_strided_slice %189 {offsets = [0, 256], sizes = [8, 128], strides = [1, 1]} : vector<8x384xf32> to vector<8x128xf32>
    %211 = vector.extract_strided_slice %188 {offsets = [0, 256], sizes = [8, 128], strides = [1, 1]} : vector<8x384xf32> to vector<8x128xf32>
    %212 = arith.mulf %199, %211 : vector<8x128xf32>
    %213 = arith.addf %210, %212 : vector<8x128xf32>
    %214 = math.tanh %213 : vector<8x128xf32>
    %cst_57 = arith.constant 1.000000e+00 : f32
    %215 = vector.broadcast %cst_57 : f32 to vector<8x128xf32>
    %216 = arith.subf %215, %209 : vector<8x128xf32>
    %217 = arith.mulf %216, %214 : vector<8x128xf32>
    %218 = arith.mulf %209, %184 : vector<8x128xf32>
    %219 = arith.addf %217, %218 : vector<8x128xf32>
    %220 = arith.truncf %219 : vector<8x128xf32> to vector<8x128xbf16>
    %cst_58 = arith.constant dense<0.000000e+00> : vector<8x384xf32>
    %221 = tpu.matmul %220, %7, %cst_58 {dimension_numbers = #tpu.dot_dimension_numbers<[1], [0], [0], [1], [0, 0, 1, 1], [], []>} : vector<8x128xbf16>, vector<128x384xbf16>, vector<8x384xf32> -> vector<8x384xf32>
    %222 = vector.broadcast %8 : vector<1x384xf32> to vector<8x384xf32>
    %223 = arith.addf %221, %222 : vector<8x384xf32>
    %224 = vector.extract_strided_slice %6 {offsets = [48, 0], sizes = [8, 384], strides = [1, 1]} : vector<64x384xf32> to vector<8x384xf32>
    %225 = vector.extract_strided_slice %224 {offsets = [0, 0], sizes = [8, 128], strides = [1, 1]} : vector<8x384xf32> to vector<8x128xf32>
    %226 = vector.extract_strided_slice %223 {offsets = [0, 0], sizes = [8, 128], strides = [1, 1]} : vector<8x384xf32> to vector<8x128xf32>
    %227 = arith.addf %225, %226 : vector<8x128xf32>
    %cst_59 = arith.constant 0.000000e+00 : f32
    %228 = vector.broadcast %cst_59 : f32 to vector<8x128xf32>
    %229 = arith.subf %228, %227 : vector<8x128xf32>
    %230 = math.exp %229 : vector<8x128xf32>
    %cst_60 = arith.constant 1.000000e+00 : f32
    %231 = vector.broadcast %cst_60 : f32 to vector<8x128xf32>
    %232 = arith.addf %231, %230 : vector<8x128xf32>
    %cst_61 = arith.constant 1.000000e+00 : f32
    %233 = vector.broadcast %cst_61 : f32 to vector<8x128xf32>
    %234 = arith.divf %233, %232 : vector<8x128xf32>
    %235 = vector.extract_strided_slice %224 {offsets = [0, 128], sizes = [8, 128], strides = [1, 1]} : vector<8x384xf32> to vector<8x128xf32>
    %236 = vector.extract_strided_slice %223 {offsets = [0, 128], sizes = [8, 128], strides = [1, 1]} : vector<8x384xf32> to vector<8x128xf32>
    %237 = arith.addf %235, %236 : vector<8x128xf32>
    %cst_62 = arith.constant 0.000000e+00 : f32
    %238 = vector.broadcast %cst_62 : f32 to vector<8x128xf32>
    %239 = arith.subf %238, %237 : vector<8x128xf32>
    %240 = math.exp %239 : vector<8x128xf32>
    %cst_63 = arith.constant 1.000000e+00 : f32
    %241 = vector.broadcast %cst_63 : f32 to vector<8x128xf32>
    %242 = arith.addf %241, %240 : vector<8x128xf32>
    %cst_64 = arith.constant 1.000000e+00 : f32
    %243 = vector.broadcast %cst_64 : f32 to vector<8x128xf32>
    %244 = arith.divf %243, %242 : vector<8x128xf32>
    %245 = vector.extract_strided_slice %224 {offsets = [0, 256], sizes = [8, 128], strides = [1, 1]} : vector<8x384xf32> to vector<8x128xf32>
    %246 = vector.extract_strided_slice %223 {offsets = [0, 256], sizes = [8, 128], strides = [1, 1]} : vector<8x384xf32> to vector<8x128xf32>
    %247 = arith.mulf %234, %246 : vector<8x128xf32>
    %248 = arith.addf %245, %247 : vector<8x128xf32>
    %249 = math.tanh %248 : vector<8x128xf32>
    %cst_65 = arith.constant 1.000000e+00 : f32
    %250 = vector.broadcast %cst_65 : f32 to vector<8x128xf32>
    %251 = arith.subf %250, %244 : vector<8x128xf32>
    %252 = arith.mulf %251, %249 : vector<8x128xf32>
    %253 = arith.mulf %244, %219 : vector<8x128xf32>
    %254 = arith.addf %252, %253 : vector<8x128xf32>
    %255 = arith.truncf %254 : vector<8x128xf32> to vector<8x128xbf16>
    %cst_66 = arith.constant dense<0.000000e+00> : vector<8x384xf32>
    %256 = tpu.matmul %255, %7, %cst_66 {dimension_numbers = #tpu.dot_dimension_numbers<[1], [0], [0], [1], [0, 0, 1, 1], [], []>} : vector<8x128xbf16>, vector<128x384xbf16>, vector<8x384xf32> -> vector<8x384xf32>
    %257 = vector.broadcast %8 : vector<1x384xf32> to vector<8x384xf32>
    %258 = arith.addf %256, %257 : vector<8x384xf32>
    %259 = vector.extract_strided_slice %6 {offsets = [56, 0], sizes = [8, 384], strides = [1, 1]} : vector<64x384xf32> to vector<8x384xf32>
    %260 = vector.extract_strided_slice %259 {offsets = [0, 0], sizes = [8, 128], strides = [1, 1]} : vector<8x384xf32> to vector<8x128xf32>
    %261 = vector.extract_strided_slice %258 {offsets = [0, 0], sizes = [8, 128], strides = [1, 1]} : vector<8x384xf32> to vector<8x128xf32>
    %262 = arith.addf %260, %261 : vector<8x128xf32>
    %cst_67 = arith.constant 0.000000e+00 : f32
    %263 = vector.broadcast %cst_67 : f32 to vector<8x128xf32>
    %264 = arith.subf %263, %262 : vector<8x128xf32>
    %265 = math.exp %264 : vector<8x128xf32>
    %cst_68 = arith.constant 1.000000e+00 : f32
    %266 = vector.broadcast %cst_68 : f32 to vector<8x128xf32>
    %267 = arith.addf %266, %265 : vector<8x128xf32>
    %cst_69 = arith.constant 1.000000e+00 : f32
    %268 = vector.broadcast %cst_69 : f32 to vector<8x128xf32>
    %269 = arith.divf %268, %267 : vector<8x128xf32>
    %270 = vector.extract_strided_slice %259 {offsets = [0, 128], sizes = [8, 128], strides = [1, 1]} : vector<8x384xf32> to vector<8x128xf32>
    %271 = vector.extract_strided_slice %258 {offsets = [0, 128], sizes = [8, 128], strides = [1, 1]} : vector<8x384xf32> to vector<8x128xf32>
    %272 = arith.addf %270, %271 : vector<8x128xf32>
    %cst_70 = arith.constant 0.000000e+00 : f32
    %273 = vector.broadcast %cst_70 : f32 to vector<8x128xf32>
    %274 = arith.subf %273, %272 : vector<8x128xf32>
    %275 = math.exp %274 : vector<8x128xf32>
    %cst_71 = arith.constant 1.000000e+00 : f32
    %276 = vector.broadcast %cst_71 : f32 to vector<8x128xf32>
    %277 = arith.addf %276, %275 : vector<8x128xf32>
    %cst_72 = arith.constant 1.000000e+00 : f32
    %278 = vector.broadcast %cst_72 : f32 to vector<8x128xf32>
    %279 = arith.divf %278, %277 : vector<8x128xf32>
    %280 = vector.extract_strided_slice %259 {offsets = [0, 256], sizes = [8, 128], strides = [1, 1]} : vector<8x384xf32> to vector<8x128xf32>
    %281 = vector.extract_strided_slice %258 {offsets = [0, 256], sizes = [8, 128], strides = [1, 1]} : vector<8x384xf32> to vector<8x128xf32>
    %282 = arith.mulf %269, %281 : vector<8x128xf32>
    %283 = arith.addf %280, %282 : vector<8x128xf32>
    %284 = math.tanh %283 : vector<8x128xf32>
    %cst_73 = arith.constant 1.000000e+00 : f32
    %285 = vector.broadcast %cst_73 : f32 to vector<8x128xf32>
    %286 = arith.subf %285, %279 : vector<8x128xf32>
    %287 = arith.mulf %286, %284 : vector<8x128xf32>
    %288 = arith.mulf %279, %254 : vector<8x128xf32>
    %289 = arith.addf %287, %288 : vector<8x128xf32>
    %290 = vector.extract_strided_slice %289 {offsets = [0, 0], sizes = [2, 32], strides = [1, 1]} : vector<8x128xf32> to vector<2x32xf32>
    %c0_74 = arith.constant 0 : index
    %c0_75 = arith.constant 0 : index
    %291 = vector.load %arg5[%c0_74, %c0_75] : memref<2x32xf32, #tpu.memory_space<vmem>>, vector<2x32xf32>
    tpu.vector_store %arg5[%c0_74, %c0_75], %290 {strides = array<i32>} : memref<2x32xf32, #tpu.memory_space<vmem>>, vector<2x32xf32>,
    return
  }
}

</mosaic_0001>

<bundles_post_ra>
// kernel: visual_semantic_embedding.3
= control target key start
LH: loop header
LB: loop body
LE: loop exit
PB: predicated region body
PF: predicated region fallthrough
CT: control target
= control target key end

     0   :  { %vm82_vm0 = vcmask 261120   ;;  %s1985_s0 = inlined_call_operand.vmem [shape: f32[64,32], index: 0, kind: input, shape index: {}]   ;;  %s1986_s1 = inlined_call_operand.vmem [shape: bf16[32,384], index: 1, kind: input, shape index: {}]   ;;  %s1987_s2 = inlined_call_operand.vmem [shape: f32[1,384], index: 2, kind: input, shape index: {}]   ;;  %s1988_s3 = inlined_call_operand.vmem [shape: bf16[128,384], index: 3, kind: input, shape index: {}]   ;;  %s1989_s4 = inlined_call_operand.vmem [shape: f32[1,384], index: 4, kind: input, shape index: {}]   ;;  %s1990_s5 = inlined_call_operand.hbm [shape: f32[2,32], index: 5, kind: output, shape index: {}]  }
   0x1   :  { %v1077_v0 = vld [vmem:[%s1986_s1 + $0x18] sm:$0xf]  ;;  %v1199_v1 = vld [vmem:[%s1986_s1 + $0x20] sm:$0xf0]  ;;  %v1185_v2 = vld [vmem:[%s1988_s3 + $0xa8] sm:$0xf] }
   0x2   :  { %v1078_v3 = vor.u32 %v1199_v1, %v1077_v0  ;;  %v1223_v4 = vld [vmem:[%s1988_s3 + $0xb0] sm:$0xf0]  ;;  %v1065_v5 = vld [vmem:[%s1986_s1] sm:$0xf]  ;;  %v1196_v6 = vld [vmem:[%s1986_s1 + $0x8] sm:$0xf0] }
   0x3   :  { %v1383_v7 = vor.u32 %v1223_v4, %v1185_v2  ;;  %v1173_v8 = vld [vmem:[%s1988_s3 + $0x90] sm:$0xf]  ;;  %v1220_v9 = vld [vmem:[%s1988_s3 + $0x98] sm:$0xf0]  ;;  %v1066_v10 = vor.u32 %v1196_v6, %v1065_v5  ;;  %v22_v11 = vld [vmem:[%s1985_s0] sm:$0xff] }
   0x4   :  { %101 = vmatpush.bf16.msra.mxu0 %v1078_v3  ;;  %v23_v12 = vld [vmem:[%s1985_s0 + $0x8] sm:$0xff]  ;;  %v1398_v13 = vor.u32 %v1220_v9, %v1173_v8  ;;  %v1161_v14 = vld [vmem:[%s1988_s3 + $0x78] sm:$0xf]  ;;  %v1217_v15 = vld [vmem:[%s1988_s3 + $0x80] sm:$0xf0] }
   0x5   :  { %350 = vmatpush.bf16.msra.mxu3 %v1383_v7  ;;  %v1406_v16 = vpack.c.bf16 %v23_v12, %v22_v11  ;;  %v1193_v17 = vld [vmem:[%s1988_s3 + $0xb0] sm:$0xf]  ;;  %v1224_v18 = vld [vmem:[%s1988_s3 + $0xb8] sm:$0xf0]  ;;  %v1415_v19 = vor.u32 %v1217_v15, %v1161_v14  ;;  %v1149_v21 = vld [vmem:[%s1988_s3 + $0x60] sm:$0xf] }
   0x6   :  { %v1417_v20 = vor.u32 %v1224_v18, %v1193_v17  ;;  %v1214_v22 = vld [vmem:[%s1988_s3 + $0x68] sm:$0xf0]  ;;  %v1181_v23 = vld [vmem:[%s1988_s3 + $0x98] sm:$0xf]  ;;  %v1221_v24 = vld [vmem:[%s1988_s3 + $0xa0] sm:$0xf0] }
   0x7   :  { %v1434_v25 = vor.u32 %v1221_v24, %v1181_v23  ;;  %v1437_v26 = vor.u32 %v1214_v22, %v1149_v21  ;;  %v1137_v27 = vld [vmem:[%s1988_s3 + $0x48] sm:$0xf] }
   0x8   :  { %102 = vmatpush.bf16.msra.mxu0 %v1066_v10 }
   0x9   :  { %351 = vmatpush.bf16.msra.mxu3 %v1398_v13 }
   0xb   :  { %1087 = vmatmul.msk.bf16.vlgmr.msra.gmra.mxu0 %vm82_vm0, %v1406_v16 }
   0xc   :  { %376 = vmatpush.bf16.msrb.mxu0 %v1417_v20 }
   0xd   :  { %352 = vmatpush.bf16.msra.mxu3 %v1415_v19 }
   0xe   :  { %10 = vsyncpa [#allocation3], 0  ;;  %v1211_v28 = vld [vmem:[%s1988_s3 + $0x50] sm:$0xf0]  ;;  %v1169_v29 = vld [vmem:[%s1988_s3 + $0x80] sm:$0xf] }
   0xf   :  { %v1218_v30 = vld [vmem:[%s1988_s3 + $0x88] sm:$0xf0]  ;;  %v1455_v32 = vor.u32 %v1211_v28, %v1137_v27  ;;  %v1125_v33 = vld [vmem:[%s1988_s3 + $0x30] sm:$0xf]  ;;  %v1208_v34 = vld [vmem:[%s1988_s3 + $0x38] sm:$0xf0] }
  0x10   :  { %377 = vmatpush.bf16.msrb.mxu0 %v1434_v25  ;;  %v1452_v31 = vor.u32 %v1218_v30, %v1169_v29  ;;  %v24_v35 = vld [vmem:[%s1985_s0 + $0x10] sm:$0xff]  ;;  %v25_v36 = vld [vmem:[%s1985_s0 + $0x18] sm:$0xff]  ;;  %v1471_v37 = vor.u32 %v1208_v34, %v1125_v33  ;;  %v1079_v40 = vld [vmem:[%s1986_s1 + $0x24] sm:$0xf0]  ;;  %v1333_v18 = vmov 0   ;;  %s1054_s6 = sshll.u32 %s1990_s5, 4  ;;  %s1055_s6 = int_to_ptr.hbm [resolvable:$true] %s1054_s6 }
  0x11   :  { %353 = vmatpush.bf16.msra.mxu3 %v1437_v26  ;;  %v1113_v38 = vld [vmem:[%s1988_s3 + $0x18] sm:$0xf]  ;;  %v1198_v39 = vld [vmem:[%s1986_s1 + $0x1c] sm:$0xf]  ;;  %v1205_v41 = vld [vmem:[%s1988_s3 + $0x20] sm:$0xf0]  ;;  %v1491_v45 = vpack.c.bf16 %v25_v36, %v24_v35 }
  0x12   :  { %v1157_v42 = vld [vmem:[%s1988_s3 + $0x68] sm:$0xf]  ;;  %v1215_v43 = vld [vmem:[%s1988_s3 + $0x70] sm:$0xf0]  ;;  %v1082_v44 = vor.u32 %v1198_v39, %v1079_v40  ;;  %v1496_v47 = vor.u32 %v1205_v41, %v1113_v38  ;;  %v1101_v48 = vld [vmem:[%s1988_s3] sm:$0xf] }
  0x13   :  { %v1493_v46 = vor.u32 %v1215_v43, %v1157_v42  ;;  %v1202_v49 = vld [vmem:[%s1988_s3 + $0x8] sm:$0xf0]  ;;  %v1195_v50 = vld [vmem:[%s1986_s1 + $0x4] sm:$0xf]  ;;  %v1067_v51 = vld [vmem:[%s1986_s1 + $0xc] sm:$0xf0] }
  0x14   :  { %378 = vmatpush.bf16.msrb.mxu0 %v1452_v31  ;;  %130 = vmatpush.bf16.msra.mxu1 %v1082_v44  ;;  %v1145_v52 = vld [vmem:[%s1988_s3 + $0x50] sm:$0xf]  ;;  %v1212_v53 = vld [vmem:[%s1988_s3 + $0x58] sm:$0xf0]  ;;  %v1222_v54 = vld [vmem:[%s1988_s3 + $0xac] sm:$0xf]  ;;  %v1070_v56 = vor.u32 %v1195_v50, %v1067_v51  ;;  %v1528_v58 = vor.u32 %v1202_v49, %v1101_v48 }
  0x15   :  { %354 = vmatpush.bf16.msra.mxu3 %v1455_v32  ;;  %v1187_v55 = vld [vmem:[%s1988_s3 + $0xb4] sm:$0xf0]  ;;  %v1525_v57 = vor.u32 %v1212_v53, %v1145_v52  ;;  %v1085_v60 = vld [vmem:[%s1986_s1 + $0x20] sm:$0xf]  ;;  %v1200_v61 = vld [vmem:[%s1986_s1 + $0x28] sm:$0xf0] }
  0x16   :  { %v1530_v59 = vor.u32 %v1222_v54, %v1187_v55  ;;  %v1133_v62 = vld [vmem:[%s1988_s3 + $0x38] sm:$0xf]  ;;  %v1219_v63 = vld [vmem:[%s1988_s3 + $0x94] sm:$0xf]  ;;  %v1175_v0 = vld [vmem:[%s1988_s3 + $0x9c] sm:$0xf0]  ;;  %v1086_v1 = vor.u32 %v1200_v61, %v1085_v60 }
  0x17   :  { %v1209_v2 = vld [vmem:[%s1988_s3 + $0x40] sm:$0xf0]  ;;  %v1073_v4 = vld [vmem:[%s1986_s1 + $0x8] sm:$0xf]  ;;  %v1197_v5 = vld [vmem:[%s1986_s1 + $0x10] sm:$0xf0]  ;;  %v1567_v8 = vor.u32 %v1219_v63, %v1175_v0 }
  0x18   :  { %379 = vmatpush.bf16.msrb.mxu0 %v1493_v46  ;;  %131 = vmatpush.bf16.msra.mxu1 %v1070_v56  ;;  %v1554_v3 = vor.u32 %v1209_v2, %v1133_v62  ;;  %v1121_v6 = vld [vmem:[%s1988_s3 + $0x20] sm:$0xf]  ;;  %v1216_v9 = vld [vmem:[%s1988_s3 + $0x7c] sm:$0xf]  ;;  %v1074_v10 = vor.u32 %v1197_v5, %v1073_v4  ;;  %v1206_v11 = vld [vmem:[%s1988_s3 + $0x28] sm:$0xf0] }
  0x19   :  { %355 = vmatpush.bf16.msra.mxu3 %v1471_v37  ;;  %159 = vmatpush.bf16.msra.mxu2 %v1086_v1  ;;  %v1163_v12 = vld [vmem:[%s1988_s3 + $0x84] sm:$0xf0]  ;;  %v1579_v14 = vor.u32 %v1206_v11, %v1121_v6  ;;  %v1203_v17 = vld [vmem:[%s1988_s3 + $0x10] sm:$0xf0]  ;;  %v26_v21 = vld [vmem:[%s1985_s0 + $0x20] sm:$0xff] }
  0x1a   :  { %v1109_v15 = vld [vmem:[%s1988_s3 + $0x8] sm:$0xf]  ;;  %v1596_v23 = vor.u32 %v1216_v9, %v1163_v12  ;;  %v1213_v28 = vld [vmem:[%s1988_s3 + $0x64] sm:$0xf]  ;;  %v1151_v29 = vld [vmem:[%s1988_s3 + $0x6c] sm:$0xf0] }
  0x1b   :  { %1088 = vmatmul.msk.bf16.gmra.mxu0 %vm82_vm0, %v1491_v45  ;;  %1091 = vmatmul.msk.bf16.vlgmr.msra.gmra.mxu1 %vm82_vm0, %v1406_v16  ;;  %v27_v22 = vld [vmem:[%s1985_s0 + $0x28] sm:$0xff]  ;;  %v1599_v24 = vor.u32 %v1203_v17, %v1109_v15  ;;  %v1612_v30 = vor.u32 %v1213_v28, %v1151_v29  ;;  %v1139_v34 = vld [vmem:[%s1988_s3 + $0x54] sm:$0xf0]  ;;  %v1207_v35 = vld [vmem:[%s1988_s3 + $0x34] sm:$0xf] }
  0x1c   :  { %380 = vmatpush.bf16.msrb.mxu0 %v1525_v57  ;;  %437 = vmatpush.bf16.msrb.mxu1 %v1383_v7  ;;  %v32_v27 = vpack.c.bf16 %v27_v22, %v26_v21  ;;  %v1210_v33 = vld [vmem:[%s1988_s3 + $0x4c] sm:$0xf]  ;;  %v1127_v36 = vld [vmem:[%s1988_s3 + $0x3c] sm:$0xf0]  ;;  %v1204_v39 = vld [vmem:[%s1988_s3 + $0x1c] sm:$0xf] }
  0x1d   :  { %356 = vmatpush.bf16.msra.mxu3 %v1496_v47  ;;  %160 = vmatpush.bf16.msra.mxu2 %v1074_v10  ;;  %v1640_v38 = vor.u32 %v1207_v35, %v1127_v36  ;;  %v1115_v40 = vld [vmem:[%s1988_s3 + $0x24] sm:$0xf0]  ;;  %v28_v41 = vld [vmem:[%s1985_s0 + $0x30] sm:$0xff]  ;;  %v29_v42 = vld [vmem:[%s1985_s0 + $0x38] sm:$0xff] }
  0x1e   :  { %v1658_v43 = vor.u32 %v1204_v39, %v1115_v40  ;;  %v33_v44 = vpack.c.bf16 %v29_v42, %v28_v41  ;;  %v1201_v48 = vld [vmem:[%s1988_s3 + $0x4] sm:$0xf]  ;;  %v1103_v49 = vld [vmem:[%s1988_s3 + $0xc] sm:$0xf0]  ;;  %v42_v51 = vld [vmem:[%s1987_s2] sm:$0x7] }
  0x1f   :  { %v1672_v50 = vor.u32 %v1201_v48, %v1103_v49  ;;  %v44_v52 = vperm.slane %v42_v51, 0  ;;  %v214_v62 = vld [vmem:[%s1989_s4] sm:$0x7]  ;;  %s1334_s2 = smov [#allocation2]  }
  0x20   :  { %381 = vmatpush.bf16.msrb.mxu0 %v1554_v3  ;;  %438 = vmatpush.bf16.msrb.mxu1 %v1398_v13  ;;  %v1742_v63 = vperm.slane %v214_v62, 0  ;;  %s1052_s4 = sshll.u32 %s1334_s2, 4  ;;  %s1053_s4 = int_to_ptr.vmem [resolvable:$true] %s1052_s4 }
  0x21   :  { %357 = vmatpush.bf16.msra.mxu3 %v1528_v58  ;;  %450 = vmatpush.bf16.msrb.mxu2 %v1530_v59 }
  0x22   :  { %1095 = vmatmul.msk.bf16.vlgmr.msra.gmra.mxu2 %vm82_vm0, %v1406_v16  ;;  %v1626_v16 = vor.u32 %v1210_v33, %v1139_v34  ;;  %v1755_v33 = vperm.slane %v214_v62, 1 }
  0x24   :  { %358 = vmatmul.bf16.vlgmr.msra.gmra.mxu3 %v1333_v18  ;;  %382 = vmatpush.bf16.msrb.mxu0 %v1579_v14 }
  0x25   :  { %363 = vmatpush.bf16.msrb.mxu3 %v1530_v59  ;;  %439 = vmatpush.bf16.msrb.mxu1 %v1415_v19 }
  0x26   :  { %451 = vmatpush.bf16.msrb.mxu2 %v1567_v8 }
  0x28   :  { %383 = vmatpush.bf16.msrb.mxu0 %v1599_v24 }
  0x29   :  { %364 = vmatpush.bf16.msrb.mxu3 %v1567_v8  ;;  %440 = vmatpush.bf16.msrb.mxu1 %v1437_v26 }
  0x2a   :  { %452 = vmatpush.bf16.msrb.mxu2 %v1596_v23 }
  0x2b   :  { %1089 = vmatmul.msk.bf16.gmra.mxu0 %vm82_vm0, %v32_v27  ;;  %1092 = vmatmul.msk.bf16.gmra.mxu1 %vm82_vm0, %v1491_v45 }
  0x2c   :  { %524 = vmatpush.bf16.msra.mxu0 %v1383_v7 }
  0x2d   :  { %365 = vmatpush.bf16.msrb.mxu3 %v1596_v23  ;;  %441 = vmatpush.bf16.msrb.mxu1 %v1455_v32 }
  0x2e   :  { %453 = vmatpush.bf16.msrb.mxu2 %v1612_v30 }
  0x30   :  { %525 = vmatpush.bf16.msra.mxu0 %v1398_v13 }
  0x31   :  { %366 = vmatpush.bf16.msrb.mxu3 %v1612_v30  ;;  %442 = vmatpush.bf16.msrb.mxu1 %v1471_v37 }
  0x32   :  { %454 = vmatpush.bf16.msrb.mxu2 %v1626_v16 }
  0x33   :  { %1096 = vmatmul.msk.bf16.gmra.mxu2 %vm82_vm0, %v1491_v45 }
  0x34   :  { %526 = vmatpush.bf16.msra.mxu0 %v1415_v19 }
  0x35   :  { %367 = vmatpush.bf16.msrb.mxu3 %v1626_v16  ;;  %443 = vmatpush.bf16.msrb.mxu1 %v1496_v47 }
  0x36   :  { %455 = vmatpush.bf16.msrb.mxu2 %v1640_v38 }
  0x38   :  { %527 = vmatpush.bf16.msra.mxu0 %v1437_v26 }
  0x39   :  { %368 = vmatpush.bf16.msrb.mxu3 %v1640_v38  ;;  %444 = vmatpush.bf16.msrb.mxu1 %v1528_v58 }
  0x3a   :  { %456 = vmatpush.bf16.msrb.mxu2 %v1658_v43 }
  0x3b   :  { %1090 = vmatmul.msk.bf16.gmra.mxu0 %vm82_vm0, %v33_v44  ;;  %1093 = vmatmul.msk.bf16.gmra.mxu1 %vm82_vm0, %v32_v27 }
  0x3c   :  { %528 = vmatpush.bf16.msra.mxu0 %v1455_v32 }
  0x3d   :  { %369 = vmatpush.bf16.msrb.mxu3 %v1658_v43  ;;  %537 = vmatpush.bf16.msra.mxu1 %v1530_v59 }
  0x3e   :  { %457 = vmatpush.bf16.msrb.mxu2 %v1672_v50 }
  0x40   :  { %529 = vmatpush.bf16.msra.mxu0 %v1471_v37 }
  0x41   :  { %370 = vmatpush.bf16.msrb.mxu3 %v1672_v50  ;;  %538 = vmatpush.bf16.msra.mxu1 %v1567_v8 }
  0x42   :  { %550 = vmatpush.bf16.msra.mxu2 %v1417_v20 }
  0x43   :  { %1097 = vmatmul.msk.bf16.gmra.mxu2 %vm82_vm0, %v32_v27  ;;  %v1751_v27 = vperm.slane %v42_v51, 1 }
  0x44   :  { %371 = vmatmul.bf16.vlgmr.msrb.gmra.mxu3 %v1333_v18  ;;  %530 = vmatpush.bf16.msra.mxu0 %v1496_v47 }
  0x45   :  { %463 = vmatpush.bf16.msra.mxu3 %v1417_v20  ;;  %539 = vmatpush.bf16.msra.mxu1 %v1596_v23 }
  0x46   :  { %551 = vmatpush.bf16.msra.mxu2 %v1434_v25 }
  0x48   :  { %531 = vmatpush.bf16.msra.mxu0 %v1528_v58 }
  0x49   :  { %464 = vmatpush.bf16.msra.mxu3 %v1434_v25  ;;  %540 = vmatpush.bf16.msra.mxu1 %v1612_v30 }
  0x4a   :  { %552 = vmatpush.bf16.msra.mxu2 %v1452_v31 }
  0x4b   :  { %384 = vmatmul.bf16.vlgmr.msrb.gmra.mxu0 %v1333_v18  ;;  %1094 = vmatmul.msk.bf16.gmra.mxu1 %vm82_vm0, %v33_v44 }
  0x4c   :  { %624 = vmatpush.bf16.msrb.mxu0 %v1530_v59 }
  0x4d   :  { %465 = vmatpush.bf16.msra.mxu3 %v1452_v31  ;;  %541 = vmatpush.bf16.msra.mxu1 %v1626_v16 }
  0x4e   :  { %553 = vmatpush.bf16.msra.mxu2 %v1493_v46 }
  0x50   :  { %625 = vmatpush.bf16.msrb.mxu0 %v1567_v8 }
  0x51   :  { %466 = vmatpush.bf16.msra.mxu3 %v1493_v46  ;;  %542 = vmatpush.bf16.msra.mxu1 %v1640_v38 }
  0x52   :  { %554 = vmatpush.bf16.msra.mxu2 %v1525_v57 }
  0x53   :  { %1098 = vmatmul.msk.bf16.gmra.mxu2 %vm82_vm0, %v33_v44 }
  0x54   :  { %626 = vmatpush.bf16.msrb.mxu0 %v1596_v23 }
  0x55   :  { %467 = vmatpush.bf16.msra.mxu3 %v1525_v57  ;;  %543 = vmatpush.bf16.msra.mxu1 %v1658_v43 }
  0x56   :  { %555 = vmatpush.bf16.msra.mxu2 %v1554_v3 }
  0x58   :  { %627 = vmatpush.bf16.msrb.mxu0 %v1612_v30 }
  0x59   :  { %468 = vmatpush.bf16.msra.mxu3 %v1554_v3  ;;  %544 = vmatpush.bf16.msra.mxu1 %v1672_v50 }
  0x5a   :  { %556 = vmatpush.bf16.msra.mxu2 %v1579_v14 }
  0x5c   :  { %628 = vmatpush.bf16.msrb.mxu0 %v1626_v16 }
  0x5d   :  { %469 = vmatpush.bf16.msra.mxu3 %v1579_v14 }
  0x5e   :  { %557 = vmatpush.bf16.msra.mxu2 %v1599_v24 }
  0x60   :  { %629 = vmatpush.bf16.msrb.mxu0 %v1640_v38 }
  0x61   :  { %470 = vmatpush.bf16.msra.mxu3 %v1599_v24 }
  0x64   :  { %630 = vmatpush.bf16.msrb.mxu0 %v1658_v43 }
  0x65   :  { %611 = vmatpush.bf16.msrb.mxu3 %v1383_v7 }
  0x68   :  { %631 = vmatpush.bf16.msrb.mxu0 %v1672_v50 }
  0x69   :  { %612 = vmatpush.bf16.msrb.mxu3 %v1398_v13 }
  0x6d   :  { %613 = vmatpush.bf16.msrb.mxu3 %v1415_v19 }
  0x71   :  { %614 = vmatpush.bf16.msrb.mxu3 %v1437_v26 }
  0x75   :  { %615 = vmatpush.bf16.msrb.mxu3 %v1455_v32 }
  0x79   :  { %616 = vmatpush.bf16.msrb.mxu3 %v1471_v37 }
  0x7d   :  { %617 = vmatpush.bf16.msrb.mxu3 %v1496_v47 }
  0x81   :  { %618 = vmatpush.bf16.msrb.mxu3 %v1528_v58 }
  0x88   :  { %v104_v45 = vpop.f32.mrf.mxu0 }
  0x89   :  { %v105_v1 = vadd.f32 %v104_v45, %v44_v52 }
  0x90   :  { %v106_v53 = vpop.f32.mrf.mxu0 }
  0x91   :  { %v1733_v54 = vadd.f32 %v106_v53, %v44_v52 }
  0x98   :  { %v109_v55 = vpop.f32.mrf.mxu0  ;;  %v133_v34 = vpop.f32.mrf.mxu1 }
  0x99   :  { %v1735_v56 = vadd.f32 %v109_v55, %v44_v52  ;;  %v134_v36 = vadd.f32 %v133_v34, %v1751_v27 }
  0xa0   :  { %v111_v60 = vpop.f32.mrf.mxu0 }
  0xa1   :  { %v1737_v61 = vadd.f32 %v111_v60, %v44_v52  ;;  %v1759_v60 = vperm.slane %v214_v62, 2 }
  0xa7   :  { %v359_v0 = vpop.f32.mrf.mxu3 }
  0xa8   :  { %v360_v2 = vadd.f32 %v359_v0, %v1742_v63  ;;  %v114_v4 = vpop.f32.mrf.mxu0 }
  0xa9   :  { %v1745_v5 = vadd.f32 %v114_v4, %v44_v52 }
  0xaa   :  { %v389_v6 = vadd.f32 %v360_v2, %v105_v1 }
  0xac   :  { %v390_v9 = vsub.f32 0.0, %v389_v6 }
  0xae   :  { %v391_v10 = vmul.f32 1.442695, %v390_v9 }
  0xaf   :  { %v361_v11 = vpop.f32.mrf.mxu3 }
  0xb0   :  { %1227 = vpow2.f32 %v391_v10  ;;  %v116_v12 = vpop.f32.mrf.mxu0  ;;  %v1762_v11 = vperm.slane %v42_v51, 2 }
  0xb1   :  { %v1747_v15 = vadd.f32 %v116_v12, %v44_v52 }
  0xb6   :  { %v1228_v17 = vpop.eup %1227 }
  0xb7   :  { %v393_v21 = vadd.f32 1.0, %v1228_v17  ;;  %v162_v17 = vpop.f32.mrf.mxu2 }
  0xb8   :  { %v119_v18 = vpop.f32.mrf.mxu0 }
  0xb9   :  { %v1749_v22 = vadd.f32 %v119_v18, %v44_v52  ;;  %1229 = vrcp.f32 %v393_v21  ;;  %v405_v2 = vand.u32 2147483648, %v393_v21  ;;  %vm399_vm2 = vweird.f32 %v393_v21 }
  0xba   :  { %v403_v6 = vand.u32 2147483647, %v393_v21 }
  0xbb   :  { %1991 = vst [vmem:[#allocation5_spill] sm:$0xff] %v1749_v22  ;;  %v406_v12 = vor.u32 1.1754944e-38, %v405_v2 }
  0xbc   :  { %vm404_vm4 = vcmp.eq.f32.partialorder %v403_v6, 8.507059e+37 }
  0xbf   :  { %v1230_v35 = vpop.eup %1229  ;;  %v164_v2 = vpop.f32.mrf.mxu2 }
  0xc0   :  { %v121_v28 = vpop.f32.mrf.mxu0  ;;  %v395_v41 = vmul.f32 %v1230_v35, %v393_v21  ;;  %vm400_vm1 = vweird.f32 %v1230_v35 }
  0xc1   :  { %v1753_v29 = vadd.f32 %v121_v28, %v44_v52  ;;  %vm401_vm3 = vmor %vm399_vm2, %vm400_vm1  ;;  %v163_v28 = vadd.f32 %v162_v17, %v1762_v11 }
  0xc2   :  { %v396_v49 = vsub.f32 1.0, %v395_v41 }
  0xc3   :  { %1992 = vst [vmem:[#allocation6_spill] sm:$0xff] %v1753_v29 }
  0xc4   :  { %v397_v55 = vmul.f32 %v1230_v35, %v396_v49 }
  0xc6   :  { %v398_v0 = vadd.f32 %v1230_v35, %v397_v55 }
  0xc7   :  { %v372_v39 = vpop.f32.mrf.mxu3  ;;  %v1795_v6 = vpop.f32.mrf.mxu2 }
  0xc8   :  { %v373_v40 = vadd.f32 %v372_v39, %v1755_v33  ;;  %v385_v44 = vpop.f32.mrf.mxu0  ;;  %v402_v10 = vsel %vm401_vm3, %v1230_v35, %v398_v0 }
  0xc9   :  { %v386_v9 = vadd.f32 %v385_v44, %v1759_v60  ;;  %v407_v18 = vsel %vm404_vm4, %v406_v12, %v402_v10 }
  0xca   :  { %v409_v42 = vadd.f32 %v373_v40, %v134_v36 }
  0xcb   :  { %v429_v62 = vmul.f32 %v407_v18, %v386_v9 }
  0xcc   :  { %v410_v48 = vsub.f32 0.0, %v409_v42 }
  0xcd   :  { %v430_v39 = vadd.f32 %v429_v62, %v163_v28 }
  0xce   :  { %v411_v45 = vmul.f32 1.442695, %v410_v48 }
  0xcf   :  { %v374_v53 = vpop.f32.mrf.mxu3  ;;  %v1799_v10 = vpop.f32.mrf.mxu2 }
  0xd0   :  { %1231 = vpow2.f32 %v411_v45  ;;  %v387_v52 = vpop.f32.mrf.mxu0 }
  0xd6   :  { %v1232_v1 = vpop.eup %1231 }
  0xd7   :  { %v413_v4 = vadd.f32 1.0, %v1232_v1  ;;  %v135_v1 = vpop.f32.mrf.mxu1  ;;  %v1803_v17 = vpop.f32.mrf.mxu2 }
  0xd9   :  { %1233 = vrcp.f32 %v413_v4  ;;  %v425_v41 = vand.u32 2147483648, %v413_v4  ;;  %v423_v42 = vand.u32 2147483647, %v413_v4  ;;  %vm419_vm6 = vweird.f32 %v413_v4 }
  0xda   :  { %1235 = vtanh.f32 %v430_v39 }
  0xdb   :  { %v426_v51 = vor.u32 1.1754944e-38, %v425_v41  ;;  %vm424_vm8 = vcmp.eq.f32.partialorder %v423_v42, 8.507059e+37 }
  0xdf   :  { %v1234_v34 = vpop.eup %1233  ;;  %v1807_v62 = vpop.f32.mrf.mxu2 }
  0xe0   :  { %v415_v36 = vmul.f32 %v1234_v34, %v413_v4  ;;  %vm420_vm5 = vweird.f32 %v1234_v34  ;;  %v1236_v45 = vpop.eup %1235  ;;  %v1793_v4 = vpop.f32.mrf.mxu1  ;;  %1993 = vst [vmem:[#allocation7_spill] sm:$0xff] %v1807_v62 }
  0xe1   :  { %vm421_vm7 = vmor %vm419_vm6, %vm420_vm5 }
  0xe2   :  { %v416_v40 = vsub.f32 1.0, %v415_v36 }
  0xe4   :  { %v417_v21 = vmul.f32 %v1234_v34, %v416_v40 }
  0xe6   :  { %v418_v44 = vadd.f32 %v1234_v34, %v417_v21 }
  0xe8   :  { %v422_v35 = vsel %vm421_vm7, %v1234_v34, %v418_v44  ;;  %v1797_v9 = vpop.f32.mrf.mxu1  ;;  %v1811_v34 = vpop.f32.mrf.mxu2 }
  0xe9   :  { %v427_v48 = vsel %vm424_vm8, %v426_v51, %v422_v35  ;;  %1995 = vst [vmem:[#allocation9_spill] sm:$0xff] %v1811_v34  ;;  %v136_v51 = vadd.f32 %v135_v1, %v1751_v27 }
  0xea   :  { %v432_v49 = vsub.f32 1.0, %v427_v48  ;;  %v434_v55 = vmul.f32 0.0, %v427_v48 }
  0xec   :  { %v433_v53 = vmul.f32 %v1236_v45, %v432_v49 }
  0xee   :  { %v1765_v52 = vadd.f32 %v434_v55, %v433_v53 }
  0xf0   :  { %v436_v0 = vpack.c.bf16 %v1765_v52, %v1765_v52  ;;  %v1801_v12 = vpop.f32.mrf.mxu1  ;;  %v1815_v39 = vpop.f32.mrf.mxu2 }
  0xf1   :  { %1997 = vst [vmem:[#allocation11_spill] sm:$0xff] %v1815_v39 }
  0xf2   :  { %445 = vmatmul.bf16.vlgmr.msrb.gmra.mxu1 %v436_v0  ;;  %458 = vmatmul.bf16.vlgmr.msrb.gmra.mxu2 %v436_v0 }
  0xf3   :  { %471 = vmatmul.bf16.vlgmr.msra.gmra.mxu3 %v436_v0  ;;  %637 = vmatpush.bf16.msrb.mxu1 %v1417_v20 }
  0xf4   :  { %698 = vmatpush.bf16.msrb.mxu2 %v1383_v7  ;;  %711 = vmatpush.bf16.msra.mxu3 %v1530_v59 }
  0xf7   :  { %638 = vmatpush.bf16.msrb.mxu1 %v1434_v25 }
  0xf8   :  { %699 = vmatpush.bf16.msrb.mxu2 %v1398_v13  ;;  %712 = vmatpush.bf16.msra.mxu3 %v1567_v8  ;;  %v1805_v18 = vpop.f32.mrf.mxu1 }
  0xfb   :  { %639 = vmatpush.bf16.msrb.mxu1 %v1452_v31 }
  0xfc   :  { %700 = vmatpush.bf16.msrb.mxu2 %v1415_v19  ;;  %713 = vmatpush.bf16.msra.mxu3 %v1596_v23 }
  0xff   :  { %640 = vmatpush.bf16.msrb.mxu1 %v1493_v46 }
 0x100   :  { %701 = vmatpush.bf16.msrb.mxu2 %v1437_v26  ;;  %714 = vmatpush.bf16.msra.mxu3 %v1612_v30  ;;  %v1809_v28 = vpop.f32.mrf.mxu1 }
 0x101   :  { %1994 = vst [vmem:[#allocation8_spill] sm:$0xff] %v1809_v28 }
 0x103   :  { %641 = vmatpush.bf16.msrb.mxu1 %v1525_v57 }
 0x104   :  { %702 = vmatpush.bf16.msrb.mxu2 %v1455_v32  ;;  %715 = vmatpush.bf16.msra.mxu3 %v1626_v16 }
 0x107   :  { %642 = vmatpush.bf16.msrb.mxu1 %v1554_v3 }
 0x108   :  { %703 = vmatpush.bf16.msrb.mxu2 %v1471_v37  ;;  %716 = vmatpush.bf16.msra.mxu3 %v1640_v38  ;;  %v1813_v36 = vpop.f32.mrf.mxu1 }
 0x109   :  { %1996 = vst [vmem:[#allocation10_spill] sm:$0xff] %v1813_v36 }
 0x10b   :  { %643 = vmatpush.bf16.msrb.mxu1 %v1579_v14 }
 0x10c   :  { %704 = vmatpush.bf16.msrb.mxu2 %v1496_v47  ;;  %717 = vmatpush.bf16.msra.mxu3 %v1658_v43 }
 0x10f   :  { %644 = vmatpush.bf16.msrb.mxu1 %v1599_v24 }
 0x110   :  { %705 = vmatpush.bf16.msrb.mxu2 %v1528_v58  ;;  %718 = vmatpush.bf16.msra.mxu3 %v1672_v50 }
 0x16f   :  { %v446_v40 = vpop.f32.mrf.mxu1 }
 0x170   :  { %v447_v41 = vadd.f32 %v446_v40, %v1742_v63 }
 0x172   :  { %v476_v21 = vadd.f32 %v447_v41, %v1733_v54 }
 0x174   :  { %v477_v42 = vsub.f32 0.0, %v476_v21 }
 0x175   :  { %v459_v44 = vpop.f32.mrf.mxu2 }
 0x176   :  { %v478_v35 = vmul.f32 1.442695, %v477_v42  ;;  %v460_v48 = vadd.f32 %v459_v44, %v1755_v33  ;;  %v472_v49 = vpop.f32.mrf.mxu3 }
 0x177   :  { %v448_v45 = vpop.f32.mrf.mxu1 }
 0x178   :  { %1237 = vpow2.f32 %v478_v35  ;;  %v496_v53 = vadd.f32 %v460_v48, %v136_v51 }
 0x17a   :  { %v497_v55 = vsub.f32 0.0, %v496_v53 }
 0x17c   :  { %v498_v0 = vmul.f32 1.442695, %v497_v55  ;;  %v165_v55 = vadd.f32 %v164_v2, %v1762_v11 }
 0x17d   :  { %v461_v29 = vpop.f32.mrf.mxu2 }
 0x17e   :  { %v1238_v39 = vpop.eup %1237  ;;  %1239 = vpow2.f32 %v498_v0  ;;  %v474_v36 = vpop.f32.mrf.mxu3 }
 0x17f   :  { %v480_v40 = vadd.f32 1.0, %v1238_v39  ;;  %v473_v36 = vadd.f32 %v472_v49, %v1759_v60 }
 0x181   :  { %1241 = vrcp.f32 %v480_v40  ;;  %v492_v34 = vand.u32 2147483648, %v480_v40  ;;  %v490_v45 = vand.u32 2147483647, %v480_v40  ;;  %vm486_vm10 = vweird.f32 %v480_v40 }
 0x183   :  { %v493_v29 = vor.u32 1.1754944e-38, %v492_v34  ;;  %vm491_vm12 = vcmp.eq.f32.partialorder %v490_v45, 8.507059e+37 }
 0x184   :  { %v1240_v54 = vpop.eup %1239 }
 0x185   :  { %v500_v41 = vadd.f32 1.0, %v1240_v54 }
 0x187   :  { %v1242_v21 = vpop.eup %1241  ;;  %1243 = vrcp.f32 %v500_v41  ;;  %v510_v22 = vand.u32 2147483647, %v500_v41  ;;  %vm506_vm14 = vweird.f32 %v500_v41 }
 0x188   :  { %v482_v1 = vmul.f32 %v1242_v21, %v480_v40  ;;  %vm487_vm9 = vweird.f32 %v1242_v21 }
 0x189   :  { %vm488_vm11 = vmor %vm486_vm10, %vm487_vm9  ;;  %vm511_vm0 = vcmp.eq.f32.partialorder %v510_v22, 8.507059e+37 }
 0x18a   :  { %v483_v42 = vsub.f32 1.0, %v482_v1 }
 0x18c   :  { %v484_v44 = vmul.f32 %v1242_v21, %v483_v42  ;;  %v512_v42 = vand.u32 2147483648, %v500_v41 }
 0x18d   :  { %v1244_v35 = vpop.eup %1243 }
 0x18e   :  { %v502_v51 = vmul.f32 %v1244_v35, %v500_v41  ;;  %v485_v48 = vadd.f32 %v1242_v21, %v484_v44  ;;  %vm507_vm13 = vweird.f32 %v1244_v35  ;;  %v513_v34 = vor.u32 1.1754944e-38, %v512_v42 }
 0x18f   :  { %vm508_vm15 = vmor %vm506_vm14, %vm507_vm13 }
 0x190   :  { %v503_v53 = vsub.f32 1.0, %v502_v51  ;;  %v489_v39 = vsel %vm488_vm11, %v1242_v21, %v485_v48 }
 0x191   :  { %v494_v0 = vsel %vm491_vm12, %v493_v29, %v489_v39 }
 0x192   :  { %v504_v54 = vmul.f32 %v1244_v35, %v503_v53  ;;  %v516_v1 = vmul.f32 %v494_v0, %v473_v36 }
 0x194   :  { %v517_v28 = vadd.f32 %v516_v1, %v165_v55  ;;  %v505_v62 = vadd.f32 %v1244_v35, %v504_v54 }
 0x196   :  { %1245 = vtanh.f32 %v517_v28  ;;  %v509_v40 = vsel %vm508_vm15, %v1244_v35, %v505_v62  ;;  %v139_v62 = vadd.f32 %v1793_v4, %v1751_v27 }
 0x197   :  { %v514_v44 = vsel %vm511_vm0, %v513_v34, %v509_v40 }
 0x198   :  { %v519_v49 = vsub.f32 1.0, %v514_v44  ;;  %v521_v2 = vmul.f32 %v514_v44, %v1765_v52 }
 0x19c   :  { %v1246_v21 = vpop.eup %1245 }
 0x19d   :  { %v520_v45 = vmul.f32 %v1246_v21, %v519_v49 }
 0x19f   :  { %v1824_v51 = vadd.f32 %v521_v2, %v520_v45 }
 0x1a1   :  { %v523_v48 = vpack.c.bf16 %v1824_v51, %v1824_v51 }
 0x1a3   :  { %532 = vmatmul.bf16.vlgmr.msra.gmra.mxu0 %v523_v48  ;;  %545 = vmatmul.bf16.vlgmr.msra.gmra.mxu1 %v523_v48 }
 0x1a4   :  { %558 = vmatmul.bf16.vlgmr.msra.gmra.mxu2 %v523_v48  ;;  %724 = vmatpush.bf16.msra.mxu0 %v1417_v20 }
 0x1a5   :  { %785 = vmatpush.bf16.msra.mxu1 %v1383_v7  ;;  %798 = vmatpush.bf16.msra.mxu2 %v1530_v59 }
 0x1a8   :  { %725 = vmatpush.bf16.msra.mxu0 %v1434_v25 }
 0x1a9   :  { %786 = vmatpush.bf16.msra.mxu1 %v1398_v13  ;;  %799 = vmatpush.bf16.msra.mxu2 %v1567_v8 }
 0x1ac   :  { %726 = vmatpush.bf16.msra.mxu0 %v1452_v31 }
 0x1ad   :  { %787 = vmatpush.bf16.msra.mxu1 %v1415_v19  ;;  %800 = vmatpush.bf16.msra.mxu2 %v1596_v23 }
 0x1b0   :  { %727 = vmatpush.bf16.msra.mxu0 %v1493_v46 }
 0x1b1   :  { %788 = vmatpush.bf16.msra.mxu1 %v1437_v26  ;;  %801 = vmatpush.bf16.msra.mxu2 %v1612_v30 }
 0x1b4   :  { %728 = vmatpush.bf16.msra.mxu0 %v1525_v57 }
 0x1b5   :  { %789 = vmatpush.bf16.msra.mxu1 %v1455_v32  ;;  %802 = vmatpush.bf16.msra.mxu2 %v1626_v16 }
 0x1b8   :  { %729 = vmatpush.bf16.msra.mxu0 %v1554_v3 }
 0x1b9   :  { %790 = vmatpush.bf16.msra.mxu1 %v1471_v37  ;;  %803 = vmatpush.bf16.msra.mxu2 %v1640_v38 }
 0x1bc   :  { %730 = vmatpush.bf16.msra.mxu0 %v1579_v14 }
 0x1bd   :  { %791 = vmatpush.bf16.msra.mxu1 %v1496_v47  ;;  %804 = vmatpush.bf16.msra.mxu2 %v1658_v43 }
 0x1c0   :  { %731 = vmatpush.bf16.msra.mxu0 %v1599_v24 }
 0x1c1   :  { %792 = vmatpush.bf16.msra.mxu1 %v1528_v58  ;;  %805 = vmatpush.bf16.msra.mxu2 %v1672_v50 }
 0x220   :  { %v533_v22 = vpop.f32.mrf.mxu0  ;;  %v546_v52 = vpop.f32.mrf.mxu1 }
 0x221   :  { %v534_v28 = vadd.f32 %v533_v22, %v1742_v63  ;;  %v547_v41 = vadd.f32 %v546_v52, %v1755_v33 }
 0x223   :  { %v563_v35 = vadd.f32 %v534_v28, %v1735_v56  ;;  %v583_v29 = vadd.f32 %v547_v41, %v139_v62 }
 0x225   :  { %v564_v53 = vsub.f32 0.0, %v563_v35  ;;  %v584_v36 = vsub.f32 0.0, %v583_v29 }
 0x227   :  { %v565_v39 = vmul.f32 1.442695, %v564_v53  ;;  %v585_v55 = vmul.f32 1.442695, %v584_v36  ;;  %v559_v0 = vpop.f32.mrf.mxu2 }
 0x228   :  { %v535_v54 = vpop.f32.mrf.mxu0  ;;  %v548_v1 = vpop.f32.mrf.mxu1  ;;  %v560_v29 = vadd.f32 %v559_v0, %v1759_v60 }
 0x229   :  { %1247 = vpow2.f32 %v565_v39 }
 0x22a   :  { %1249 = vpow2.f32 %v585_v55  ;;  %v168_v55 = vadd.f32 %v1795_v6, %v1762_v11 }
 0x22f   :  { %v1248_v42 = vpop.eup %1247  ;;  %v561_v40 = vpop.f32.mrf.mxu2 }
 0x230   :  { %v1250_v34 = vpop.eup %1249  ;;  %v567_v4 = vadd.f32 1.0, %v1248_v42 }
 0x231   :  { %v587_v44 = vadd.f32 1.0, %v1250_v34 }
 0x232   :  { %1251 = vrcp.f32 %v567_v4  ;;  %v579_v22 = vand.u32 2147483648, %v567_v4  ;;  %v577_v62 = vand.u32 2147483647, %v567_v4  ;;  %vm573_vm2 = vweird.f32 %v567_v4 }
 0x233   :  { %1253 = vrcp.f32 %v587_v44  ;;  %v599_v1 = vand.u32 2147483648, %v587_v44  ;;  %vm593_vm6 = vweird.f32 %v587_v44  ;;  %v597_v42 = vand.u32 2147483647, %v587_v44 }
 0x234   :  { %v580_v35 = vor.u32 1.1754944e-38, %v579_v22  ;;  %vm578_vm4 = vcmp.eq.f32.partialorder %v577_v62, 8.507059e+37 }
 0x235   :  { %vm598_vm8 = vcmp.eq.f32.partialorder %v597_v42, 8.507059e+37 }
 0x238   :  { %v1252_v49 = vpop.eup %1251 }
 0x239   :  { %v1254_v21 = vpop.eup %1253  ;;  %v569_v56 = vmul.f32 %v1252_v49, %v567_v4  ;;  %vm574_vm1 = vweird.f32 %v1252_v49  ;;  %v600_v4 = vor.u32 1.1754944e-38, %v599_v1 }
 0x23a   :  { %v589_v45 = vmul.f32 %v1254_v21, %v587_v44  ;;  %vm575_vm3 = vmor %vm573_vm2, %vm574_vm1  ;;  %vm594_vm5 = vweird.f32 %v1254_v21  ;;  %v141_v44 = vadd.f32 %v1797_v9, %v1751_v27 }
 0x23b   :  { %v570_v2 = vsub.f32 1.0, %v569_v56  ;;  %vm595_vm7 = vmor %vm593_vm6, %vm594_vm5 }
 0x23c   :  { %v590_v48 = vsub.f32 1.0, %v589_v45 }
 0x23d   :  { %v571_v52 = vmul.f32 %v1252_v49, %v570_v2 }
 0x23e   :  { %v591_v28 = vmul.f32 %v1254_v21, %v590_v48 }
 0x23f   :  { %v572_v41 = vadd.f32 %v1252_v49, %v571_v52 }
 0x240   :  { %v592_v39 = vadd.f32 %v1254_v21, %v591_v28 }
 0x241   :  { %v576_v53 = vsel %vm575_vm3, %v1252_v49, %v572_v41 }
 0x242   :  { %v581_v36 = vsel %vm578_vm4, %v580_v35, %v576_v53  ;;  %v596_v34 = vsel %vm595_vm7, %v1254_v21, %v592_v39 }
 0x243   :  { %v603_v54 = vmul.f32 %v581_v36, %v560_v29  ;;  %v601_v56 = vsel %vm598_vm8, %v600_v4, %v596_v34 }
 0x244   :  { %v606_v0 = vsub.f32 1.0, %v601_v56  ;;  %v608_v2 = vmul.f32 %v601_v56, %v1824_v51 }
 0x245   :  { %v604_v40 = vadd.f32 %v603_v54, %v168_v55 }
 0x247   :  { %1255 = vtanh.f32 %v604_v40 }
 0x24d   :  { %v1256_v49 = vpop.eup %1255 }
 0x24e   :  { %v607_v45 = vmul.f32 %v1256_v49, %v606_v0 }
 0x250   :  { %v1861_v48 = vadd.f32 %v608_v2, %v607_v45 }
 0x252   :  { %v610_v6 = vpack.c.bf16 %v1861_v48, %v1861_v48 }
 0x254   :  { %619 = vmatmul.bf16.vlgmr.msrb.gmra.mxu3 %v610_v6  ;;  %632 = vmatmul.bf16.vlgmr.msrb.gmra.mxu0 %v610_v6 }
 0x255   :  { %645 = vmatmul.bf16.vlgmr.msrb.gmra.mxu1 %v610_v6  ;;  %811 = vmatpush.bf16.msrb.mxu3 %v1417_v20 }
 0x256   :  { %872 = vmatpush.bf16.msrb.mxu0 %v1383_v7  ;;  %885 = vmatpush.bf16.msrb.mxu1 %v1530_v59 }
 0x259   :  { %812 = vmatpush.bf16.msrb.mxu3 %v1434_v25 }
 0x25a   :  { %873 = vmatpush.bf16.msrb.mxu0 %v1398_v13  ;;  %886 = vmatpush.bf16.msrb.mxu1 %v1567_v8 }
 0x25d   :  { %813 = vmatpush.bf16.msrb.mxu3 %v1452_v31 }
 0x25e   :  { %874 = vmatpush.bf16.msrb.mxu0 %v1415_v19  ;;  %887 = vmatpush.bf16.msrb.mxu1 %v1596_v23 }
 0x261   :  { %814 = vmatpush.bf16.msrb.mxu3 %v1493_v46 }
 0x262   :  { %875 = vmatpush.bf16.msrb.mxu0 %v1437_v26  ;;  %888 = vmatpush.bf16.msrb.mxu1 %v1612_v30 }
 0x265   :  { %815 = vmatpush.bf16.msrb.mxu3 %v1525_v57 }
 0x266   :  { %876 = vmatpush.bf16.msrb.mxu0 %v1455_v32  ;;  %889 = vmatpush.bf16.msrb.mxu1 %v1626_v16 }
 0x269   :  { %816 = vmatpush.bf16.msrb.mxu3 %v1554_v3 }
 0x26a   :  { %877 = vmatpush.bf16.msrb.mxu0 %v1471_v37  ;;  %890 = vmatpush.bf16.msrb.mxu1 %v1640_v38 }
 0x26d   :  { %817 = vmatpush.bf16.msrb.mxu3 %v1579_v14 }
 0x26e   :  { %878 = vmatpush.bf16.msrb.mxu0 %v1496_v47  ;;  %891 = vmatpush.bf16.msrb.mxu1 %v1658_v43 }
 0x271   :  { %818 = vmatpush.bf16.msrb.mxu3 %v1599_v24 }
 0x272   :  { %879 = vmatpush.bf16.msrb.mxu0 %v1528_v58  ;;  %892 = vmatpush.bf16.msrb.mxu1 %v1672_v50 }
 0x2d1   :  { %v633_v51 = vpop.f32.mrf.mxu0 }
 0x2d2   :  { %v634_v21 = vadd.f32 %v633_v51, %v1755_v33  ;;  %v646_v22 = vpop.f32.mrf.mxu1 }
 0x2d4   :  { %v670_v52 = vadd.f32 %v634_v21, %v141_v44 }
 0x2d6   :  { %v671_v62 = vsub.f32 0.0, %v670_v52  ;;  %v647_v52 = vadd.f32 %v646_v22, %v1759_v60 }
 0x2d7   :  { %v620_v28 = vpop.f32.mrf.mxu3 }
 0x2d8   :  { %v672_v41 = vmul.f32 1.442695, %v671_v62  ;;  %v621_v35 = vadd.f32 %v620_v28, %v1742_v63 }
 0x2d9   :  { %v635_v29 = vpop.f32.mrf.mxu0 }
 0x2da   :  { %1257 = vpow2.f32 %v672_v41  ;;  %v650_v53 = vadd.f32 %v621_v35, %v1737_v61  ;;  %v648_v36 = vpop.f32.mrf.mxu1  ;;  %v170_v35 = vadd.f32 %v1799_v10, %v1762_v11 }
 0x2dc   :  { %v651_v39 = vsub.f32 0.0, %v650_v53 }
 0x2de   :  { %v652_v55 = vmul.f32 1.442695, %v651_v39 }
 0x2df   :  { %v622_v54 = vpop.f32.mrf.mxu3 }
 0x2e0   :  { %v1258_v1 = vpop.eup %1257  ;;  %1259 = vpow2.f32 %v652_v55 }
 0x2e1   :  { %v674_v9 = vadd.f32 1.0, %v1258_v1 }
 0x2e3   :  { %1261 = vrcp.f32 %v674_v9  ;;  %v686_v29 = vand.u32 2147483648, %v674_v9  ;;  %vm680_vm14 = vweird.f32 %v674_v9  ;;  %v684_v36 = vand.u32 2147483647, %v674_v9 }
 0x2e5   :  { %v687_v54 = vor.u32 1.1754944e-38, %v686_v29  ;;  %vm685_vm0 = vcmp.eq.f32.partialorder %v684_v36, 8.507059e+37  ;;  %v173_v29 = vadd.f32 %v1803_v17, %v1762_v11 }
 0x2e6   :  { %v1260_v42 = vpop.eup %1259 }
 0x2e7   :  { %v654_v40 = vadd.f32 1.0, %v1260_v42 }
 0x2e9   :  { %1263 = vrcp.f32 %v654_v40  ;;  %v1262_v34 = vpop.eup %1261  ;;  %v666_v2 = vand.u32 2147483648, %v654_v40  ;;  %v664_v61 = vand.u32 2147483647, %v654_v40  ;;  %vm660_vm10 = vweird.f32 %v654_v40 }
 0x2ea   :  { %v676_v4 = vmul.f32 %v1262_v34, %v674_v9  ;;  %vm681_vm13 = vweird.f32 %v1262_v34 }
 0x2eb   :  { %v667_v21 = vor.u32 1.1754944e-38, %v666_v2  ;;  %vm665_vm12 = vcmp.eq.f32.partialorder %v664_v61, 8.507059e+37  ;;  %vm682_vm15 = vmor %vm680_vm14, %vm681_vm13 }
 0x2ec   :  { %v677_v49 = vsub.f32 1.0, %v676_v4 }
 0x2ee   :  { %v678_v51 = vmul.f32 %v1262_v34, %v677_v49 }
 0x2ef   :  { %v1264_v56 = vpop.eup %1263 }
 0x2f0   :  { %v656_v0 = vmul.f32 %v1264_v56, %v654_v40  ;;  %vm661_vm9 = vweird.f32 %v1264_v56  ;;  %v679_v41 = vadd.f32 %v1262_v34, %v678_v51 }
 0x2f1   :  { %vm662_vm11 = vmor %vm660_vm10, %vm661_vm9 }
 0x2f2   :  { %v657_v45 = vsub.f32 1.0, %v656_v0  ;;  %v683_v55 = vsel %vm682_vm15, %v1262_v34, %v679_v41 }
 0x2f3   :  { %v688_v1 = vsel %vm685_vm0, %v687_v54, %v683_v55 }
 0x2f4   :  { %v658_v6 = vmul.f32 %v1264_v56, %v657_v45  ;;  %v693_v22 = vsub.f32 1.0, %v688_v1  ;;  %v695_v4 = vmul.f32 %v688_v1, %v1861_v48 }
 0x2f6   :  { %v659_v44 = vadd.f32 %v1264_v56, %v658_v6 }
 0x2f8   :  { %v663_v62 = vsel %vm662_vm11, %v1264_v56, %v659_v44 }
 0x2f9   :  { %v668_v28 = vsel %vm665_vm12, %v667_v21, %v663_v62 }
 0x2fa   :  { %v690_v53 = vmul.f32 %v668_v28, %v647_v52 }
 0x2fc   :  { %v691_v39 = vadd.f32 %v690_v53, %v170_v35 }
 0x2fe   :  { %1265 = vtanh.f32 %v691_v39 }
 0x304   :  { %v1266_v42 = vpop.eup %1265 }
 0x305   :  { %v694_v40 = vmul.f32 %v1266_v42, %v693_v22 }
 0x307   :  { %v1898_v56 = vadd.f32 %v695_v4, %v694_v40 }
 0x309   :  { %v697_v10 = vpack.c.bf16 %v1898_v56, %v1898_v56 }
 0x30b   :  { %706 = vmatmul.bf16.vlgmr.msrb.gmra.mxu2 %v697_v10  ;;  %719 = vmatmul.bf16.vlgmr.msra.gmra.mxu3 %v697_v10 }
 0x30c   :  { %732 = vmatmul.bf16.vlgmr.msra.gmra.mxu0 %v697_v10  ;;  %898 = vmatpush.bf16.msrb.mxu2 %v1417_v20 }
 0x30d   :  { %959 = vmatpush.bf16.msra.mxu3 %v1383_v7  ;;  %972 = vmatpush.bf16.msra.mxu0 %v1530_v59 }
 0x310   :  { %899 = vmatpush.bf16.msrb.mxu2 %v1434_v25 }
 0x311   :  { %960 = vmatpush.bf16.msra.mxu3 %v1398_v13  ;;  %973 = vmatpush.bf16.msra.mxu0 %v1567_v8 }
 0x314   :  { %900 = vmatpush.bf16.msrb.mxu2 %v1452_v31 }
 0x315   :  { %961 = vmatpush.bf16.msra.mxu3 %v1415_v19  ;;  %974 = vmatpush.bf16.msra.mxu0 %v1596_v23 }
 0x318   :  { %901 = vmatpush.bf16.msrb.mxu2 %v1493_v46 }
 0x319   :  { %962 = vmatpush.bf16.msra.mxu3 %v1437_v26  ;;  %975 = vmatpush.bf16.msra.mxu0 %v1612_v30  ;;  %v144_v26 = vadd.f32 %v1801_v12, %v1751_v27 }
 0x31c   :  { %902 = vmatpush.bf16.msrb.mxu2 %v1525_v57 }
 0x31d   :  { %963 = vmatpush.bf16.msra.mxu3 %v1455_v32  ;;  %976 = vmatpush.bf16.msra.mxu0 %v1626_v16 }
 0x320   :  { %903 = vmatpush.bf16.msrb.mxu2 %v1554_v3 }
 0x321   :  { %964 = vmatpush.bf16.msra.mxu3 %v1471_v37  ;;  %977 = vmatpush.bf16.msra.mxu0 %v1640_v38 }
 0x324   :  { %904 = vmatpush.bf16.msrb.mxu2 %v1579_v14 }
 0x325   :  { %965 = vmatpush.bf16.msra.mxu3 %v1496_v47  ;;  %978 = vmatpush.bf16.msra.mxu0 %v1658_v43 }
 0x328   :  { %905 = vmatpush.bf16.msrb.mxu2 %v1599_v24 }
 0x329   :  { %966 = vmatpush.bf16.msra.mxu3 %v1528_v58  ;;  %979 = vmatpush.bf16.msra.mxu0 %v1672_v50 }
 0x389   :  { %v733_v7 = vpop.f32.mrf.mxu0 }
 0x38a   :  { %v734_v62 = vadd.f32 %v733_v7, %v1759_v60 }
 0x38e   :  { %v707_v13 = vpop.f32.mrf.mxu2  ;;  %v720_v19 = vpop.f32.mrf.mxu3 }
 0x38f   :  { %v708_v32 = vadd.f32 %v707_v13, %v1742_v63  ;;  %v721_v37 = vadd.f32 %v720_v19, %v1755_v33 }
 0x391   :  { %v737_v47 = vadd.f32 %v708_v32, %v1745_v5  ;;  %v757_v59 = vadd.f32 %v721_v37, %v144_v26  ;;  %v735_v8 = vpop.f32.mrf.mxu0 }
 0x393   :  { %v738_v23 = vsub.f32 0.0, %v737_v47  ;;  %v758_v30 = vsub.f32 0.0, %v757_v59 }
 0x395   :  { %v739_v16 = vmul.f32 1.442695, %v738_v23  ;;  %v759_v58 = vmul.f32 1.442695, %v758_v30 }
 0x396   :  { %v709_v38 = vpop.f32.mrf.mxu2  ;;  %v722_v43 = vpop.f32.mrf.mxu3 }
 0x397   :  { %1267 = vpow2.f32 %v739_v16 }
 0x398   :  { %1269 = vpow2.f32 %v759_v58 }
 0x39d   :  { %v1268_v50 = vpop.eup %1267 }
 0x39e   :  { %v1270_v48 = vpop.eup %1269  ;;  %v741_v9 = vadd.f32 1.0, %v1268_v50 }
 0x39f   :  { %v761_v12 = vadd.f32 1.0, %v1270_v48 }
 0x3a0   :  { %1271 = vrcp.f32 %v741_v9  ;;  %v753_v2 = vand.u32 2147483648, %v741_v9  ;;  %v751_v51 = vand.u32 2147483647, %v741_v9  ;;  %vm747_vm2 = vweird.f32 %v741_v9 }
 0x3a1   :  { %1273 = vrcp.f32 %v761_v12  ;;  %v773_v53 = vand.u32 2147483648, %v761_v12  ;;  %vm767_vm6 = vweird.f32 %v761_v12  ;;  %v771_v39 = vand.u32 2147483647, %v761_v12 }
 0x3a2   :  { %v754_v52 = vor.u32 1.1754944e-38, %v753_v2  ;;  %vm752_vm4 = vcmp.eq.f32.partialorder %v751_v51, 8.507059e+37 }
 0x3a3   :  { %v774_v1 = vor.u32 1.1754944e-38, %v773_v53  ;;  %vm772_vm8 = vcmp.eq.f32.partialorder %v771_v39, 8.507059e+37 }
 0x3a6   :  { %v1272_v34 = vpop.eup %1271 }
 0x3a7   :  { %v1274_v0 = vpop.eup %1273  ;;  %v743_v49 = vmul.f32 %v1272_v34, %v741_v9  ;;  %vm748_vm1 = vweird.f32 %v1272_v34 }
 0x3a8   :  { %v763_v5 = vmul.f32 %v1274_v0, %v761_v12  ;;  %vm749_vm3 = vmor %vm747_vm2, %vm748_vm1  ;;  %vm768_vm5 = vweird.f32 %v1274_v0 }
 0x3a9   :  { %v744_v45 = vsub.f32 1.0, %v743_v49  ;;  %vm769_vm7 = vmor %vm767_vm6, %vm768_vm5 }
 0x3aa   :  { %v764_v6 = vsub.f32 1.0, %v763_v5  ;;  %v1998_v5 = vld [vmem:[#allocation7_spill] sm:$0xff] }
 0x3ab   :  { %v745_v61 = vmul.f32 %v1272_v34, %v744_v45  ;;  %v175_v45 = vadd.f32 %v1998_v5, %v1762_v11 }
 0x3ac   :  { %v765_v44 = vmul.f32 %v1274_v0, %v764_v6 }
 0x3ad   :  { %v746_v21 = vadd.f32 %v1272_v34, %v745_v61 }
 0x3ae   :  { %v766_v35 = vadd.f32 %v1274_v0, %v765_v44 }
 0x3af   :  { %v750_v28 = vsel %vm749_vm3, %v1272_v34, %v746_v21 }
 0x3b0   :  { %v755_v41 = vsel %vm752_vm4, %v754_v52, %v750_v28  ;;  %v770_v54 = vsel %vm769_vm7, %v1274_v0, %v766_v35 }
 0x3b1   :  { %v777_v36 = vmul.f32 %v755_v41, %v734_v62  ;;  %v775_v22 = vsel %vm772_vm8, %v774_v1, %v770_v54 }
 0x3b2   :  { %v780_v42 = vsub.f32 1.0, %v775_v22  ;;  %v782_v10 = vmul.f32 %v775_v22, %v1898_v56  ;;  %v1999_v22 = vld [vmem:[#allocation8_spill] sm:$0xff] }
 0x3b3   :  { %v778_v55 = vadd.f32 %v777_v36, %v173_v29 }
 0x3b5   :  { %1275 = vtanh.f32 %v778_v55 }
 0x3bb   :  { %v1276_v40 = vpop.eup %1275 }
 0x3bc   :  { %v781_v4 = vmul.f32 %v1276_v40, %v780_v42  ;;  %v149_v42 = vadd.f32 %v1999_v22, %v1751_v27 }
 0x3be   :  { %v1935_v7 = vadd.f32 %v782_v10, %v781_v4  ;;  %v2000_v10 = vld [vmem:[#allocation5_spill] sm:$0xff] }
 0x3c0   :  { %v784_v17 = vpack.c.bf16 %v1935_v7, %v1935_v7 }
 0x3c2   :  { %793 = vmatmul.bf16.vlgmr.msra.gmra.mxu1 %v784_v17  ;;  %806 = vmatmul.bf16.vlgmr.msra.gmra.mxu2 %v784_v17 }
 0x3c3   :  { %819 = vmatmul.bf16.vlgmr.msrb.gmra.mxu3 %v784_v17  ;;  %985 = vmatpush.bf16.msra.mxu1 %v1417_v20 }
 0x3c7   :  { %986 = vmatpush.bf16.msra.mxu1 %v1434_v25  ;;  %v146_v25 = vadd.f32 %v1805_v18, %v1751_v27 }
 0x3cb   :  { %987 = vmatpush.bf16.msra.mxu1 %v1452_v31 }
 0x3cf   :  { %988 = vmatpush.bf16.msra.mxu1 %v1493_v46 }
 0x3d3   :  { %989 = vmatpush.bf16.msra.mxu1 %v1525_v57 }
 0x3d7   :  { %990 = vmatpush.bf16.msra.mxu1 %v1554_v3 }
 0x3db   :  { %991 = vmatpush.bf16.msra.mxu1 %v1579_v14 }
 0x3df   :  { %992 = vmatpush.bf16.msra.mxu1 %v1599_v24 }
 0x43f   :  { %v794_v56 = vpop.f32.mrf.mxu1 }
 0x440   :  { %v795_v13 = vadd.f32 %v794_v56, %v1742_v63 }
 0x442   :  { %v824_v19 = vadd.f32 %v795_v13, %v1747_v15 }
 0x444   :  { %v825_v20 = vsub.f32 0.0, %v824_v19 }
 0x445   :  { %v807_v26 = vpop.f32.mrf.mxu2 }
 0x446   :  { %v826_v31 = vmul.f32 1.442695, %v825_v20  ;;  %v808_v46 = vadd.f32 %v807_v26, %v1755_v33  ;;  %v820_v57 = vpop.f32.mrf.mxu3 }
 0x447   :  { %v796_v32 = vpop.f32.mrf.mxu1  ;;  %v821_v0 = vadd.f32 %v820_v57, %v1759_v60 }
 0x448   :  { %1277 = vpow2.f32 %v826_v31  ;;  %v844_v3 = vadd.f32 %v808_v46, %v146_v25 }
 0x44a   :  { %v845_v14 = vsub.f32 0.0, %v844_v3 }
 0x44c   :  { %v846_v37 = vmul.f32 1.442695, %v845_v14 }
 0x44d   :  { %v809_v24 = vpop.f32.mrf.mxu2 }
 0x44e   :  { %v1278_v47 = vpop.eup %1277  ;;  %1279 = vpow2.f32 %v846_v37  ;;  %v822_v59 = vpop.f32.mrf.mxu3 }
 0x44f   :  { %v828_v8 = vadd.f32 1.0, %v1278_v47 }
 0x451   :  { %1281 = vrcp.f32 %v828_v8  ;;  %v840_v58 = vand.u32 2147483648, %v828_v8  ;;  %v838_v43 = vand.u32 2147483647, %v828_v8  ;;  %vm834_vm10 = vweird.f32 %v828_v8 }
 0x453   :  { %v841_v12 = vor.u32 1.1754944e-38, %v840_v58  ;;  %vm839_vm12 = vcmp.eq.f32.partialorder %v838_v43, 8.507059e+37 }
 0x454   :  { %v1280_v15 = vpop.eup %1279 }
 0x455   :  { %v848_v23 = vadd.f32 1.0, %v1280_v15 }
 0x457   :  { %v1282_v30 = vpop.eup %1281  ;;  %1283 = vrcp.f32 %v848_v23  ;;  %v860_v51 = vand.u32 2147483648, %v848_v23  ;;  %v858_v44 = vand.u32 2147483647, %v848_v23  ;;  %vm854_vm14 = vweird.f32 %v848_v23 }
 0x458   :  { %v830_v18 = vmul.f32 %v1282_v30, %v828_v8  ;;  %vm835_vm9 = vweird.f32 %v1282_v30 }
 0x459   :  { %vm836_vm11 = vmor %vm834_vm10, %vm835_vm9  ;;  %v861_v28 = vor.u32 1.1754944e-38, %v860_v51  ;;  %vm859_vm0 = vcmp.eq.f32.partialorder %v858_v44, 8.507059e+37 }
 0x45a   :  { %v831_v16 = vsub.f32 1.0, %v830_v18 }
 0x45c   :  { %v832_v38 = vmul.f32 %v1282_v30, %v831_v16 }
 0x45d   :  { %v1284_v50 = vpop.eup %1283 }
 0x45e   :  { %v850_v48 = vmul.f32 %v1284_v50, %v848_v23  ;;  %v833_v9 = vadd.f32 %v1282_v30, %v832_v38  ;;  %vm855_vm13 = vweird.f32 %v1284_v50 }
 0x45f   :  { %vm856_vm15 = vmor %vm854_vm14, %vm855_vm13 }
 0x460   :  { %v851_v34 = vsub.f32 1.0, %v850_v48  ;;  %v837_v49 = vsel %vm836_vm11, %v1282_v30, %v833_v9 }
 0x461   :  { %v842_v2 = vsel %vm839_vm12, %v841_v12, %v837_v49  ;;  %v2001_v12 = vld [vmem:[#allocation9_spill] sm:$0xff] }
 0x462   :  { %v852_v6 = vmul.f32 %v1284_v50, %v851_v34  ;;  %v864_v61 = vmul.f32 %v842_v2, %v821_v0  ;;  %v178_v34 = vadd.f32 %v2001_v12, %v1762_v11 }
 0x464   :  { %v865_v21 = vadd.f32 %v864_v61, %v175_v45  ;;  %v853_v52 = vadd.f32 %v1284_v50, %v852_v6 }
 0x466   :  { %1285 = vtanh.f32 %v865_v21  ;;  %v857_v62 = vsel %vm856_vm15, %v1284_v50, %v853_v52 }
 0x467   :  { %v862_v41 = vsel %vm859_vm0, %v861_v28, %v857_v62 }
 0x468   :  { %v867_v35 = vsub.f32 1.0, %v862_v41  ;;  %v869_v36 = vmul.f32 %v862_v41, %v1935_v7 }
 0x46c   :  { %v1286_v29 = vpop.eup %1285 }
 0x46d   :  { %v868_v53 = vmul.f32 %v1286_v29, %v867_v35  ;;  %v2002_v35 = vld [vmem:[#allocation10_spill] sm:$0xff] }
 0x46e   :  { %v151_v29 = vadd.f32 %v2002_v35, %v1751_v27 }
 0x46f   :  { %v1956_v39 = vadd.f32 %v869_v36, %v868_v53 }
 0x471   :  { %v871_v55 = vpack.c.bf16 %v1956_v39, %v1956_v39 }
 0x473   :  { %880 = vmatmul.bf16.vlgmr.msrb.gmra.mxu0 %v871_v55  ;;  %893 = vmatmul.bf16.vlgmr.msrb.gmra.mxu1 %v871_v55 }
 0x474   :  { %906 = vmatmul.bf16.vlgmr.msrb.gmra.mxu2 %v871_v55 }
 0x4f0   :  { %v881_v54 = vpop.f32.mrf.mxu0  ;;  %v894_v1 = vpop.f32.mrf.mxu1 }
 0x4f1   :  { %v882_v40 = vadd.f32 %v881_v54, %v1742_v63  ;;  %v895_v4 = vadd.f32 %v894_v1, %v1755_v33 }
 0x4f3   :  { %v911_v17 = vadd.f32 %v882_v40, %v2000_v10  ;;  %v931_v7 = vadd.f32 %v895_v4, %v149_v42  ;;  %v2003_v40 = vld [vmem:[#allocation6_spill] sm:$0xff] }
 0x4f5   :  { %v912_v56 = vsub.f32 0.0, %v911_v17  ;;  %v932_v13 = vsub.f32 0.0, %v931_v7 }
 0x4f7   :  { %v913_v19 = vmul.f32 1.442695, %v912_v56  ;;  %v933_v20 = vmul.f32 1.442695, %v932_v13  ;;  %v907_v26 = vpop.f32.mrf.mxu2 }
 0x4f8   :  { %v883_v25 = vpop.f32.mrf.mxu0  ;;  %v896_v31 = vpop.f32.mrf.mxu1  ;;  %v908_v43 = vadd.f32 %v907_v26, %v1759_v60 }
 0x4f9   :  { %1287 = vpow2.f32 %v913_v19 }
 0x4fa   :  { %1289 = vpow2.f32 %v933_v20 }
 0x4ff   :  { %v1288_v46 = vpop.eup %1287  ;;  %v909_v57 = vpop.f32.mrf.mxu2 }
 0x500   :  { %v1290_v32 = vpop.eup %1289  ;;  %v915_v3 = vadd.f32 1.0, %v1288_v46 }
 0x501   :  { %v935_v14 = vadd.f32 1.0, %v1290_v32 }
 0x502   :  { %1291 = vrcp.f32 %v915_v3  ;;  %v927_v23 = vand.u32 2147483648, %v915_v3  ;;  %v925_v18 = vand.u32 2147483647, %v915_v3  ;;  %vm921_vm2 = vweird.f32 %v915_v3 }
 0x503   :  { %1293 = vrcp.f32 %v935_v14  ;;  %v947_v49 = vand.u32 2147483648, %v935_v14  ;;  %vm941_vm6 = vweird.f32 %v935_v14  ;;  %v945_v5 = vand.u32 2147483647, %v935_v14 }
 0x504   :  { %v928_v38 = vor.u32 1.1754944e-38, %v927_v23  ;;  %vm926_vm4 = vcmp.eq.f32.partialorder %v925_v18, 8.507059e+37  ;;  %v2004_v23 = vld [vmem:[#allocation11_spill] sm:$0xff] }
 0x505   :  { %v948_v6 = vor.u32 1.1754944e-38, %v947_v49  ;;  %vm946_vm8 = vcmp.eq.f32.partialorder %v945_v5, 8.507059e+37 }
 0x508   :  { %v1292_v37 = vpop.eup %1291 }
 0x509   :  { %v1294_v24 = vpop.eup %1293  ;;  %v917_v47 = vmul.f32 %v1292_v37, %v915_v3  ;;  %vm922_vm1 = vweird.f32 %v1292_v37 }
 0x50a   :  { %v937_v59 = vmul.f32 %v1294_v24, %v935_v14  ;;  %vm923_vm3 = vmor %vm921_vm2, %vm922_vm1  ;;  %vm942_vm5 = vweird.f32 %v1294_v24  ;;  %vm1045_vm1 = vcmask 254976  }
 0x50b   :  { %v918_v8 = vsub.f32 1.0, %v917_v47  ;;  %vm943_vm7 = vmor %vm941_vm6, %vm942_vm5 }
 0x50c   :  { %v938_v15 = vsub.f32 1.0, %v937_v59 }
 0x50d   :  { %v919_v30 = vmul.f32 %v1292_v37, %v918_v8 }
 0x50e   :  { %v939_v16 = vmul.f32 %v1294_v24, %v938_v15 }
 0x50f   :  { %v920_v58 = vadd.f32 %v1292_v37, %v919_v30  ;;  %v180_v30 = vadd.f32 %v2004_v23, %v1762_v11 }
 0x510   :  { %v940_v9 = vadd.f32 %v1294_v24, %v939_v16 }
 0x511   :  { %v924_v50 = vsel %vm923_vm3, %v1292_v37, %v920_v58 }
 0x512   :  { %v929_v48 = vsel %vm926_vm4, %v928_v38, %v924_v50  ;;  %v944_v2 = vsel %vm943_vm7, %v1294_v24, %v940_v9 }
 0x513   :  { %v951_v0 = vmul.f32 %v929_v48, %v908_v43  ;;  %v949_v61 = vsel %vm946_vm8, %v948_v6, %v944_v2 }
 0x514   :  { %v954_v51 = vsub.f32 1.0, %v949_v61  ;;  %v956_v52 = vmul.f32 %v949_v61, %v1956_v39 }
 0x515   :  { %v952_v45 = vadd.f32 %v951_v0, %v178_v34 }
 0x517   :  { %1295 = vtanh.f32 %v952_v45 }
 0x51d   :  { %v1296_v44 = vpop.eup %1295 }
 0x51e   :  { %v955_v21 = vmul.f32 %v1296_v44, %v954_v51 }
 0x520   :  { %v1969_v62 = vadd.f32 %v956_v52, %v955_v21 }
 0x522   :  { %v958_v28 = vpack.c.bf16 %v1969_v62, %v1969_v62 }
 0x524   :  { %967 = vmatmul.bf16.vlgmr.msra.gmra.mxu3 %v958_v28  ;;  %980 = vmatmul.bf16.vlgmr.msra.gmra.mxu0 %v958_v28 }
 0x525   :  { %993 = vmatmul.bf16.vlgmr.msra.gmra.mxu1 %v958_v28 }
 0x5a1   :  { %v981_v41 = vpop.f32.mrf.mxu0 }
 0x5a2   :  { %v982_v53 = vadd.f32 %v981_v41, %v1755_v33  ;;  %v994_v36 = vpop.f32.mrf.mxu1 }
 0x5a3   :  { %v995_v47 = vadd.f32 %v994_v36, %v1759_v60 }
 0x5a4   :  { %v1018_v55 = vadd.f32 %v982_v53, %v151_v29 }
 0x5a6   :  { %v1019_v54 = vsub.f32 0.0, %v1018_v55 }
 0x5a7   :  { %v968_v1 = vpop.f32.mrf.mxu3 }
 0x5a8   :  { %v1020_v22 = vmul.f32 1.442695, %v1019_v54  ;;  %v969_v39 = vadd.f32 %v968_v1, %v1742_v63 }
 0x5a9   :  { %v983_v42 = vpop.f32.mrf.mxu0 }
 0x5aa   :  { %1297 = vpow2.f32 %v1020_v22  ;;  %v998_v4 = vadd.f32 %v969_v39, %v2003_v40  ;;  %v996_v10 = vpop.f32.mrf.mxu1 }
 0x5ac   :  { %v999_v17 = vsub.f32 0.0, %v998_v4 }
 0x5ae   :  { %v1000_v7 = vmul.f32 1.442695, %v999_v17 }
 0x5af   :  { %v970_v56 = vpop.f32.mrf.mxu3 }
 0x5b0   :  { %v1298_v13 = vpop.eup %1297  ;;  %1299 = vpow2.f32 %v1000_v7 }
 0x5b1   :  { %v1022_v27 = vadd.f32 1.0, %v1298_v13 }
 0x5b3   :  { %1301 = vrcp.f32 %v1022_v27  ;;  %v1034_v18 = vand.u32 2147483648, %v1022_v27  ;;  %vm1028_vm14 = vweird.f32 %v1022_v27  ;;  %v1032_v58 = vand.u32 2147483647, %v1022_v27 }
 0x5b5   :  { %v1035_v50 = vor.u32 1.1754944e-38, %v1034_v18  ;;  %vm1033_vm0 = vcmp.eq.f32.partialorder %v1032_v58, 8.507059e+37 }
 0x5b6   :  { %v1300_v33 = vpop.eup %1299 }
 0x5b7   :  { %v1002_v19 = vadd.f32 1.0, %v1300_v33 }
 0x5b9   :  { %1303 = vrcp.f32 %v1002_v19  ;;  %v1302_v20 = vpop.eup %1301  ;;  %v1014_v57 = vand.u32 2147483648, %v1002_v19  ;;  %v1012_v3 = vand.u32 2147483647, %v1002_v19  ;;  %vm1008_vm10 = vweird.f32 %v1002_v19 }
 0x5ba   :  { %v1024_v26 = vmul.f32 %v1302_v20, %v1022_v27  ;;  %vm1029_vm13 = vweird.f32 %v1302_v20 }
 0x5bb   :  { %v1015_v24 = vor.u32 1.1754944e-38, %v1014_v57  ;;  %vm1013_vm12 = vcmp.eq.f32.partialorder %v1012_v3, 8.507059e+37  ;;  %vm1030_vm15 = vmor %vm1028_vm14, %vm1029_vm13 }
 0x5bc   :  { %v1025_v63 = vsub.f32 1.0, %v1024_v26 }
 0x5be   :  { %v1026_v14 = vmul.f32 %v1302_v20, %v1025_v63 }
 0x5bf   :  { %v1304_v25 = vpop.eup %1303 }
 0x5c0   :  { %v1004_v31 = vmul.f32 %v1304_v25, %v1002_v19  ;;  %vm1009_vm9 = vweird.f32 %v1304_v25  ;;  %v1027_v15 = vadd.f32 %v1302_v20, %v1026_v14 }
 0x5c1   :  { %vm1010_vm11 = vmor %vm1008_vm10, %vm1009_vm9 }
 0x5c2   :  { %v1005_v46 = vsub.f32 1.0, %v1004_v31  ;;  %v1031_v43 = vsel %vm1030_vm15, %v1302_v20, %v1027_v15 }
 0x5c3   :  { %v1036_v48 = vsel %vm1033_vm0, %v1035_v50, %v1031_v43 }
 0x5c4   :  { %v1006_v32 = vmul.f32 %v1304_v25, %v1005_v46  ;;  %v1041_v60 = vsub.f32 1.0, %v1036_v48  ;;  %v1043_v12 = vmul.f32 %v1036_v48, %v1969_v62 }
 0x5c6   :  { %v1007_v37 = vadd.f32 %v1304_v25, %v1006_v32 }
 0x5c8   :  { %v1011_v59 = vsel %vm1010_vm11, %v1304_v25, %v1007_v37 }
 0x5c9   :  { %v1016_v8 = vsel %vm1013_vm12, %v1015_v24, %v1011_v59 }
 0x5ca   :  { %v1038_v16 = vmul.f32 %v1016_v8, %v995_v47 }
 0x5cc   :  { %v1039_v38 = vadd.f32 %v1038_v16, %v180_v30 }
 0x5ce   :  { %1305 = vtanh.f32 %v1039_v38 }
 0x5d4   :  { %v1306_v9 = vpop.eup %1305 }
 0x5d5   :  { %v1042_v11 = vmul.f32 %v1306_v9, %v1041_v60 }
 0x5d7   :  { %v1044_v34 = vadd.f32 %v1043_v12, %v1042_v11 }
 0x5d9   :  { %1046 = vst.msk [vmem:[#allocation2] sm:$0x3] %vm1045_vm1, %v1044_v34 }
 0x5da   :  { %1057 = dma.vmem_to_hbm [thread:$0]  %s1053_s4, 32, %s1055_s6, [#allocation3]  }
 0x5db   :  { %1331 = dma.done.wait [#allocation3], 32  }
 0x5dc   :  { %1332 = vsyncadd [#allocation3], 4294967264 }
 0x5dd   :  { %1062 = vsyncpa [#allocation3], 1 }

// kernel: visual_semantic_embedding.2
= control target key start
LH: loop header
LB: loop body
LE: loop exit
PB: predicated region body
PF: predicated region fallthrough
CT: control target
= control target key end

     0   :  { %s6504_s0 = inlined_call_operand.vmem [shape: f32[2,16,16,4], index: 0, kind: input, shape index: {}]   ;;  %s6505_s1 = inlined_call_operand.vmem [shape: bf16[36,8], index: 1, kind: input, shape index: {}]   ;;  %s6506_s2 = inlined_call_operand.vmem [shape: f32[1,8], index: 2, kind: input, shape index: {}]   ;;  %s6507_s3 = inlined_call_operand.vmem [shape: bf16[72,8], index: 3, kind: input, shape index: {}]   ;;  %s6508_s4 = inlined_call_operand.vmem [shape: f32[1,8], index: 4, kind: input, shape index: {}]   ;;  %s6509_s5 = inlined_call_operand.vmem [shape: bf16[72,16], index: 5, kind: input, shape index: {}]   ;;  %s6510_s6 = inlined_call_operand.vmem [shape: f32[1,16], index: 6, kind: input, shape index: {}]   ;;  %s6511_s7 = inlined_call_operand.vmem [shape: bf16[256,64], index: 7, kind: input, shape index: {}]   ;;  %s6512_s8 = inlined_call_operand.vmem [shape: f32[1,64], index: 8, kind: input, shape index: {}]   ;;  %s6513_s9 = inlined_call_operand.vmem [shape: bf16[64,64], index: 9, kind: input, shape index: {}]   ;;  %s6514_s10 = inlined_call_operand.vmem [shape: f32[1,64], index: 10, kind: input, shape index: {}]   ;;  %s6515_s11 = inlined_call_operand.vmem [shape: bf16[64,32], index: 11, kind: input, shape index: {}]   ;;  %s6516_s12 = inlined_call_operand.hbm [shape: f32[2,1,32], index: 12, kind: output, shape index: {}]  }
   0x1   :  { %6521 = sst [smem:[#allocation5_spill]] %s6504_s0 }
   0x2   :  { %6522 = sst [smem:[#allocation6_spill]] %s6505_s1 }
   0x3   :  { %6523 = sst [smem:[#allocation7_spill]] %s6506_s2 }
   0x4   :  { %17 = vsyncpa [#allocation3], 0 }
   0x5   :  { %19 = vsyncpa [#allocation3 + $0x1], 0  ;;  %s4637_s21 = smov 0   ;;  %s4639_s22 = smov 0  }
   0x6   :  { %s4641_s23 = smov 0   ;;  %s4643_s24 = smov 0  }
   0x7 LB: > { %s4658_s25 = sadd.s32 4294967295, %s4561_s24   ;;  %s3502_s26 = sadd.s32 4294967294, %s4561_s24   ;;  %s4561_s24 = sphi %s4643_s24, %s6534_s24   ;;  %s4557_s23 = sphi %s4641_s23, %s6533_s23   ;;  %s4553_s22 = sphi %s4639_s22, %s6532_s22   ;;  %s4549_s21 = sphi %s4637_s21, %s6531_s21  }
   0x8   : > { %s4662_s27 = sadd.s32 1, %s4561_s24   ;;  %s289_s28 = sadd.s32 1, %s4557_s23 }
   0x9   : > { %s286_s29 = ssub.s32 %s4561_s24, %s4662_s27  ;;  %p299_p0 = scmp.ne.s32.totalorder %s4557_s23, %s4553_s22 }
   0xa   : > { %p287_p1 = scmp.eq.s32.totalorder %s286_s29, 0  ;;  %p300_p2 = scmp.eq.s32.totalorder %s4658_s25, 1 }
   0xb   : > { %p305_p3 = scmp.ne.s32.totalorder %s4553_s22, %s4549_s21  ;;  %p306_p4 = scmp.eq.s32.totalorder %s3502_s26, 1 }
   0xc   : > { %s4673_s30 = scalar_select %p287_p1, %s4557_s23, %s289_s28  }
   0xd   : > { %p4675_p5 = por %p300_p2, %p299_p0  ;;  %p4679_p6 = por %p306_p4, %p305_p3 }
   0xe   : > { %p3505_p7 = scmp.ge.s32.totalorder %s4561_s24, 1  ;;  %p365_p8 = scmp.lt.s32.totalorder %s4561_s24, 3 }
  0x10   : > { %p366_p9 = pnand %p3505_p7, %p365_p8 }
  0x11   : > { %p406_p10 = scmp.lt.s32.totalorder (!%p366_p9), %s4658_s25, 1  ;;  %s6526_s0 = sld [smem:[#allocation5_spill]] (!%p366_p9) }
  0x12   : > { %369 = sbr.rel (%p366_p9) target bundleno = 2263 (0x8d7), region = 68  ;;  %s4563_s20 = smov (!%p366_p9), 4  }
  0x13   : > { %s4564_s26 = smov (!%p366_p9), 8   ;;  %s6519_s28 = smov (!%p366_p9), 24  }
  0x14   : > { %s4567_s29 = smov (!%p366_p9), 12   ;;  %s6527_s1 = sld [smem:[#allocation6_spill]] (!%p366_p9) }
  0x15   : > { %s6528_s2 = sld [smem:[#allocation7_spill]] (!%p366_p9)  ;;  %s6517_s17 = smov (!%p366_p9), 16  }
  0x16   : > { %s3443_s18 = scalar_lea.hbm (!%p366_p9), %s6516_s12, %s4658_s25 }
  0x17   : > { %s407_s15 = scalar_select %p406_p10, %s4658_s25, 1  ;;  %vm585_vm0 = vcmask 1046528   ;;  %v4565_v31 = vmov 0.0   ;;  %vm483_vm1 = vcmask 1040384   ;;  %vm888_vm2 = vcmask 31744  }
  0x18   : > { %v586_v32 = vrot.slane %v4565_v31, 1  ;;  %vm923_vm3 = vcmask 64512   ;;  %vm1333_vm4 = vcmask 1041408   ;;  %vm1184_vm5 = vcmask 97280   ;;  %s4519_s25 = scalar_lea.hbm %s6516_s12, 2 }
  0x19   : > { %s3684_s16 = sshll.u32 %s407_s15, 8  ;;  %vm1217_vm6 = vcmask 195584   ;;  %vm1284_vm7 = vcmask 293888   ;;  %vm1927_vm8 = vcmask 130048   ;;  %vm2348_vm9 = vcmask 1043456  }
  0x1a   : > { %s4690_s19 = scalar_lea.vmem %s6526_s0, %s3684_s16  ;;  %v653_v34 = vsel %vm585_vm0, %v586_v32, 0.0  ;;  %vm2220_vm10 = vcmask 392192   ;;  %vm2299_vm11 = vcmask 588800   ;;  %vm2697_vm12 = vcmask 1042432   ;;  %s4570_s16 = smov 32  }
  0x1b   : > { %v4693_v0 = vld [vmem:[%s4690_s19 + $0x20] sm:$0xff]  ;;  %v417_v1 = vld [vmem:[%s4690_s19 + $0x28] sm:$0xff]  ;;  %v4706_v10 = vld [vmem:[%s4690_s19 + $0x10] sm:$0xff]  ;;  %v4734_v35 = vpack.i.bf16 %v653_v34, %v586_v32  ;;  %vm2714_vm13 = vcmask 1044480   ;;  %vm2723_vm14 = vcmask 1045504   ;;  %vm3154_vm15 = vcmask 261120  }
  0x1c   : > { %v4697_v2 = vld [vmem:[%s4690_s19] sm:$0xff]  ;;  %v595_v3 = vrot.slane %v417_v1, 1  ;;  %v3795_v4 = vpack.i.bf16 %v417_v1, %v4693_v0  ;;  %v413_v5 = vld [vmem:[%s4690_s19 + $0x8] sm:$0xff]  ;;  %v594_v6 = vrot.slane %v4693_v0, 1  ;;  %v415_v11 = vld [vmem:[%s4690_s19 + $0x18] sm:$0xff]  ;;  %v591_v17 = vrot.slane %v4706_v10, 1 }
  0x1d   : > { %v3775_v7 = vpack.i.bf16 %v413_v5, %v4697_v2  ;;  %v588_v8 = vrot.slane %v4697_v2, 1  ;;  %v589_v9 = vrot.slane %v413_v5, 1  ;;  %v592_v18 = vrot.slane %v415_v11, 1  ;;  %v4720_v23 = vld [vmem:[%s4690_s19 + $0x30] sm:$0xff]  ;;  %v419_v24 = vld [vmem:[%s4690_s19 + $0x38] sm:$0xff]  ;;  %v4741_v39 = vld [vmem:[%s4690_s19 + $0x48] sm:$0xff] }
  0x1e   : > { %3796 = vrot.lane.b32.xlu2 %v3795_v4, %s4563_s20  ;;  %v596_v12 = vsel %vm585_vm0, %v594_v6, %v595_v3  ;;  %v656_v13 = vsel %vm585_vm0, %v595_v3, 0.0  ;;  %v3780_v20 = vpack.i.bf16 %v415_v11, %v4706_v10  ;;  %v597_v26 = vrot.slane %v4720_v23, 1  ;;  %v4744_v40 = vld [vmem:[%s4690_s19 + $0x50] sm:$0xff]  ;;  %v4751_v44 = vld [vmem:[%s4690_s19 + $0x40] sm:$0xff] }
  0x1f   : > { %3776 = vrot.lane.b32.xlu0 %v3775_v7, %s4563_s20  ;;  %v590_v14 = vsel %vm585_vm0, %v588_v8, %v589_v9  ;;  %v654_v15 = vsel %vm585_vm0, %v589_v9, 0.0  ;;  %v3800_v19 = vpack.i.bf16 %v656_v13, %v596_v12  ;;  %v593_v21 = vsel %vm585_vm0, %v591_v17, %v592_v18 }
  0x20   : > { %v3785_v16 = vpack.i.bf16 %v654_v15, %v590_v14  ;;  %v655_v22 = vsel %vm585_vm0, %v592_v18, 0.0  ;;  %v598_v27 = vrot.slane %v419_v24, 1  ;;  %v3805_v28 = vpack.i.bf16 %v419_v24, %v4720_v23 }
  0x21   : > { %v3790_v25 = vpack.i.bf16 %v655_v22, %v593_v21  ;;  %v493_v36 = vrot.slane %v417_v1, 7  ;;  %v492_v37 = vrot.slane %v4693_v0, 7  ;;  %v3835_v41 = vpack.i.bf16 %v4744_v40, %v4741_v39  ;;  %v4773_v0 = vld [vmem:[%s4690_s19 + $0x60] sm:$0xff]  ;;  %v4776_v1 = vld [vmem:[%s4690_s19 + $0x68] sm:$0xff] }
  0x22   : > { %3786 = vrot.lane.b32.xlu1 %v3785_v16, %s4564_s26  ;;  %v599_v29 = vsel %vm585_vm0, %v597_v26, %v598_v27  ;;  %v657_v30 = vsel %vm585_vm0, %v598_v27, 0.0  ;;  %v487_v42 = vrot.slane %v413_v5, 7  ;;  %v486_v43 = vrot.slane %v4697_v2, 7  ;;  %v4801_v26 = vld [vmem:[%s4690_s19 + $0xb0] sm:$0xff] }
  0x23   : > { %v3810_v33 = vpack.i.bf16 %v657_v30, %v599_v29  ;;  %v494_v38 = vsel %vm483_vm1, %v492_v37, %v493_v36  ;;  %v490_v46 = vrot.slane %v415_v11, 7  ;;  %v489_v47 = vrot.slane %v4706_v10, 7  ;;  %v4806_v29 = vld [vmem:[%s4690_s19 + $0x78] sm:$0xff] }
  0x24   : > { %v488_v45 = vsel %vm483_vm1, %v486_v43, %v487_v42  ;;  %v3815_v48 = vpack.i.bf16 %v4751_v44, %v4565_v31  ;;  %v571_v53 = vsel %vm483_vm1, 0.0, %v492_v37  ;;  %v496_v62 = vrot.slane %v419_v24, 7 }
  0x25   : > { %v491_v50 = vsel %vm483_vm1, %v489_v47, %v490_v46  ;;  %v495_v63 = vrot.slane %v4720_v23, 7  ;;  %v606_v2 = vrot.slane %v4773_v0, 1  ;;  %v607_v4 = vrot.slane %v4776_v1, 1  ;;  %v4824_v46 = vld [vmem:[%s4690_s19 + $0x58] sm:$0xff] }
  0x26   : > { %3801 = vrot.lane.b32.xlu2 %v3800_v19, %s4564_s26  ;;  %v569_v8 = vsel %vm483_vm1, 0.0, %v486_v43  ;;  %v600_v17 = vrot.slane %v4751_v44, 1  ;;  %v570_v23 = vsel %vm483_vm1, 0.0, %v489_v47  ;;  %v3880_v34 = vpack.i.bf16 %v4801_v26, %v4806_v29 }
  0x27   : > { %3781 = vrot.lane.b32.xlu0 %v3780_v20, %s4563_s20  ;;  %v497_v3 = vsel %vm483_vm1, %v495_v63, %v496_v62  ;;  %v608_v5 = vsel %vm585_vm0, %v606_v2, %v607_v4  ;;  %v660_v6 = vsel %vm585_vm0, %v607_v4, 0.0  ;;  %v601_v20 = vrot.slane %v4741_v39, 1  ;;  %v4851_v4 = vld [vmem:[%s4690_s19 + $0x70] sm:$0xff] }
  0x28   : > { %v3875_v11 = vpack.i.bf16 %v660_v6, %v608_v5 }
  0x29   : > { %v602_v27 = vsel %vm585_vm0, %v600_v17, %v601_v20 }
  0x2a   : > { %3791 = vrot.lane.b32.xlu1 %v3790_v25, %s4564_s26 }
  0x2e   : > { %3816 = vrot.lane.b32.xlu2 %v3815_v48, %s4563_s20 }
  0x2f   : > { %3806 = vrot.lane.b32.xlu0 %v3805_v28, %s4563_s20  ;;  %v658_v28 = vsel %vm585_vm0, %v601_v20, 0.0 }
  0x32   : > { %3811 = vrot.lane.b32.xlu1 %v3810_v33, %s4564_s26 }
  0x37   : > { %3821 = vrot.lane.b32.xlu0 %v4734_v35, %s4564_s26 }
  0x3f   : > { %3836 = vrot.lane.b32.xlu0 %v3835_v41, %s4563_s20 }
  0x78   : > { %v3797_v49 = vpop.permute.xlu2 %3796 }
  0x79   : > { %v3799_v51 = vunpack.i.h.bf16 %v3797_v49  ;;  %v3798_v52 = vunpack.i.l.bf16 %v3797_v49 }
  0x7b   : > { %v895_v54 = vsel %vm888_vm2, %v571_v53, %v3798_v52  ;;  %v896_v55 = vsel %vm888_vm2, %v494_v38, %v3799_v51  ;;  %v3840_v38 = vpack.i.bf16 %v658_v28, %v602_v27  ;;  %v499_v51 = vrot.slane %v4741_v39, 7 }
  0x7c   : > { %v3845_v52 = vpack.i.bf16 %v4773_v0, %v4824_v46  ;;  %v603_v53 = vrot.slane %v4744_v40, 1 }
  0x80   : > { %v3802_v56 = vpop.permute.xlu2 %3801 }
  0x81   : > { %v3804_v57 = vunpack.i.h.bf16 %v3802_v56  ;;  %v3803_v58 = vunpack.i.l.bf16 %v3802_v56  ;;  %v604_v56 = vrot.slane %v4824_v46, 1 }
  0x83   : > { %v4763_v59 = vsel %vm923_vm3, %v895_v54, %v3803_v58  ;;  %v4766_v60 = vsel %vm923_vm3, %v896_v55, %v3804_v57  ;;  %v498_v57 = vrot.slane %v4751_v44, 7  ;;  %v605_v2 = vsel %vm585_vm0, %v603_v53, %v604_v56 }
  0x84   : > { %v3865_v61 = vpack.i.bf16 %v4766_v60, %v4763_v59 }
  0x85   : > { %v4840_v39 = vsel %vm483_vm1, %v498_v57, %v499_v51 }
  0x86   : > { %3866 = vrot.lane.b32.xlu0 %v3865_v61, %s6519_s28 }
  0x88   : > { %v3817_v27 = vpop.permute.xlu2 %3816 }
  0x8e   : > { %3871 = vrot.lane.b32.xlu0 %v3865_v61, %s4567_s29 }
  0x91   : > { %v3777_v7 = vpop.permute.xlu0 %3776 }
  0x92   : > { %v3779_v9 = vunpack.i.h.bf16 %v3777_v7  ;;  %v3778_v10 = vunpack.i.l.bf16 %v3777_v7  ;;  %v609_v7 = vrot.slane %v4851_v4, 1 }
  0x94   : > { %v3787_v12 = vpop.permute.xlu1 %3786  ;;  %v891_v13 = vsel %vm888_vm2, %v569_v8, %v3778_v10  ;;  %v892_v14 = vsel %vm888_vm2, %v488_v45, %v3779_v9  ;;  %v610_v8 = vrot.slane %v4806_v29, 1 }
  0x95   : > { %v3789_v15 = vunpack.i.h.bf16 %v3787_v12  ;;  %v3788_v16 = vunpack.i.l.bf16 %v3787_v12  ;;  %v3860_v12 = vpack.i.bf16 %v4851_v4, %v4776_v1 }
  0x96   : > { %3876 = vrot.lane.b32.xlu0 %v3875_v11, %s4564_s26  ;;  %v611_v9 = vsel %vm585_vm0, %v609_v7, %v610_v8  ;;  %v661_v10 = vsel %vm585_vm0, %v610_v8, 0.0 }
  0x97   : > { %v4790_v18 = vsel %vm923_vm3, %v891_v13, %v3788_v16  ;;  %v4793_v19 = vsel %vm923_vm3, %v892_v14, %v3789_v15  ;;  %v3890_v11 = vpack.i.bf16 %v661_v10, %v611_v9  ;;  %v4866_v13 = vld [vmem:[%s4690_s19 + $0xc0] sm:$0xff]  ;;  %v4869_v14 = vld [vmem:[%s4690_s19 + $0xb8] sm:$0xff]  ;;  %v621_v16 = vrot.slane %v4801_v26, 1 }
  0x98   : > { %v3825_v21 = vpack.i.bf16 %v4793_v19, %v4790_v18  ;;  %v3895_v15 = vpack.i.bf16 %v4866_v13, %v4869_v14  ;;  %v622_v17 = vrot.slane %v4869_v14, 1 }
  0x99   : > { %v3782_v22 = vpop.permute.xlu0 %3781 }
  0x9a   : > { %v3784_v24 = vunpack.i.h.bf16 %v3782_v22  ;;  %v3783_v25 = vunpack.i.l.bf16 %v3782_v22  ;;  %3826 = vrot.lane.b32.xlu1 %v3825_v21, %s4567_s29  ;;  %v623_v20 = vsel %vm585_vm0, %v621_v16, %v622_v17  ;;  %v665_v21 = vsel %vm585_vm0, %v622_v17, 0.0 }
  0x9b   : > { %v3910_v22 = vpack.i.bf16 %v665_v21, %v623_v20  ;;  %v3819_v17 = vunpack.i.h.bf16 %v3817_v27  ;;  %v573_v20 = vsel %vm483_vm1, 0.0, %v498_v57  ;;  %v4941_v21 = vld [vmem:[%s4690_s19 + $0x88] sm:$0xff] }
  0x9c   : > { %v894_v30 = vsel %vm888_vm2, %v491_v50, %v3784_v24  ;;  %v893_v32 = vsel %vm888_vm2, %v570_v23, %v3783_v25  ;;  %v3792_v33 = vpop.permute.xlu1 %3791  ;;  %v572_v50 = vsel %vm483_vm1, 0.0, %v495_v63  ;;  %v448_v23 = vld [vmem:[%s6527_s1 + $0x10] sm:$0x3]  ;;  %v4884_v24 = vrot.slane %v4565_v31, 7 }
  0x9d   : > { %v3794_v36 = vunpack.i.h.bf16 %v3792_v33  ;;  %v3793_v37 = vunpack.i.l.bf16 %v3792_v33  ;;  %v1278_v25 = vunpack.c.l.b16 %v448_v23  ;;  %v3818_v33 = vunpack.i.l.bf16 %v3817_v27 }
  0x9e   : > { %3881 = vrot.lane.b32.xlu0 %v3880_v34, %s4563_s20  ;;  %v613_v44 = vrot.slane %v4941_v21, 1 }
  0x9f   : > { %v4814_v41 = vsel %vm923_vm3, %v893_v32, %v3793_v37  ;;  %v4817_v42 = vsel %vm923_vm3, %v894_v30, %v3794_v36  ;;  %v1281_v28 = vpack.c.b16 %v1278_v25, %v1278_v25  ;;  %v4887_v30 = vld [vmem:[%s4690_s19 + $0x80] sm:$0xff]  ;;  %v4890_v32 = vld [vmem:[%s4690_s19 + $0xc8] sm:$0xff]  ;;  %v4896_v36 = vsel %vm483_vm1, 0.0, %v4884_v24 }
  0xa0   : > { %v3830_v43 = vpack.i.bf16 %v4817_v42, %v4814_v41  ;;  %v3900_v34 = vpack.i.bf16 %v4887_v30, %v4890_v32  ;;  %v612_v27 = vrot.slane %v4887_v30, 1  ;;  %v625_v57 = vrot.slane %v4890_v32, 1 }
  0xa1   : > { %v3807_v45 = vpop.permute.xlu0 %3806  ;;  %v1335_v37 = vsel %vm1333_vm4, %v1281_v28, 0  ;;  %v624_v28 = vrot.slane %v4866_v13, 1 }
  0xa2   : > { %3831 = vrot.lane.b32.xlu2 %v3830_v43, %s6519_s28  ;;  %3841 = vrot.lane.b32.xlu1 %v3840_v38, %s4564_s26  ;;  %v3809_v47 = vunpack.i.h.bf16 %v3807_v45  ;;  %v3808_v48 = vunpack.i.l.bf16 %v3807_v45 }
  0xa3   : > { %1342 = vmatpush.bf16.msra.mxu0 %v1335_v37  ;;  %3719 = vmatpush.bf16.msra.mxu2 %v1335_v37  ;;  %v899_v37 = vsel %vm888_vm2, %v573_v20, %v3819_v17 }
  0xa4   : > { %v3812_v49 = vpop.permute.xlu1 %3811  ;;  %v898_v58 = vsel %vm888_vm2, %v497_v3, %v3809_v47  ;;  %v897_v61 = vsel %vm888_vm2, %v572_v50, %v3808_v48  ;;  %v659_v3 = vsel %vm585_vm0, %v604_v56, 0.0  ;;  %v889_v48 = vsel %vm888_vm2, %v4896_v36, %v3818_v33  ;;  %v3685_v50 = vld [vmem:[%s6527_s1] sm:$0xff] }
  0xa5   : > { %v3814_v54 = vunpack.i.h.bf16 %v3812_v49  ;;  %v3813_v55 = vunpack.i.l.bf16 %v3812_v49  ;;  %v3855_v6 = vpack.i.bf16 %v659_v3, %v605_v2  ;;  %v890_v49 = vsel %vm888_vm2, %v4884_v24, %v3818_v33 }
  0xa6   : > { %3901 = vrot.lane.b32.xlu0 %v3900_v34, %s4563_s20 }
  0xa7   : > { %v4843_v62 = vsel %vm923_vm3, %v897_v61, %v3813_v55  ;;  %v4846_v63 = vsel %vm923_vm3, %v898_v58, %v3814_v54  ;;  %v502_v54 = vrot.slane %v4824_v46, 7  ;;  %v501_v55 = vrot.slane %v4744_v40, 7 }
  0xa8   : > { %v3885_v5 = vpack.i.bf16 %v4846_v63, %v4843_v62  ;;  %v504_v58 = vrot.slane %v4773_v0, 7  ;;  %v505_v61 = vrot.slane %v4776_v1, 7 }
  0xa9   : > { %v3822_v38 = vpop.permute.xlu0 %3821  ;;  %v4921_v56 = vsel %vm483_vm1, %v501_v55, %v502_v54 }
  0xaa   : > { %3851 = vrot.lane.b32.xlu2 %v3830_v43, %s4567_s29  ;;  %3846 = vrot.lane.b32.xlu1 %v3845_v52, %s4563_s20  ;;  %v3686_v43 = vld [vmem:[%s6527_s1 + $0x8] sm:$0xff]  ;;  %v3824_v45 = vunpack.i.h.bf16 %v3822_v38  ;;  %v3823_v47 = vunpack.i.l.bf16 %v3822_v38  ;;  %v4928_v2 = vsel %vm483_vm1, %v504_v58, %v505_v61  ;;  %s3447_s1 = sshll.u32 %s3443_s18, 4  ;;  %s3448_s1 = int_to_ptr.hbm [resolvable:$true] %s3447_s1 }
  0xab   : > { %1343 = vmatpush.bf16.msra.mxu0 %v3686_v43  ;;  %3720 = vmatpush.bf16.msra.mxu2 %v3686_v43  ;;  %s4513_s15 = sshra.s32 %s3448_s1, 4  ;;  %s4514_s15 = int_to_ptr.hbm [resolvable:$true] %s4513_s15 }
  0xac   : > { %v4911_v51 = vsel %vm923_vm3, %v889_v48, %v3823_v47  ;;  %v4914_v52 = vsel %vm923_vm3, %v890_v49, %v3824_v45  ;;  %v574_v48 = vsel %vm483_vm1, 0.0, %v501_v55  ;;  %p4520_p0 = scmp.lt.s32.totalorder %s4514_s15, %s6516_s12 }
  0xad   : > { %v4095_v53 = vpack.i.bf16 %v4914_v52, %v4911_v51 }
  0xaf   : > { %1344 = vmatpush.bf16.msra.mxu0 %v3685_v50  ;;  %3721 = vmatpush.bf16.msra.mxu2 %v3685_v50 }
  0xb2   : > { %3886 = vrot.lane.b32.xlu1 %v3885_v5, %s6519_s28  ;;  %3856 = vrot.lane.b32.xlu2 %v3855_v6, %s4564_s26 }
  0xba   : > { %3891 = vrot.lane.b32.xlu1 %v3890_v11, %s4564_s26  ;;  %3861 = vrot.lane.b32.xlu2 %v3860_v12, %s4563_s20 }
  0xc2   : > { %3906 = vrot.lane.b32.xlu1 %v3885_v5, %s4567_s29  ;;  %3896 = vrot.lane.b32.xlu2 %v3895_v15, %s4563_s20  ;;  %v3837_v5 = vpop.permute.xlu0 %3836 }
  0xc3   : > { %v3838_v10 = vunpack.i.l.bf16 %v3837_v5  ;;  %v3839_v49 = vunpack.i.h.bf16 %v3837_v5 }
  0xca   : > { %3911 = vrot.lane.b32.xlu1 %v3910_v22, %s4564_s26  ;;  %v900_v22 = vsel %vm888_vm2, %v4840_v39, %v3838_v10 }
  0xf8   : > { %v3867_v23 = vpop.permute.xlu0 %3866 }
  0xf9   : > { %v3869_v54 = vunpack.i.h.bf16 %v3867_v23  ;;  %v3868_v61 = vunpack.i.l.bf16 %v3867_v23 }
  0xfc   : > { %v3832_v3 = vpop.permute.xlu2 %3831 }
  0xfd   : > { %v3834_v6 = vunpack.i.h.bf16 %v3832_v3  ;;  %v3833_v7 = vunpack.i.l.bf16 %v3832_v3  ;;  %v614_v3 = vsel %vm585_vm0, %v612_v27, %v613_v44  ;;  %v5002_v27 = vld [vmem:[%s4690_s19 + $0x90] sm:$0xff] }
 0x104   : > { %v3852_v15 = vpop.permute.xlu2 %3851 }
 0x105   : > { %v3854_v38 = vunpack.i.h.bf16 %v3852_v15  ;;  %v3853_v43 = vunpack.i.l.bf16 %v3852_v15 }
 0x107   : > { %v1188_v55 = vsel %vm1184_vm5, %v4793_v19, %v3854_v38  ;;  %v520_v19 = vrot.slane %v4869_v14, 7 }
 0x108   : > { %v1221_v17 = vsel %vm1217_vm6, %v1188_v55, %v3869_v54 }
 0x10c   : > { %v3827_v8 = vpop.permute.xlu1 %3826  ;;  %v3857_v50 = vpop.permute.xlu2 %3856 }
 0x10d   : > { %v3829_v46 = vunpack.i.h.bf16 %v3827_v8  ;;  %v3828_v40 = vunpack.i.l.bf16 %v3827_v8  ;;  %v666_v8 = vsel %vm585_vm0, %v625_v57, 0.0  ;;  %v3859_v5 = vunpack.i.h.bf16 %v3857_v50 }
 0x10f   : > { %v1185_v9 = vsel %vm1184_vm5, %v4911_v51, %v3828_v40  ;;  %v1186_v1 = vsel %vm1184_vm5, %v4914_v52, %v3829_v46  ;;  %v1187_v46 = vsel %vm1184_vm5, %v4790_v18, %v3853_v43  ;;  %v3858_v40 = vunpack.i.l.bf16 %v3857_v50 }
 0x110   : > { %v1218_v11 = vsel %vm1217_vm6, %v1185_v9, %v3833_v7  ;;  %v1219_v12 = vsel %vm1217_vm6, %v1186_v1, %v3834_v6  ;;  %v662_v6 = vsel %vm585_vm0, %v613_v44, 0.0  ;;  %v626_v7 = vsel %vm585_vm0, %v624_v28, %v625_v57  ;;  %v5005_v44 = vld [vmem:[%s4690_s19 + $0xd8] sm:$0xff] }
 0x111   : > { %v1250_v16 = vpack.c.bf16 %v1219_v12, %v1218_v11  ;;  %v901_v1 = vsel %vm888_vm2, %v574_v48, %v3839_v49  ;;  %v3872_v11 = vpop.permute.xlu0 %3871  ;;  %v3935_v12 = vpack.i.bf16 %v662_v6, %v614_v3  ;;  %v3920_v15 = vpack.i.bf16 %v666_v8, %v626_v7 }
 0x112   : > { %v519_v18 = vrot.slane %v4801_v26, 7  ;;  %v615_v57 = vrot.slane %v5002_v27, 1  ;;  %v3945_v50 = vpack.i.bf16 %v5002_v27, %v5005_v44  ;;  %v3874_v3 = vunpack.i.h.bf16 %v3872_v11 }
 0x113   : > { %3516 = vmatmul.msk.bf16.vlgmr.msra.gmra.mxu0 %vm1284_vm7, %v1250_v16  ;;  %v1220_v16 = vsel %vm1217_vm6, %v1187_v46, %v3868_v61  ;;  %v628_v61 = vrot.slane %v5005_v44, 1  ;;  %v575_v6 = vsel %vm483_vm1, 0.0, %v504_v58  ;;  %v3873_v7 = vunpack.i.l.bf16 %v3872_v11 }
 0x114   : > { %v3842_v25 = vpop.permute.xlu1 %3841  ;;  %v1251_v28 = vpack.c.bf16 %v1221_v17, %v1220_v16  ;;  %v4989_v14 = vpop.permute.xlu2 %3861 }
 0x115   : > { %v3844_v33 = vunpack.i.h.bf16 %v3842_v25  ;;  %v3843_v34 = vunpack.i.l.bf16 %v3842_v25  ;;  %v3863_v43 = vunpack.i.l.bf16 %v4989_v14 }
 0x117   : > { %v4951_v45 = vsel %vm923_vm3, %v899_v37, %v3843_v34  ;;  %v4954_v39 = vsel %vm923_vm3, %v900_v22, %v3844_v33  ;;  %v4977_v22 = vsel %vm923_vm3, %v901_v1, %v3858_v40  ;;  %v4987_v33 = vld [vmem:[%s4690_s19 + $0x98] sm:$0xff]  ;;  %v4999_v34 = vsel %vm483_vm1, %v519_v18, %v520_v19 }
 0x118   : > { %v3930_v47 = vpack.i.bf16 %v4954_v39, %v4951_v45  ;;  %v616_v38 = vrot.slane %v4987_v33, 1 }
 0x11a   : > { %3931 = vrot.lane.b32.xlu0 %v3930_v47, %s4567_s29  ;;  %3916 = vrot.lane.b32.xlu2 %v3930_v47, %s6519_s28  ;;  %v3877_v47 = vpop.permute.xlu0 %3876  ;;  %v617_v55 = vsel %vm585_vm0, %v615_v57, %v616_v38  ;;  %v663_v1 = vsel %vm585_vm0, %v616_v38, 0.0  ;;  %v5050_v38 = vld [vmem:[%s4690_s19 + $0xa0] sm:$0xff] }
 0x11b   : > { %v3879_v8 = vunpack.i.h.bf16 %v3877_v47  ;;  %v3878_v46 = vunpack.i.l.bf16 %v3877_v47 }
 0x11c   : > { %v3847_v9 = vpop.permute.xlu1 %3846 }
 0x11d   : > { %v3848_v10 = vunpack.i.l.bf16 %v3847_v9  ;;  %v3849_v49 = vunpack.i.h.bf16 %v3847_v9 }
 0x11f   : > { %v902_v20 = vsel %vm888_vm2, %v4921_v56, %v3848_v10  ;;  %v4994_v56 = vld [vmem:[%s4690_s19 + $0xd0] sm:$0xff]  ;;  %v903_v0 = vsel %vm888_vm2, %v575_v6, %v3849_v49  ;;  %v667_v10 = vsel %vm585_vm0, %v628_v61, 0.0  ;;  %v618_v6 = vrot.slane %v5050_v38, 1 }
 0x120   : > { %v4980_v23 = vsel %vm923_vm3, %v902_v20, %v3859_v5  ;;  %v3925_v48 = vpack.i.bf16 %v4994_v56, %v4941_v21  ;;  %v627_v54 = vrot.slane %v4994_v56, 1  ;;  %v904_v5 = vsel %vm888_vm2, %v4928_v2, %v3863_v43  ;;  %v5053_v43 = vld [vmem:[%s4690_s19 + $0xe8] sm:$0xff] }
 0x121   : > { %v3940_v25 = vpack.i.bf16 %v4980_v23, %v4977_v22  ;;  %v1189_v2 = vsel %vm1184_vm5, %v4814_v41, %v3873_v7  ;;  %v5034_v16 = vsel %vm923_vm3, %v904_v5, %v3879_v8  ;;  %v5037_v17 = vsel %vm923_vm3, %v903_v0, %v3878_v46 }
 0x122   : > { %3936 = vrot.lane.b32.xlu0 %v3935_v12, %s4564_s26  ;;  %3921 = vrot.lane.b32.xlu2 %v3920_v15, %s4564_s26  ;;  %v629_v58 = vsel %vm585_vm0, %v627_v54, %v628_v61  ;;  %v1190_v12 = vsel %vm1184_vm5, %v4817_v42, %v3874_v3  ;;  %v3965_v15 = vpack.i.bf16 %v663_v1, %v617_v55  ;;  %v508_v41 = vrot.slane %v4806_v29, 7  ;;  %v3882_v57 = vpop.permute.xlu0 %3881  ;;  %v5056_v29 = vld [vmem:[%s4690_s19 + $0xe0] sm:$0xff] }
 0x123   : > { %3941 = vrot.lane.b32.xlu1 %v3940_v25, %s6519_s28  ;;  %3517 = vmatmul.msk.bf16.gmra.mxu0 %vm1284_vm7, %v1251_v28  ;;  %v507_v42 = vrot.slane %v4851_v4, 7  ;;  %v3970_v28 = vpack.i.bf16 %v5034_v16, %v5037_v17  ;;  %v5059_v4 = vld [vmem:[%s4690_s19 + $0xa8] sm:$0xff]  ;;  %v3883_v54 = vunpack.i.l.bf16 %v3882_v57  ;;  %v3975_v61 = vpack.i.bf16 %v5050_v38, %v5053_v43 }
 0x124   : > { %v3887_v37 = vpop.permute.xlu1 %3886  ;;  %v3955_v3 = vpack.i.bf16 %v5056_v29, %v4987_v33  ;;  %v619_v7 = vrot.slane %v5059_v4, 1  ;;  %v630_v8 = vrot.slane %v5056_v29, 1  ;;  %v631_v46 = vrot.slane %v5053_v43, 1 }
 0x125   : > { %v3889_v40 = vunpack.i.h.bf16 %v3887_v37  ;;  %v3888_v9 = vunpack.i.l.bf16 %v3887_v37  ;;  %v576_v47 = vsel %vm483_vm1, 0.0, %v507_v42 }
 0x126   : > { %v620_v1 = vsel %vm585_vm0, %v618_v6, %v619_v7  ;;  %v664_v0 = vsel %vm585_vm0, %v619_v7, 0.0 }
 0x127   : > { %v1222_v19 = vsel %vm1217_vm6, %v1189_v2, %v3888_v9  ;;  %v1223_v20 = vsel %vm1217_vm6, %v1190_v12, %v3889_v40  ;;  %v5077_v9 = vpop.permute.xlu2 %3896  ;;  %v3884_v2 = vunpack.i.h.bf16 %v3882_v57 }
 0x128   : > { %v1252_v37 = vpack.c.bf16 %v1223_v20, %v1222_v19  ;;  %v3898_v12 = vunpack.i.l.bf16 %v5077_v9  ;;  %v3995_v19 = vpack.i.bf16 %v664_v0, %v620_v1 }
 0x12a   : > { %3961 = vrot.lane.b32.xlu0 %v3940_v25, %s4567_s29  ;;  %3926 = vrot.lane.b32.xlu2 %v3925_v48, %s4563_s20  ;;  %v3950_v25 = vpack.i.bf16 %v667_v10, %v629_v58  ;;  %v509_v48 = vsel %vm483_vm1, %v507_v42, %v508_v41  ;;  %v632_v58 = vsel %vm585_vm0, %v630_v8, %v631_v46  ;;  %v668_v10 = vsel %vm585_vm0, %v631_v46, 0.0 }
 0x12b   : > { %3946 = vrot.lane.b32.xlu1 %v3945_v50, %s4563_s20  ;;  %v3864_v50 = vunpack.i.h.bf16 %v4989_v14  ;;  %v906_v14 = vsel %vm888_vm2, %v509_v48, %v3883_v54  ;;  %v3980_v41 = vpack.i.bf16 %v668_v10, %v632_v58  ;;  %v5110_v48 = vld [vmem:[%s4690_s19 + $0xf0] sm:$0xff]  ;;  %v523_v46 = vrot.slane %v4890_v32, 7 }
 0x12c   : > { %v3892_v11 = vpop.permute.xlu1 %3891  ;;  %v3985_v54 = vpack.i.bf16 %v5110_v48, %v5059_v4 }
 0x12d   : > { %v905_v55 = vsel %vm888_vm2, %v576_v47, %v3864_v50  ;;  %v3894_v5 = vunpack.i.h.bf16 %v3892_v11  ;;  %v3893_v40 = vunpack.i.l.bf16 %v3892_v11  ;;  %v580_v11 = vsel %vm483_vm1, 0.0, %v519_v18  ;;  %v5113_v50 = vld [vmem:[%s4690_s19 + $0xf8] sm:$0xff]  ;;  %s4571_s19 = smov 64  }
 0x12e   : > { %v913_v26 = vsel %vm888_vm2, %v580_v11, %v3884_v2 }
 0x12f   : > { %v5090_v20 = vsel %vm923_vm3, %v905_v55, %v3893_v40  ;;  %v522_v55 = vrot.slane %v4866_v13, 7  ;;  %v511_v40 = vrot.slane %v4941_v21, 7 }
 0x132   : > { %3966 = vrot.lane.b32.xlu0 %v3965_v15, %s4564_s26  ;;  %3951 = vrot.lane.b32.xlu2 %v3950_v25, %s4564_s26  ;;  %v5093_v25 = vsel %vm923_vm3, %v906_v14, %v3894_v5  ;;  %v524_v5 = vsel %vm483_vm1, %v522_v55, %v523_v46  ;;  %v510_v14 = vrot.slane %v4887_v30, 7  ;;  %v529_v46 = vrot.slane %v5053_v43, 7  ;;  %v5183_v43 = vld [vmem:[%s6528_s2] ss:$0 sm:$0xff] }
 0x133   : > { %3971 = vrot.lane.b32.xlu1 %v3970_v28, %s6519_s28  ;;  %3518 = vmatmul.msk.bf16.gmra.mxu0 %vm1284_vm7, %v1252_v37  ;;  %v4000_v18 = vpack.i.bf16 %v5093_v25, %v5090_v20  ;;  %v914_v37 = vsel %vm888_vm2, %v4999_v34, %v3898_v12  ;;  %v3902_v12 = vpop.permute.xlu0 %3901 }
 0x134   : > { %v5063_v49 = vpop.permute.xlu1 %3906  ;;  %v512_v1 = vsel %vm483_vm1, %v510_v14, %v511_v40 }
 0x135   : > { %v3909_v0 = vunpack.i.h.bf16 %v5063_v49  ;;  %v3908_v58 = vunpack.i.l.bf16 %v5063_v49  ;;  %v526_v49 = vrot.slane %v5005_v44, 7 }
 0x137   : > { %v1192_v32 = vsel %vm1184_vm5, %v4766_v60, %v3909_v0  ;;  %v1191_v13 = vsel %vm1184_vm5, %v4763_v59, %v3908_v58  ;;  %v3904_v58 = vunpack.i.h.bf16 %v3902_v12 }
 0x13a   : > { %3991 = vrot.lane.b32.xlu0 %v3970_v28, %s4567_s29  ;;  %3956 = vrot.lane.b32.xlu2 %v3955_v3, %s4563_s20  ;;  %v634_v3 = vrot.slane %v5113_v50, 1 }
 0x13b   : > { %3976 = vrot.lane.b32.xlu1 %v3975_v61, %s4563_s20  ;;  %v633_v61 = vrot.slane %v5110_v48, 1 }
 0x13c   : > { %v3912_v15 = vpop.permute.xlu1 %3911  ;;  %v669_v7 = vsel %vm585_vm0, %v634_v3, 0.0 }
 0x13d   : > { %v3914_v42 = vunpack.i.h.bf16 %v3912_v15  ;;  %v3913_v28 = vunpack.i.l.bf16 %v3912_v15  ;;  %v635_v6 = vsel %vm585_vm0, %v633_v61, %v634_v3 }
 0x13e   : > { %v4010_v8 = vpack.i.bf16 %v669_v7, %v635_v6  ;;  %v514_v6 = vrot.slane %v4987_v33, 7 }
 0x13f   : > { %v5104_v57 = vsel %vm923_vm3, %v913_v26, %v3913_v28  ;;  %v5107_v47 = vsel %vm923_vm3, %v914_v37, %v3914_v42  ;;  %v581_v42 = vsel %vm483_vm1, 0.0, %v522_v55  ;;  %v525_v26 = vrot.slane %v4994_v56, 7 }
 0x140   : > { %v5119_v34 = vpack.i.bf16 %v5107_v47, %v5104_v57  ;;  %v513_v56 = vrot.slane %v5002_v27, 7 }
 0x141   : > { %v527_v3 = vsel %vm483_vm1, %v525_v26, %v526_v49 }
 0x142   : > { %3996 = vrot.lane.b32.xlu0 %v3995_v19, %s4564_s26  ;;  %3981 = vrot.lane.b32.xlu2 %v3980_v41, %s4564_s26  ;;  %v3903_v19 = vunpack.i.l.bf16 %v3902_v12  ;;  %v3899_v41 = vunpack.i.h.bf16 %v5077_v9  ;;  %v5168_v7 = vsel %vm483_vm1, %v513_v56, %v514_v6 }
 0x143   : > { %4001 = vrot.lane.b32.xlu1 %v4000_v18, %s6519_s28 }
 0x144   : > { %v916_v28 = vsel %vm888_vm2, %v524_v5, %v3903_v19  ;;  %v528_v5 = vrot.slane %v5056_v29, 7 }
 0x146   : > { %v5176_v33 = vsel %vm483_vm1, %v528_v5, %v529_v46 }
 0x14a   : > { %734 = vrot.lane.b32.xlu0 %v5113_v50, %s4563_s20  ;;  %3986 = vrot.lane.b32.xlu2 %v3985_v54, %s4563_s20  ;;  %v915_v54 = vsel %vm888_vm2, %v581_v42, %v3899_v41 }
 0x14b   : > { %4006 = vrot.lane.b32.xlu1 %v5119_v34, %s4567_s29 }
 0x153   : > { %4011 = vrot.lane.b32.xlu1 %v4010_v8, %s4564_s26 }
 0x174   : > { %v3917_v10 = vpop.permute.xlu2 %3916 }
 0x175   : > { %v3919_v11 = vunpack.i.h.bf16 %v3917_v10  ;;  %v3918_v2 = vunpack.i.l.bf16 %v3917_v10 }
 0x177   : > { %v1224_v21 = vsel %vm1217_vm6, %v1191_v13, %v3918_v2  ;;  %v1225_v30 = vsel %vm1217_vm6, %v1192_v32, %v3919_v11  ;;  %v577_v11 = vsel %vm483_vm1, 0.0, %v510_v14 }
 0x178   : > { %v1253_v15 = vpack.c.bf16 %v1225_v30, %v1224_v21  ;;  %v516_v30 = vrot.slane %v5050_v38, 7 }
 0x17a   : > { %3519 = vmatmul.msk.bf16.gmra.mxu0 %vm1284_vm7, %v1253_v15  ;;  %v907_v15 = vsel %vm888_vm2, %v577_v11, %v3904_v58 }
 0x17c   : > { %v3922_v60 = vpop.permute.xlu2 %3921 }
 0x17d   : > { %v3924_v59 = vunpack.i.h.bf16 %v3922_v60  ;;  %v3923_v37 = vunpack.i.l.bf16 %v3922_v60 }
 0x17f   : > { %v5153_v61 = vsel %vm923_vm3, %v915_v54, %v3923_v37  ;;  %v5156_v9 = vsel %vm923_vm3, %v916_v28, %v3924_v59 }
 0x180   : > { %v4030_v44 = vpack.i.bf16 %v5156_v9, %v5153_v61 }
 0x182   : > { %4031 = vrot.lane.b32.xlu1 %v4030_v44, %s4567_s29  ;;  %4016 = vrot.lane.b32.xlu2 %v4030_v44, %s6519_s28 }
 0x184   : > { %v3927_v8 = vpop.permute.xlu2 %3926 }
 0x185   : > { %v3928_v40 = vunpack.i.l.bf16 %v3927_v8 }
 0x187   : > { %v908_v13 = vsel %vm888_vm2, %v512_v1, %v3928_v40  ;;  %v582_v40 = vsel %vm483_vm1, 0.0, %v525_v26 }
 0x18a   : > { %4021 = vrot.lane.b32.xlu2 %v4000_v18, %s4567_s29  ;;  %v517_v18 = vrot.slane %v5059_v4, 7 }
 0x18c   : > { %v3932_v55 = vpop.permute.xlu0 %3931  ;;  %v3952_v10 = vpop.permute.xlu2 %3951  ;;  %v5202_v59 = vsel %vm483_vm1, %v516_v30, %v517_v18 }
 0x18d   : > { %v3934_v2 = vunpack.i.h.bf16 %v3932_v55  ;;  %v3933_v32 = vunpack.i.l.bf16 %v3932_v55  ;;  %v3929_v55 = vunpack.i.h.bf16 %v3927_v8 }
 0x18f   : > { %v1194_v14 = vsel %vm1184_vm5, %v4846_v63, %v3934_v2  ;;  %v1193_v4 = vsel %vm1184_vm5, %v4843_v62, %v3933_v32  ;;  %v3954_v2 = vunpack.i.h.bf16 %v3952_v10  ;;  %v3953_v32 = vunpack.i.l.bf16 %v3952_v10 }
 0x190   : > { %v1346_v0 = vpop.f32.mrf.mxu0 }
 0x191   : > { %v1347_v28 = vadd.f32 %v5183_v43, %v1346_v0 }
 0x193   : > { %v5213_v0 = vmax.f32 %v1347_v28, 0.0  ;;  %v578_v28 = vsel %vm483_vm1, 0.0, %v513_v56 }
 0x194   : > { %v3937_v21 = vpop.permute.xlu0 %3936  ;;  %v5209_v46 = vpop.permute.xlu2 %3956 }
 0x195   : > { %v3939_v12 = vunpack.i.h.bf16 %v3937_v21  ;;  %v3938_v19 = vunpack.i.l.bf16 %v3937_v21  ;;  %v3942_v41 = vpop.permute.xlu1 %3941  ;;  %v917_v21 = vsel %vm888_vm2, %v582_v40, %v3929_v55  ;;  %v1500_v8 = vrot.slane %v5213_v0, 7 }
 0x196   : > { %v3944_v49 = vunpack.i.h.bf16 %v3942_v41  ;;  %v3943_v42 = vunpack.i.l.bf16 %v3942_v41  ;;  %v5224_v41 = vsel %vm923_vm3, %v917_v21, %v3953_v32 }
 0x197   : > { %v5194_v1 = vsel %vm923_vm3, %v907_v15, %v3938_v19  ;;  %v5197_v60 = vsel %vm923_vm3, %v908_v13, %v3939_v12  ;;  %v3958_v19 = vunpack.i.l.bf16 %v5209_v46 }
 0x198   : > { %v1348_v37 = vpop.f32.mrf.mxu0  ;;  %v4025_v63 = vpack.i.bf16 %v5197_v60, %v5194_v1  ;;  %v1226_v62 = vsel %vm1217_vm6, %v1193_v4, %v3943_v42  ;;  %v1227_v54 = vsel %vm1217_vm6, %v1194_v14, %v3944_v49 }
 0x199   : > { %v1349_v44 = vadd.f32 %v5183_v43, %v1348_v37  ;;  %v1254_v6 = vpack.c.bf16 %v1227_v54, %v1226_v62  ;;  %v910_v62 = vsel %vm888_vm2, %v5168_v7, %v3958_v19  ;;  %v583_v19 = vsel %vm483_vm1, 0.0, %v528_v5 }
 0x19a   : > { %4026 = vrot.lane.b32.xlu0 %v4025_v63, %s6519_s28 }
 0x19b   : > { %v5215_v58 = vmax.f32 %v1349_v44, 0.0  ;;  %3520 = vmatmul.msk.bf16.gmra.mxu0 %vm1284_vm7, %v1254_v6 }
 0x19c   : > { %v3962_v11 = vpop.permute.xlu0 %3961  ;;  %v3982_v37 = vpop.permute.xlu2 %3981 }
 0x19d   : > { %v1501_v18 = vrot.slane %v5215_v58, 7  ;;  %v3947_v13 = vpop.permute.xlu1 %3946  ;;  %v3964_v49 = vunpack.i.h.bf16 %v3962_v11  ;;  %v3963_v42 = vunpack.i.l.bf16 %v3962_v11 }
 0x19e   : > { %v3948_v15 = vunpack.i.l.bf16 %v3947_v13  ;;  %v3949_v4 = vunpack.i.h.bf16 %v3947_v13 }
 0x19f   : > { %v5232_v10 = vsel %vm483_vm1, %v1500_v8, %v1501_v18  ;;  %v1196_v27 = vsel %vm1184_vm5, %v4954_v39, %v3964_v49  ;;  %v1195_v56 = vsel %vm1184_vm5, %v4951_v45, %v3963_v42  ;;  %v3959_v45 = vunpack.i.h.bf16 %v5209_v46 }
 0x1a0   : > { %v918_v12 = vsel %vm888_vm2, %v527_v3, %v3948_v15  ;;  %v1351_v26 = vpop.f32.mrf.mxu0 }
 0x1a1   : > { %v5227_v14 = vsel %vm923_vm3, %v918_v12, %v3954_v2  ;;  %v1352_v40 = vadd.f32 %v5183_v43, %v1351_v26 }
 0x1a2   : > { %4041 = vrot.lane.b32.xlu0 %v4025_v63, %s4567_s29  ;;  %v4035_v3 = vpack.i.bf16 %v5227_v14, %v5224_v41  ;;  %v909_v63 = vsel %vm888_vm2, %v578_v28, %v3949_v4  ;;  %v3984_v28 = vunpack.i.h.bf16 %v3982_v37 }
 0x1a3   : > { %v5260_v26 = vmax.f32 %v1352_v40, 0.0 }
 0x1a4   : > { %v3967_v54 = vpop.permute.xlu0 %3966  ;;  %4036 = vrot.lane.b32.xlu2 %v4035_v3, %s6519_s28 }
 0x1a5   : > { %v3969_v44 = vunpack.i.h.bf16 %v3967_v54  ;;  %v3968_v6 = vunpack.i.l.bf16 %v3967_v54  ;;  %v3972_v55 = vpop.permute.xlu1 %3971  ;;  %v1503_v46 = vrot.slane %v5260_v26, 7 }
 0x1a6   : > { %v3974_v2 = vunpack.i.h.bf16 %v3972_v55  ;;  %v3973_v11 = vunpack.i.l.bf16 %v3972_v55 }
 0x1a7   : > { %v5250_v7 = vsel %vm923_vm3, %v909_v63, %v3968_v6  ;;  %v5253_v32 = vsel %vm923_vm3, %v910_v62, %v3969_v44  ;;  %v3983_v62 = vunpack.i.l.bf16 %v3982_v37  ;;  %v3987_v44 = vpop.permute.xlu2 %3986  ;;  %v919_v6 = vsel %vm888_vm2, %v583_v19, %v3959_v45 }
 0x1a8   : > { %v1353_v18 = vpop.f32.mrf.mxu0  ;;  %v4045_v13 = vpack.i.bf16 %v5253_v32, %v5250_v7  ;;  %v1228_v21 = vsel %vm1217_vm6, %v1195_v56, %v3973_v11  ;;  %v1229_v15 = vsel %vm1217_vm6, %v1196_v27, %v3974_v2  ;;  %v3988_v63 = vunpack.i.l.bf16 %v3987_v44 }
 0x1a9   : > { %v1354_v12 = vadd.f32 %v5183_v43, %v1353_v18  ;;  %v1255_v39 = vpack.c.bf16 %v1229_v15, %v1228_v21  ;;  %v5282_v40 = vsel %vm923_vm3, %v919_v6, %v3983_v62  ;;  %v579_v56 = vsel %vm483_vm1, 0.0, %v516_v30 }
 0x1aa   : > { %4046 = vrot.lane.b32.xlu1 %v4045_v13, %s6519_s28  ;;  %v912_v18 = vsel %vm888_vm2, %v5202_v59, %v3988_v63 }
 0x1ab   : > { %v5267_v4 = vmax.f32 %v1354_v12, 0.0  ;;  %3521 = vmatmul.msk.bf16.gmra.mxu0 %vm1284_vm7, %v1255_v39 }
 0x1ac   : > { %v3992_v49 = vpop.permute.xlu0 %3991  ;;  %4051 = vrot.lane.b32.xlu2 %v4035_v3, %s4567_s29 }
 0x1ad   : > { %v1504_v42 = vrot.slane %v5267_v4, 7  ;;  %v3977_v54 = vpop.permute.xlu1 %3976  ;;  %v3993_v27 = vunpack.i.l.bf16 %v3992_v49 }
 0x1ae   : > { %v3978_v29 = vunpack.i.l.bf16 %v3977_v54  ;;  %v3979_v2 = vunpack.i.h.bf16 %v3977_v54 }
 0x1af   : > { %v5279_v3 = vsel %vm483_vm1, %v1503_v46, %v1504_v42  ;;  %v1197_v30 = vsel %vm1184_vm5, %v4977_v22, %v3993_v27  ;;  %v532_v27 = vrot.slane %v5113_v50, 7 }
 0x1b0   : > { %v920_v5 = vsel %vm888_vm2, %v5176_v33, %v3978_v29  ;;  %v1356_v55 = vpop.f32.mrf.mxu0  ;;  %v3994_v33 = vunpack.i.h.bf16 %v3992_v49  ;;  %v911_v45 = vsel %vm888_vm2, %v579_v56, %v3979_v2 }
 0x1b1   : > { %v5285_v37 = vsel %vm923_vm3, %v920_v5, %v3984_v28  ;;  %v1357_v15 = vadd.f32 %v5183_v43, %v1356_v55 }
 0x1b2   : > { %4061 = vrot.lane.b32.xlu1 %v4045_v13, %s4567_s29  ;;  %v4055_v11 = vpack.i.bf16 %v5285_v37, %v5282_v40  ;;  %v1198_v38 = vsel %vm1184_vm5, %v4980_v23, %v3994_v33  ;;  %v531_v33 = vrot.slane %v5110_v48, 7 }
 0x1b3   : > { %v5312_v29 = vmax.f32 %v1357_v15, 0.0 }
 0x1b4   : > { %v3997_v21 = vpop.permute.xlu0 %3996  ;;  %4056 = vrot.lane.b32.xlu0 %v4055_v11, %s6519_s28 }
 0x1b5   : > { %v3999_v12 = vunpack.i.h.bf16 %v3997_v21  ;;  %v3998_v39 = vunpack.i.l.bf16 %v3997_v21  ;;  %v4002_v13 = vpop.permute.xlu1 %4001  ;;  %v1506_v55 = vrot.slane %v5312_v29, 7  ;;  %v584_v21 = vsel %vm483_vm1, 0.0, %v531_v33 }
 0x1b6   : > { %v4004_v19 = vunpack.i.h.bf16 %v4002_v13  ;;  %v4003_v42 = vunpack.i.l.bf16 %v4002_v13 }
 0x1b7   : > { %v5303_v59 = vsel %vm923_vm3, %v911_v45, %v3998_v39  ;;  %v5306_v49 = vsel %vm923_vm3, %v912_v18, %v3999_v12  ;;  %v3989_v18 = vunpack.i.h.bf16 %v3987_v44 }
 0x1b8   : > { %v1358_v28 = vpop.f32.mrf.mxu0  ;;  %v4065_v62 = vpack.i.bf16 %v5306_v49, %v5303_v59  ;;  %v1230_v54 = vsel %vm1217_vm6, %v1197_v30, %v4003_v42  ;;  %v1231_v6 = vsel %vm1217_vm6, %v1198_v38, %v4004_v19  ;;  %v1597_v19 = vrot.slane %v5215_v58, 1 }
 0x1b9   : > { %v1359_v23 = vadd.f32 %v5183_v43, %v1358_v28  ;;  %v1256_v5 = vpack.c.bf16 %v1231_v6, %v1230_v54  ;;  %v921_v48 = vsel %vm888_vm2, %v584_v21, %v3989_v18  ;;  %v1596_v38 = vrot.slane %v5213_v0, 1 }
 0x1ba   : > { %4066 = vrot.lane.b32.xlu2 %v4065_v62, %s6519_s28  ;;  %v1600_v30 = vrot.slane %v5267_v4, 1  ;;  %v1599_v28 = vrot.slane %v5260_v26, 1  ;;  %v1660_v54 = vsel %vm585_vm0, %v1597_v19, 0.0 }
 0x1bb   : > { %v1431_v22 = vmax.f32 %v1359_v23, 0.0  ;;  %3522 = vmatmul.msk.bf16.gmra.mxu0 %vm1284_vm7, %v1256_v5  ;;  %v1602_v23 = vrot.slane %v5312_v29, 1 }
 0x1bc   : > { %4071 = vrot.lane.b32.xlu0 %v4055_v11, %s4567_s29  ;;  %v533_v11 = vsel %vm483_vm1, %v531_v33, %v532_v27  ;;  %v735_v15 = vpop.permute.xlu0 %734  ;;  %v1601_v51 = vsel %vm585_vm0, %v1599_v28, %v1600_v30  ;;  %v1661_v52 = vsel %vm585_vm0, %v1600_v30, 0.0  ;;  %v4105_v27 = vpack.i.bf16 %v5267_v4, %v5260_v26 }
 0x1bd   : > { %v1507_v63 = vrot.slane %v1431_v22, 7  ;;  %v4007_v2 = vpop.permute.xlu1 %4006  ;;  %v922_v50 = vsel %vm888_vm2, %v533_v11, %v735_v15  ;;  %v4115_v6 = vpack.i.bf16 %v1661_v52, %v1601_v51 }
 0x1be   : > { %v4009_v18 = vunpack.i.h.bf16 %v4007_v2  ;;  %v4008_v21 = vunpack.i.l.bf16 %v4007_v2  ;;  %v4120_v2 = vpack.i.bf16 %v1431_v22, %v5312_v29 }
 0x1bf   : > { %v5324_v56 = vsel %vm483_vm1, %v1506_v55, %v1507_v63 }
 0x1c2   : > { %4081 = vrot.lane.b32.xlu2 %v4065_v62, %s4567_s29  ;;  %v1598_v62 = vsel %vm585_vm0, %v1596_v38, %v1597_v19 }
 0x1c4   : > { %4086 = vrot.lane.b32.xlu0 %v5119_v34, %s6519_s28  ;;  %v4100_v34 = vpack.i.bf16 %v5215_v58, %v5213_v0  ;;  %v1603_v58 = vrot.slane %v1431_v22, 1 }
 0x1c5   : > { %v4012_v12 = vpop.permute.xlu1 %4011 }
 0x1c6   : > { %v4014_v39 = vunpack.i.h.bf16 %v4012_v12  ;;  %v4013_v13 = vunpack.i.l.bf16 %v4012_v12  ;;  %v1604_v5 = vsel %vm585_vm0, %v1602_v23, %v1603_v58  ;;  %v1662_v63 = vsel %vm585_vm0, %v1603_v58, 0.0 }
 0x1c7   : > { %v4125_v33 = vpack.i.bf16 %v1662_v63, %v1604_v5  ;;  %v1207_v12 = vsel %vm1184_vm5, %v5303_v59, %v4008_v21 }
 0x1c8   : > { %v957_v45 = vsel %vm923_vm3, %v922_v50, %v4014_v39  ;;  %v956_v44 = vsel %vm923_vm3, %v921_v48, %v4013_v13  ;;  %v1208_v50 = vsel %vm1184_vm5, %v5306_v49, %v4009_v18 }
 0x1c9   : > { %v4075_v42 = vpack.i.bf16 %v957_v45, %v956_v44 }
 0x1ca   : > { %4096 = vrot.lane.b32.xlu2 %v4095_v53, %s6519_s28  ;;  %v4110_v53 = vpack.i.bf16 %v1660_v54, %v1598_v62 }
 0x1cb   : > { %4076 = vrot.lane.b32.xlu1 %v4075_v42, %s6519_s28 }
 0x1cc   : > { %4101 = vrot.lane.b32.xlu0 %v4100_v34, %s4564_s26 }
 0x1d2   : > { %4111 = vrot.lane.b32.xlu2 %v4110_v53, %s6517_s17 }
 0x1d3   : > { %4091 = vrot.lane.b32.xlu1 %v4075_v42, %s4567_s29  ;;  %s4569_s29 = smov 48  }
 0x1d4   : > { %4116 = vrot.lane.b32.xlu0 %v4115_v6, %s6517_s17 }
 0x1da   : > { %4126 = vrot.lane.b32.xlu2 %v4125_v33, %s6517_s17 }
 0x1db   : > { %4106 = vrot.lane.b32.xlu1 %v4105_v27, %s4564_s26 }
 0x1dc   : > { %v4017_v11 = vpop.permute.xlu2 %4016 }
 0x1dd   : > { %v4019_v15 = vunpack.i.h.bf16 %v4017_v11  ;;  %v4018_v48 = vunpack.i.l.bf16 %v4017_v11 }
 0x1df   : > { %v1240_v39 = vsel %vm1217_vm6, %v1207_v12, %v4018_v48  ;;  %v1241_v13 = vsel %vm1217_vm6, %v1208_v50, %v4019_v15 }
 0x1e0   : > { %v1261_v4 = vpack.c.bf16 %v1241_v13, %v1240_v39 }
 0x1e2   : > { %3527 = vmatmul.msk.bf16.vlgmr.msra.gmra.mxu2 %vm1284_vm7, %v1261_v4 }
 0x1e3   : > { %4121 = vrot.lane.b32.xlu1 %v4120_v2, %s4564_s26 }
 0x1e4   : > { %v4022_v45 = vpop.permute.xlu2 %4021 }
 0x1e5   : > { %v4024_v11 = vunpack.i.h.bf16 %v4022_v45  ;;  %v4023_v15 = vunpack.i.l.bf16 %v4022_v45 }
 0x1e7   : > { %v1200_v39 = vsel %vm1184_vm5, %v5034_v16, %v4024_v11  ;;  %v1199_v13 = vsel %vm1184_vm5, %v5037_v17, %v4023_v15 }
 0x1f4   : > { %v4032_v19 = vpop.permute.xlu1 %4031 }
 0x1f5   : > { %v4034_v59 = vunpack.i.h.bf16 %v4032_v19  ;;  %v4033_v34 = vunpack.i.l.bf16 %v4032_v19 }
 0x1f7   : > { %v1361_v44 = vpop.f32.mrf.mxu0  ;;  %v1210_v22 = vsel %vm1184_vm5, %v5107_v47, %v4034_v59  ;;  %v1209_v54 = vsel %vm1184_vm5, %v5104_v57, %v4033_v34 }
 0x1f8   : > { %v1362_v42 = vadd.f32 %v5183_v43, %v1361_v44 }
 0x1fa   : > { %v5371_v49 = vmax.f32 %v1362_v42, 0.0 }
 0x1fc   : > { %v1509_v23 = vrot.slane %v5371_v49, 7  ;;  %v1605_v5 = vrot.slane %v5371_v49, 1 }
 0x1fe   : > { %v4037_v38 = vpop.permute.xlu2 %4036 }
 0x1ff   : > { %v4039_v30 = vunpack.i.h.bf16 %v4037_v38  ;;  %v4038_v28 = vunpack.i.l.bf16 %v4037_v38  ;;  %v1363_v62 = vpop.f32.mrf.mxu0 }
 0x200   : > { %v1364_v51 = vadd.f32 %v5183_v43, %v1363_v62 }
 0x201   : > { %v1242_v52 = vsel %vm1217_vm6, %v1209_v54, %v4038_v28  ;;  %v1243_v53 = vsel %vm1217_vm6, %v1210_v22, %v4039_v30 }
 0x202   : > { %v1433_v58 = vmax.f32 %v1364_v51, 0.0  ;;  %v1262_v6 = vpack.c.bf16 %v1243_v53, %v1242_v52 }
 0x204   : > { %v1510_v63 = vrot.slane %v1433_v58, 7  ;;  %v1606_v33 = vrot.slane %v1433_v58, 1  ;;  %3528 = vmatmul.msk.bf16.gmra.mxu2 %vm1284_vm7, %v1262_v6  ;;  %v4130_v47 = vpack.i.bf16 %v1433_v58, %v5371_v49 }
 0x206   : > { %4131 = vrot.lane.b32.xlu0 %v4130_v47, %s4564_s26  ;;  %v1607_v57 = vsel %vm585_vm0, %v1605_v5, %v1606_v33  ;;  %v1663_v27 = vsel %vm585_vm0, %v1606_v33, 0.0  ;;  %v5390_v18 = vsel %vm483_vm1, %v1509_v23, %v1510_v63  ;;  %v4052_v45 = vpop.permute.xlu2 %4051 }
 0x207   : > { %v4140_v21 = vpack.i.bf16 %v1663_v27, %v1607_v57  ;;  %v4053_v63 = vunpack.i.l.bf16 %v4052_v45 }
 0x209   : > { %4141 = vrot.lane.b32.xlu1 %v4140_v21, %s6517_s17 }
 0x20c   : > { %v4027_v48 = vpop.permute.xlu0 %4026 }
 0x20d   : > { %v4029_v12 = vunpack.i.h.bf16 %v4027_v48  ;;  %v4028_v50 = vunpack.i.l.bf16 %v4027_v48  ;;  %v1211_v48 = vsel %vm1184_vm5, %v5153_v61, %v4053_v63 }
 0x20e   : > { %4136 = vrot.lane.b32.xlu0 %v4734_v35, %s6517_s17 }
 0x20f   : > { %v1232_v4 = vsel %vm1217_vm6, %v1199_v13, %v4028_v50  ;;  %v1233_v2 = vsel %vm1217_vm6, %v1200_v39, %v4029_v12 }
 0x210   : > { %v1257_v44 = vpack.c.bf16 %v1233_v2, %v1232_v4 }
 0x212   : > { %3523 = vmatmul.msk.bf16.gmra.mxu0 %vm1284_vm7, %v1257_v44 }
 0x214   : > { %v4042_v19 = vpop.permute.xlu0 %4041  ;;  %v4067_v30 = vpop.permute.xlu2 %4066 }
 0x215   : > { %v4044_v34 = vunpack.i.h.bf16 %v4042_v19  ;;  %v4043_v16 = vunpack.i.l.bf16 %v4042_v19  ;;  %v4068_v19 = vunpack.i.l.bf16 %v4067_v30 }
 0x217   : > { %v1202_v62 = vsel %vm1184_vm5, %v5093_v25, %v4044_v34  ;;  %v1201_v22 = vsel %vm1184_vm5, %v5090_v20, %v4043_v16  ;;  %v4054_v25 = vunpack.i.h.bf16 %v4052_v45 }
 0x218   : > { %v1366_v42 = vpop.f32.mrf.mxu0 }
 0x219   : > { %v1367_v59 = vadd.f32 %v5183_v43, %v1366_v42  ;;  %v1212_v15 = vsel %vm1184_vm5, %v5156_v9, %v4054_v25  ;;  %v4069_v9 = vunpack.i.h.bf16 %v4067_v30 }
 0x21b   : > { %v5403_v38 = vmax.f32 %v1367_v59, 0.0 }
 0x21c   : > { %v4047_v17 = vpop.permute.xlu1 %4046  ;;  %v4082_v27 = vpop.permute.xlu2 %4081 }
 0x21d   : > { %v4049_v28 = vunpack.i.h.bf16 %v4047_v17  ;;  %v4048_v35 = vunpack.i.l.bf16 %v4047_v17  ;;  %v4145_v54 = vpack.i.bf16 %v5403_v38, %v4565_v31  ;;  %v1512_v12 = vrot.slane %v5403_v38, 7 }
 0x21f   : > { %v1234_v51 = vsel %vm1217_vm6, %v1201_v22, %v4048_v35  ;;  %v1235_v52 = vsel %vm1217_vm6, %v1202_v62, %v4049_v28  ;;  %4146 = vrot.lane.b32.xlu2 %v4145_v54, %s4564_s26 }
 0x220   : > { %v1368_v53 = vpop.f32.mrf.mxu0  ;;  %v1258_v58 = vpack.c.bf16 %v1235_v52, %v1234_v51  ;;  %v4084_v51 = vunpack.i.h.bf16 %v4082_v27  ;;  %v4083_v52 = vunpack.i.l.bf16 %v4082_v27 }
 0x221   : > { %v1369_v6 = vadd.f32 %v5183_v43, %v1368_v53 }
 0x222   : > { %3524 = vmatmul.msk.bf16.gmra.mxu0 %vm1284_vm7, %v1258_v58 }
 0x223   : > { %v5416_v5 = vmax.f32 %v1369_v6, 0.0 }
 0x224   : > { %v4062_v20 = vpop.permute.xlu1 %4061  ;;  %v5444_v28 = vpop.permute.xlu2 %4096 }
 0x225   : > { %v1513_v33 = vrot.slane %v5416_v5, 7  ;;  %v4064_v31 = vunpack.i.h.bf16 %v4062_v20  ;;  %v4063_v47 = vunpack.i.l.bf16 %v4062_v20 }
 0x226   : > { %v4057_v57 = vpop.permute.xlu0 %4056 }
 0x227   : > { %v4059_v21 = vunpack.i.h.bf16 %v4057_v57  ;;  %v4058_v11 = vunpack.i.l.bf16 %v4057_v57  ;;  %v1204_v2 = vsel %vm1184_vm5, %v5197_v60, %v4064_v31  ;;  %v1203_v44 = vsel %vm1184_vm5, %v5194_v1, %v4063_v47 }
 0x228   : > { %v1371_v50 = vpop.f32.mrf.mxu0  ;;  %v5434_v61 = vsel %vm483_vm1, %v1512_v12, %v1513_v33  ;;  %v1236_v59 = vsel %vm1217_vm6, %v1203_v44, %v4068_v19  ;;  %v1237_v34 = vsel %vm1217_vm6, %v1204_v2, %v4069_v9  ;;  %v1206_v33 = vsel %vm1184_vm5, %v5253_v32, %v4084_v51 }
 0x229   : > { %v1372_v39 = vadd.f32 %v5183_v43, %v1371_v50  ;;  %v1244_v13 = vsel %vm1217_vm6, %v1211_v48, %v4058_v11  ;;  %v1245_v4 = vsel %vm1217_vm6, %v1212_v15, %v4059_v21  ;;  %v1259_v17 = vpack.c.bf16 %v1237_v34, %v1236_v59 }
 0x22a   : > { %v1263_v45 = vpack.c.bf16 %v1245_v4, %v1244_v13  ;;  %v1205_v31 = vsel %vm1184_vm5, %v5250_v7, %v4083_v52  ;;  %v1580_v47 = vsel %vm483_vm1, 0.0, %v1500_v8  ;;  %v1609_v59 = vrot.slane %v5416_v5, 1 }
 0x22b   : > { %v5436_v42 = vmax.f32 %v1372_v39, 0.0  ;;  %v4099_v52 = vunpack.i.h.bf16 %v5444_v28 }
 0x22c   : > { %3529 = vmatmul.msk.bf16.gmra.mxu2 %vm1284_vm7, %v1263_v45  ;;  %v4112_v25 = vpop.permute.xlu2 %4111 }
 0x22d   : > { %v4160_v1 = vpack.i.bf16 %v5436_v42, %v5416_v5  ;;  %v1515_v22 = vrot.slane %v5436_v42, 7  ;;  %v4114_v11 = vunpack.i.h.bf16 %v4112_v25  ;;  %v4113_v13 = vunpack.i.l.bf16 %v4112_v25 }
 0x22e   : > { %v4072_v60 = vpop.permute.xlu0 %4071 }
 0x22f   : > { %4161 = vrot.lane.b32.xlu0 %v4160_v1, %s4564_s26  ;;  %v4074_v63 = vunpack.i.h.bf16 %v4072_v60  ;;  %v4073_v20 = vunpack.i.l.bf16 %v4072_v60 }
 0x230   : > { %v1373_v16 = vpop.f32.mrf.mxu0 }
 0x231   : > { %v1374_v30 = vadd.f32 %v5183_v43, %v1373_v16  ;;  %v1214_v32 = vsel %vm1184_vm5, %v5227_v14, %v4074_v63  ;;  %v1213_v7 = vsel %vm1184_vm5, %v5224_v41, %v4073_v20 }
 0x232   : > { %3525 = vmatmul.msk.bf16.gmra.mxu0 %vm1284_vm7, %v1259_v17 }
 0x233   : > { %v5448_v35 = vmax.f32 %v1374_v30, 0.0  ;;  %v1664_v30 = vsel %vm585_vm0, %v1609_v59, 0.0 }
 0x235   : > { %v1516_v62 = vrot.slane %v5448_v35, 7  ;;  %v1612_v29 = vrot.slane %v5448_v35, 1 }
 0x236   : > { %v4087_v54 = vpop.permute.xlu0 %4086 }
 0x237   : > { %v5455_v53 = vsel %vm483_vm1, %v1515_v22, %v1516_v62  ;;  %v4089_v58 = vunpack.i.h.bf16 %v4087_v54  ;;  %v4088_v6 = vunpack.i.l.bf16 %v4087_v54 }
 0x238   : > { %v1376_v16 = vpop.f32.mrf.mxu0 }
 0x239   : > { %v1238_v27 = vsel %vm1217_vm6, %v1205_v31, %v4088_v6  ;;  %v1239_v21 = vsel %vm1217_vm6, %v1206_v33, %v4089_v58  ;;  %v1377_v62 = vadd.f32 %v5183_v43, %v1376_v16  ;;  %v4098_v58 = vunpack.i.l.bf16 %v5444_v28 }
 0x23a   : > { %v1260_v8 = vpack.c.bf16 %v1239_v21, %v1238_v27 }
 0x23d   : > { %v4077_v57 = vpop.permute.xlu1 %4076 }
 0x23e   : > { %v4079_v15 = vunpack.i.h.bf16 %v4077_v57  ;;  %v4078_v48 = vunpack.i.l.bf16 %v4077_v57  ;;  %v4102_v50 = vpop.permute.xlu0 %4101 }
 0x23f   : > { %v4104_v39 = vunpack.i.h.bf16 %v4102_v50  ;;  %v4103_v0 = vunpack.i.l.bf16 %v4102_v50 }
 0x240   : > { %v1246_v4 = vsel %vm1217_vm6, %v1213_v7, %v4078_v48  ;;  %v1247_v2 = vsel %vm1217_vm6, %v1214_v32, %v4079_v15  ;;  %v4127_v48 = vpop.permute.xlu2 %4126  ;;  %v1582_v7 = vsel %vm483_vm1, 0.0, %v1506_v55 }
 0x241   : > { %v1895_v44 = vsel %vm923_vm3, %v1580_v47, %v4103_v0  ;;  %v1896_v45 = vsel %vm923_vm3, %v5232_v10, %v4104_v39  ;;  %v1264_v9 = vpack.c.bf16 %v1247_v2, %v1246_v4  ;;  %v1608_v10 = vrot.slane %v5403_v38, 1 }
 0x242   : > { %3526 = vmatmul.msk.bf16.gmra.mxu0 %vm1284_vm7, %v1260_v8  ;;  %v5477_v14 = vsel %vm1927_vm8, %v1895_v44, %v4113_v13  ;;  %v5480_v41 = vsel %vm1927_vm8, %v1896_v45, %v4114_v11  ;;  %v4129_v39 = vunpack.i.h.bf16 %v4127_v48  ;;  %v4128_v0 = vunpack.i.l.bf16 %v4127_v48  ;;  %v1378_v13 = vpop.f32.mrf.mxu0 }
 0x243   : > { %3530 = vmatmul.msk.bf16.gmra.mxu2 %vm1284_vm7, %v1264_v9  ;;  %v4150_v19 = vpack.i.bf16 %v5480_v41, %v5477_v14  ;;  %v1610_v17 = vsel %vm585_vm0, %v1608_v10, %v1609_v59  ;;  %v1379_v55 = vadd.f32 %v5183_v43, %v1378_v13  ;;  %v1665_v59 = vsel %vm585_vm0, %v1612_v29, 0.0 }
 0x244   : > { %v4165_v51 = vpack.i.bf16 %v1664_v30, %v1610_v17 }
 0x245   : > { %v4092_v34 = vpop.permute.xlu1 %4091  ;;  %4151 = vrot.lane.b32.xlu1 %v4150_v19, %s6519_s28  ;;  %v5540_v9 = vmax.f32 %v1379_v55, 0.0 }
 0x246   : > { %v4094_v60 = vunpack.i.h.bf16 %v4092_v34  ;;  %v4093_v1 = vunpack.i.l.bf16 %v4092_v34  ;;  %v4117_v6 = vpop.permute.xlu0 %4116 }
 0x247   : > { %v4119_v47 = vunpack.i.h.bf16 %v4117_v6  ;;  %v4118_v57 = vunpack.i.l.bf16 %v4117_v6  ;;  %v1615_v10 = vrot.slane %v5540_v9, 1 }
 0x248   : > { %v1216_v54 = vsel %vm1184_vm5, %v5285_v37, %v4094_v60  ;;  %v1215_v5 = vsel %vm1184_vm5, %v5282_v40, %v4093_v1  ;;  %v1581_v37 = vsel %vm483_vm1, 0.0, %v1503_v46  ;;  %v5503_v40 = vmax.f32 %v1377_v62, 0.0 }
 0x249   : > { %v1248_v33 = vsel %vm1217_vm6, %v1215_v5, %v4098_v58  ;;  %v1249_v31 = vsel %vm1217_vm6, %v1216_v54, %v4099_v52  ;;  %v1666_v16 = vsel %vm585_vm0, %v1615_v10, 0.0 }
 0x24a   : > { %v1265_v21 = vpack.c.bf16 %v1249_v31, %v1248_v33  ;;  %v4180_v46 = vpack.i.bf16 %v5503_v40, %v5448_v35  ;;  %v1614_v35 = vrot.slane %v5503_v40, 1 }
 0x24c   : > { %v1616_v1 = vsel %vm585_vm0, %v1614_v35, %v1615_v10 }
 0x24d   : > { %4166 = vrot.lane.b32.xlu1 %v4165_v51, %s6517_s17  ;;  %v4107_v25 = vpop.permute.xlu1 %4106  ;;  %v4200_v30 = vpack.i.bf16 %v1666_v16, %v1616_v1  ;;  %v3689_v16 = vld [vmem:[%s6507_s3 + $0x10] sm:$0xff] }
 0x24e   : > { %v4109_v63 = vunpack.i.h.bf16 %v4107_v25  ;;  %v4108_v20 = vunpack.i.l.bf16 %v4107_v25 }
 0x250   : > { %v1897_v28 = vsel %vm923_vm3, %v1581_v37, %v4108_v20  ;;  %v1898_v27 = vsel %vm923_vm3, %v5279_v3, %v4109_v63  ;;  %v1583_v37 = vsel %vm483_vm1, 0.0, %v1509_v23 }
 0x251   : > { %v5509_v11 = vsel %vm1927_vm8, %v1897_v28, %v4118_v57  ;;  %v5512_v15 = vsel %vm1927_vm8, %v1898_v27, %v4119_v47 }
 0x252   : > { %v4155_v26 = vpack.i.bf16 %v5512_v15, %v5509_v11 }
 0x253   : > { %3531 = vmatmul.msk.bf16.gmra.mxu2 %vm1284_vm7, %v1265_v21 }
 0x254   : > { %4156 = vrot.lane.b32.xlu2 %v4155_v26, %s4569_s29 }
 0x255   : > { %4181 = vrot.lane.b32.xlu1 %v4180_v46, %s4564_s26  ;;  %v4122_v3 = vpop.permute.xlu1 %4121 }
 0x256   : > { %v4124_v50 = vunpack.i.h.bf16 %v4122_v3  ;;  %v4123_v32 = vunpack.i.l.bf16 %v4122_v3 }
 0x258   : > { %v1900_v8 = vsel %vm923_vm3, %v5324_v56, %v4124_v50  ;;  %v1899_v4 = vsel %vm923_vm3, %v1582_v7, %v4123_v32  ;;  %v1611_v56 = vrot.slane %v5436_v42, 1 }
 0x259   : > { %v5528_v2 = vsel %vm1927_vm8, %v1899_v4, %v4128_v0  ;;  %v5531_v44 = vsel %vm1927_vm8, %v1900_v8, %v4129_v39 }
 0x25a   : > { %v4175_v45 = vpack.i.bf16 %v5531_v44, %v5528_v2  ;;  %v1613_v19 = vsel %vm585_vm0, %v1611_v56, %v1612_v29 }
 0x25b   : > { %v4185_v34 = vpack.i.bf16 %v1665_v59, %v1613_v19 }
 0x25c   : > { %4176 = vrot.lane.b32.xlu0 %v4175_v45, %s4569_s29  ;;  %4171 = vrot.lane.b32.xlu2 %v4155_v26, %s6519_s28 }
 0x264   : > { %4196 = vrot.lane.b32.xlu0 %v4175_v45, %s6519_s28  ;;  %4186 = vrot.lane.b32.xlu2 %v4185_v34, %s6517_s17  ;;  %v3690_v34 = vld [vmem:[%s6507_s3 + $0x18] sm:$0xff] }
 0x265   : > { %v1401_v60 = vpop.f32.mrf.mxu2 }
 0x266   : > { %v1402_v17 = vadd.f32 %v5183_v43, %v1401_v60 }
 0x268   : > { %v5552_v54 = vmax.f32 %v1402_v17, 0.0 }
 0x26a   : > { %v1533_v52 = vrot.slane %v5552_v54, 7 }
 0x26c   : > { %4201 = vrot.lane.b32.xlu0 %v4200_v30, %s6517_s17 }
 0x26d   : > { %v1403_v62 = vpop.f32.mrf.mxu2 }
 0x26e   : > { %v1404_v5 = vadd.f32 %v5183_v43, %v1403_v62 }
 0x270   : > { %v5555_v51 = vmax.f32 %v1404_v5, 0.0 }
 0x272   : > { %v1534_v58 = vrot.slane %v5555_v51, 7 }
 0x274   : > { %v5562_v6 = vsel %vm483_vm1, %v1533_v52, %v1534_v58  ;;  %v3688_v58 = vld [vmem:[%s6507_s3 + $0x8] sm:$0xff] }
 0x278   : > { %v4132_v25 = vpop.permute.xlu0 %4131 }
 0x279   : > { %v4134_v63 = vunpack.i.h.bf16 %v4132_v25  ;;  %v4133_v20 = vunpack.i.l.bf16 %v4132_v25  ;;  %v5564_v33 = vpop.permute.xlu2 %4146 }
 0x27a   : > { %v4148_v21 = vunpack.i.l.bf16 %v5564_v33 }
 0x27b   : > { %v4142_v31 = vpop.permute.xlu1 %4141  ;;  %v1902_v28 = vsel %vm923_vm3, %v5390_v18, %v4134_v63  ;;  %v1901_v27 = vsel %vm923_vm3, %v1583_v37, %v4133_v20 }
 0x27c   : > { %v4144_v47 = vunpack.i.h.bf16 %v4142_v31  ;;  %v4143_v57 = vunpack.i.l.bf16 %v4142_v31  ;;  %v1893_v18 = vsel %vm923_vm3, %v4896_v36, %v4148_v21  ;;  %v1894_v50 = vsel %vm923_vm3, %v4884_v24, %v4148_v21  ;;  %v1466_v36 = vld [vmem:[%s6507_s3 + $0x20] sm:$0xf] }
 0x27d   : > { %v2289_v24 = vunpack.c.l.b16 %v1466_v36 }
 0x27e   : > { %v5574_v26 = vsel %vm1927_vm8, %v1901_v27, %v4143_v57  ;;  %v5577_v46 = vsel %vm1927_vm8, %v1902_v28, %v4144_v47  ;;  %v3687_v57 = vld [vmem:[%s6507_s3] sm:$0xff] }
 0x27f   : > { %v4210_v49 = vpack.i.bf16 %v5577_v46, %v5574_v26  ;;  %v2294_v8 = vpack.c.b16 %v2289_v24, %v2289_v24  ;;  %v1630_v24 = vrot.slane %v5555_v51, 1 }
 0x280   : > { %v4137_v48 = vpop.permute.xlu0 %4136 }
 0x281   : > { %v4139_v23 = vunpack.i.h.bf16 %v4137_v48  ;;  %v4138_v3 = vunpack.i.l.bf16 %v4137_v48  ;;  %4211 = vrot.lane.b32.xlu1 %v4210_v49, %s4569_s29  ;;  %v2350_v45 = vsel %vm2348_vm9, %v2294_v8, 0  ;;  %v1629_v8 = vrot.slane %v5552_v54, 1 }
 0x282   : > { %2355 = vmatpush.bf16.msra.mxu1 %v2350_v45  ;;  %3722 = vmatpush.bf16.msra.mxu3 %v2350_v45 }
 0x283   : > { %v5587_v32 = vsel %vm1927_vm8, %v1894_v50, %v4139_v23  ;;  %v5590_v7 = vsel %vm1927_vm8, %v1893_v18, %v4139_v23  ;;  %v5593_v39 = vsel %vm1927_vm8, %v1893_v18, %v4138_v3 }
 0x284   : > { %v4420_v0 = vpack.i.bf16 %v5587_v32, %v5593_v39 }
 0x286   : > { %2356 = vmatpush.bf16.msra.mxu1 %v3690_v34  ;;  %3723 = vmatpush.bf16.msra.mxu3 %v3690_v34 }
 0x287   : > { %v1406_v13 = vpop.f32.mrf.mxu2 }
 0x288   : > { %v1407_v4 = vadd.f32 %v5183_v43, %v1406_v13 }
 0x289   : > { %4216 = vrot.lane.b32.xlu1 %v4210_v49, %s6519_s28 }
 0x28a   : > { %v5603_v56 = vmax.f32 %v1407_v4, 0.0  ;;  %2357 = vmatpush.bf16.msra.mxu1 %v3689_v16  ;;  %3724 = vmatpush.bf16.msra.mxu3 %v3689_v16 }
 0x28c   : > { %v1536_v60 = vrot.slane %v5603_v56, 7  ;;  %v1632_v3 = vrot.slane %v5603_v56, 1  ;;  %v4225_v50 = vpack.i.bf16 %v5603_v56, %v5555_v51 }
 0x28e   : > { %2358 = vmatpush.bf16.msra.mxu1 %v3688_v58  ;;  %3725 = vmatpush.bf16.msra.mxu3 %v3688_v58 }
 0x28f   : > { %v1381_v29 = vpop.f32.mrf.mxu0  ;;  %v1408_v55 = vpop.f32.mrf.mxu2 }
 0x290   : > { %v1382_v19 = vadd.f32 %v5183_v43, %v1381_v29  ;;  %v1409_v59 = vadd.f32 %v5183_v43, %v1408_v55 }
 0x292   : > { %v5610_v10 = vmax.f32 %v1382_v19, 0.0  ;;  %v5612_v35 = vmax.f32 %v1409_v59, 0.0  ;;  %2359 = vmatpush.bf16.msra.mxu1 %v3687_v57  ;;  %3726 = vmatpush.bf16.msra.mxu3 %v3687_v57  ;;  %v1631_v19 = vsel %vm585_vm0, %v1629_v8, %v1630_v24  ;;  %v1671_v59 = vsel %vm585_vm0, %v1630_v24, 0.0 }
 0x293   : > { %v4240_v16 = vpack.i.bf16 %v1671_v59, %v1631_v19 }
 0x294   : > { %v1537_v1 = vrot.slane %v5612_v35, 7  ;;  %v4190_v17 = vpack.i.bf16 %v5610_v10, %v5540_v9  ;;  %v1521_v63 = vrot.slane %v5610_v10, 7  ;;  %v1617_v20 = vrot.slane %v5610_v10, 1 }
 0x295   : > { %v1633_v23 = vrot.slane %v5612_v35, 1 }
 0x296   : > { %v5624_v30 = vsel %vm483_vm1, %v1536_v60, %v1537_v1  ;;  %4191 = vrot.lane.b32.xlu2 %v4190_v17, %s4564_s26 }
 0x297   : > { %v1383_v62 = vpop.f32.mrf.mxu0  ;;  %v1634_v13 = vsel %vm585_vm0, %v1632_v3, %v1633_v23  ;;  %v1672_v36 = vsel %vm585_vm0, %v1633_v23, 0.0 }
 0x298   : > { %v1384_v5 = vadd.f32 %v5183_v43, %v1383_v62  ;;  %v4245_v45 = vpack.i.bf16 %v1672_v36, %v1634_v13 }
 0x29a   : > { %v1441_v25 = vmax.f32 %v1384_v5, 0.0 }
 0x29c   : > { %v1522_v31 = vrot.slane %v1441_v25, 7  ;;  %v1618_v37 = vrot.slane %v1441_v25, 1  ;;  %v4205_v47 = vpack.i.bf16 %v5552_v54, %v1441_v25 }
 0x29e   : > { %4206 = vrot.lane.b32.xlu0 %v4205_v47, %s4564_s26  ;;  %v1619_v28 = vsel %vm585_vm0, %v1617_v20, %v1618_v37  ;;  %v1667_v27 = vsel %vm585_vm0, %v1618_v37, 0.0  ;;  %v5643_v21 = vsel %vm483_vm1, %v1521_v63, %v1522_v31 }
 0x29f   : > { %v1386_v49 = vpop.f32.mrf.mxu0  ;;  %v4220_v48 = vpack.i.bf16 %v1667_v27, %v1619_v28 }
 0x2a0   : > { %v1387_v18 = vadd.f32 %v5183_v43, %v1386_v49 }
 0x2a1   : > { %4221 = vrot.lane.b32.xlu1 %v4220_v48, %s6517_s17  ;;  %v5682_v48 = vld [vmem:[%s6528_s2] ss:$0 sm:$0xff]  ;;  %v4162_v36 = vpop.permute.xlu0 %4161 }
 0x2a2   : > { %v5656_v29 = vmax.f32 %v1387_v18, 0.0 }
 0x2a4   : > { %v1524_v51 = vrot.slane %v5656_v29, 7  ;;  %v1620_v5 = vrot.slane %v5656_v29, 1 }
 0x2a6   : > { %4226 = vrot.lane.b32.xlu0 %v4225_v50, %s4564_s26 }
 0x2a7   : > { %v1388_v4 = vpop.f32.mrf.mxu0 }
 0x2a8   : > { %v1389_v55 = vadd.f32 %v5183_v43, %v1388_v4 }
 0x2a9   : > { %4246 = vrot.lane.b32.xlu1 %v4245_v45, %s6517_s17 }
 0x2aa   : > { %v5662_v34 = vmax.f32 %v1389_v55, 0.0 }
 0x2ac   : > { %v1525_v1 = vrot.slane %v5662_v34, 7  ;;  %v1621_v17 = vrot.slane %v5662_v34, 1 }
 0x2ae   : > { %4241 = vrot.lane.b32.xlu0 %v4240_v16, %s6517_s17  ;;  %v5671_v62 = vsel %vm483_vm1, %v1524_v51, %v1525_v1  ;;  %v4157_v20 = vpop.permute.xlu2 %4156  ;;  %v1622_v31 = vsel %vm585_vm0, %v1620_v5, %v1621_v17  ;;  %v1668_v37 = vsel %vm585_vm0, %v1621_v17, 0.0  ;;  %v4149_v16 = vunpack.i.h.bf16 %v5564_v33 }
 0x2af   : > { %v1391_v58 = vpop.f32.mrf.mxu0  ;;  %v1411_v25 = vpop.f32.mrf.mxu2  ;;  %v4260_v47 = vpack.i.bf16 %v1668_v37, %v1622_v31  ;;  %v4159_v45 = vunpack.i.h.bf16 %v4157_v20  ;;  %v4158_v55 = vunpack.i.l.bf16 %v4157_v20 }
 0x2b0   : > { %v1392_v57 = vadd.f32 %v5183_v43, %v1391_v58  ;;  %v1412_v28 = vadd.f32 %v5183_v43, %v1411_v25  ;;  %v4163_v58 = vunpack.i.l.bf16 %v4162_v36 }
 0x2b2   : > { %v5686_v24 = vmax.f32 %v1392_v57, 0.0  ;;  %v5688_v43 = vmax.f32 %v1412_v28, 0.0 }
 0x2b4   : > { %v1527_v37 = vrot.slane %v5686_v24, 7 }
 0x2b6   : > { %4261 = vrot.lane.b32.xlu0 %v4260_v47, %s6517_s17  ;;  %v5694_v19 = vpop.permute.xlu2 %4171  ;;  %v1539_v47 = vrot.slane %v5688_v43, 7 }
 0x2b7   : > { %v1393_v27 = vpop.f32.mrf.mxu0  ;;  %v1413_v49 = vpop.f32.mrf.mxu2 }
 0x2b8   : > { %v1394_v23 = vadd.f32 %v5682_v48, %v1393_v27  ;;  %v1414_v3 = vadd.f32 %v5682_v48, %v1413_v49  ;;  %v4152_v18 = vpop.permute.xlu1 %4151  ;;  %v1623_v27 = vrot.slane %v5686_v24, 1 }
 0x2b9   : > { %v4154_v50 = vunpack.i.h.bf16 %v4152_v18  ;;  %v4153_v13 = vunpack.i.l.bf16 %v4152_v18  ;;  %v1584_v18 = vsel %vm483_vm1, 0.0, %v1512_v12 }
 0x2ba   : > { %v5690_v8 = vmax.f32 %v1394_v23, 0.0  ;;  %v5692_v4 = vmax.f32 %v1414_v3, 0.0 }
 0x2bb   : > { %v2188_v59 = vsel %vm1217_vm6, %v5593_v39, %v4153_v13  ;;  %v2189_v1 = vsel %vm1217_vm6, %v5587_v32, %v4154_v50 }
 0x2bc   : > { %v1528_v17 = vrot.slane %v5690_v8, 7  ;;  %v1540_v5 = vrot.slane %v5692_v4, 7  ;;  %v4265_v25 = vpack.i.bf16 %v5686_v24, %v5692_v4  ;;  %v2221_v20 = vsel %vm2220_vm10, %v2188_v59, %v4158_v55 }
 0x2bd   : > { %v2222_v31 = vsel %vm2220_vm10, %v2189_v1, %v4159_v45  ;;  %v1624_v57 = vrot.slane %v5690_v8, 1  ;;  %v1903_v45 = vsel %vm923_vm3, %v1584_v18, %v4149_v16  ;;  %v1904_v55 = vsel %vm923_vm3, %v5434_v61, %v4163_v58 }
 0x2be   : > { %v2253_v33 = vpack.c.bf16 %v2222_v31, %v2221_v20  ;;  %4266 = vrot.lane.b32.xlu0 %v4265_v25, %s4564_s26  ;;  %v5716_v23 = vsel %vm483_vm1, %v1539_v47, %v1540_v5  ;;  %v5721_v3 = vsel %vm483_vm1, %v1527_v37, %v1528_v17  ;;  %v4187_v25 = vpop.permute.xlu2 %4186  ;;  %v4164_v20 = vunpack.i.h.bf16 %v4162_v36 }
 0x2bf   : > { %v1396_v28 = vpop.f32.mrf.mxu0  ;;  %v1625_v59 = vsel %vm585_vm0, %v1623_v27, %v1624_v57  ;;  %v1669_v1 = vsel %vm585_vm0, %v1624_v57, 0.0  ;;  %v4188_v31 = vunpack.i.l.bf16 %v4187_v25  ;;  %v4189_v18 = vunpack.i.h.bf16 %v4187_v25 }
 0x2c0   : > { %3548 = vmatmul.msk.bf16.vlgmr.msra.gmra.mxu1 %vm2299_vm11, %v2253_v33  ;;  %v4167_v49 = vpop.permute.xlu1 %4166  ;;  %v1397_v38 = vadd.f32 %v5682_v48, %v1396_v28  ;;  %v4295_v16 = vpack.i.bf16 %v1669_v1, %v1625_v59  ;;  %v1585_v28 = vsel %vm483_vm1, 0.0, %v1515_v22 }
 0x2c1   : > { %v4169_v50 = vunpack.i.h.bf16 %v4167_v49  ;;  %v4168_v13 = vunpack.i.l.bf16 %v4167_v49  ;;  %v1905_v36 = vsel %vm923_vm3, %v1585_v28, %v4164_v20 }
 0x2c2   : > { %v5742_v57 = vmax.f32 %v1397_v38, 0.0  ;;  %v5764_v38 = vsel %vm1927_vm8, %v1905_v36, %v4188_v31 }
 0x2c3   : > { %v5732_v5 = vsel %vm1927_vm8, %v1903_v45, %v4168_v13  ;;  %v5735_v17 = vsel %vm1927_vm8, %v1904_v55, %v4169_v50  ;;  %v4235_v13 = vpack.i.bf16 %v5656_v29, %v5612_v35  ;;  %v4174_v45 = vunpack.i.h.bf16 %v5694_v19 }
 0x2c4   : > { %v4230_v12 = vpack.i.bf16 %v5735_v17, %v5732_v5  ;;  %v4173_v55 = vunpack.i.l.bf16 %v5694_v19  ;;  %v1530_v22 = vrot.slane %v5742_v57, 7 }
 0x2c6   : > { %4231 = vrot.lane.b32.xlu2 %v4230_v12, %s4569_s29  ;;  %v1416_v61 = vpop.f32.mrf.mxu2  ;;  %4296 = vrot.lane.b32.xlu0 %v4295_v16, %s6517_s17  ;;  %v2190_v28 = vsel %vm1217_vm6, %v5477_v14, %v4173_v55  ;;  %v1635_v55 = vrot.slane %v5688_v43, 1 }
 0x2c7   : > { %v1398_v58 = vpop.f32.mrf.mxu0  ;;  %v1417_v59 = vadd.f32 %v5682_v48, %v1416_v61 }
 0x2c8   : > { %v1399_v33 = vadd.f32 %v5682_v48, %v1398_v58  ;;  %v5745_v27 = vpop.permute.xlu1 %4181 }
 0x2c9   : > { %v4183_v49 = vunpack.i.l.bf16 %v5745_v27  ;;  %v5777_v20 = vmax.f32 %v1417_v59, 0.0 }
 0x2ca   : > { %v5752_v50 = vmax.f32 %v1399_v33, 0.0  ;;  %v2191_v33 = vsel %vm1217_vm6, %v5480_v41, %v4174_v45  ;;  %v1636_v41 = vrot.slane %v5692_v4, 1  ;;  %v1626_v45 = vrot.slane %v5742_v57, 1 }
 0x2cb   : > { %v1906_v42 = vsel %vm923_vm3, %v5455_v53, %v4183_v49  ;;  %v1542_v59 = vrot.slane %v5777_v20, 7  ;;  %v4255_v4 = vpack.i.bf16 %v5688_v43, %v5662_v34 }
 0x2cc   : > { %v1531_v1 = vrot.slane %v5752_v50, 7  ;;  %v5767_v25 = vsel %vm1927_vm8, %v1906_v42, %v4189_v18 }
 0x2cd   : > { %v4270_v35 = vpack.i.bf16 %v5767_v25, %v5764_v38 }
 0x2ce   : > { %4236 = vrot.lane.b32.xlu2 %v4235_v13, %s4564_s26  ;;  %v1418_v19 = vpop.f32.mrf.mxu2  ;;  %v4177_v16 = vpop.permute.xlu0 %4176  ;;  %v5775_v53 = vsel %vm483_vm1, %v1530_v22, %v1531_v1 }
 0x2cf   : > { %v1419_v61 = vadd.f32 %v5682_v48, %v1418_v19  ;;  %v4179_v58 = vunpack.i.h.bf16 %v4177_v16  ;;  %v4178_v31 = vunpack.i.l.bf16 %v4177_v16  ;;  %4271 = vrot.lane.b32.xlu1 %v4270_v35, %s4569_s29  ;;  %v1627_v19 = vrot.slane %v5752_v50, 1 }
 0x2d1   : > { %v1455_v49 = vmax.f32 %v1419_v61, 0.0  ;;  %v2223_v36 = vsel %vm2220_vm10, %v2190_v28, %v4178_v31  ;;  %v2224_v18 = vsel %vm2220_vm10, %v2191_v33, %v4179_v58  ;;  %v1628_v16 = vsel %vm585_vm0, %v1626_v45, %v1627_v19 }
 0x2d2   : > { %v2254_v13 = vpack.c.bf16 %v2224_v18, %v2223_v36  ;;  %v1670_v61 = vsel %vm585_vm0, %v1627_v19, 0.0  ;;  %v1637_v58 = vsel %vm585_vm0, %v1635_v55, %v1636_v41  ;;  %v1673_v31 = vsel %vm585_vm0, %v1636_v41, 0.0 }
 0x2d3   : > { %v1543_v42 = vrot.slane %v1455_v49, 7  ;;  %v4300_v1 = vpack.i.bf16 %v5742_v57, %v1455_v49  ;;  %v4325_v33 = vpack.i.bf16 %v1670_v61, %v1628_v16  ;;  %v4280_v28 = vpack.i.bf16 %v1673_v31, %v1637_v58 }
 0x2d4   : > { %3549 = vmatmul.msk.bf16.gmra.mxu1 %vm2299_vm11, %v2254_v13  ;;  %v1518_v36 = vrot.slane %v5503_v40, 7  ;;  %v1519_v18 = vrot.slane %v5540_v9, 7  ;;  %v4184_v13 = vunpack.i.h.bf16 %v5745_v27 }
 0x2d5   : > { %4301 = vrot.lane.b32.xlu0 %v4300_v1, %s4564_s26  ;;  %v5795_v14 = vsel %vm483_vm1, %v1542_v59, %v1543_v42 }
 0x2d6   : > { %4251 = vrot.lane.b32.xlu2 %v4230_v12, %s6519_s28  ;;  %v4197_v12 = vpop.permute.xlu0 %4196  ;;  %v1586_v45 = vsel %vm483_vm1, 0.0, %v1518_v36  ;;  %v1520_v16 = vsel %vm483_vm1, %v1518_v36, %v1519_v18  ;;  %v1639_v18 = vrot.slane %v1455_v49, 1  ;;  %v1421_v49 = vpop.f32.mrf.mxu2 }
 0x2d7   : > { %4276 = vrot.lane.b32.xlu1 %v4270_v35, %s6519_s28  ;;  %v4199_v42 = vunpack.i.h.bf16 %v4197_v12  ;;  %v4198_v1 = vunpack.i.l.bf16 %v4197_v12  ;;  %v1907_v58 = vsel %vm923_vm3, %v1586_v45, %v4184_v13 }
 0x2d9   : > { %v2192_v9 = vsel %vm1217_vm6, %v5509_v11, %v4198_v1  ;;  %v2193_v27 = vsel %vm1217_vm6, %v5512_v15, %v4199_v42  ;;  %v1638_v11 = vrot.slane %v5777_v20, 1  ;;  %v1674_v42 = vsel %vm585_vm0, %v1639_v18, 0.0 }
 0x2da   : > { %v4290_v1 = vpack.i.bf16 %v5777_v20, %v5690_v8  ;;  %v1587_v8 = vsel %vm483_vm1, 0.0, %v1521_v63 }
 0x2db   : > { %v1640_v15 = vsel %vm585_vm0, %v1638_v11, %v1639_v18 }
 0x2dd   : > { %4326 = vrot.lane.b32.xlu0 %v4325_v33, %s6517_s17 }
 0x2de   : > { %4256 = vrot.lane.b32.xlu2 %v4255_v4, %s4564_s26  ;;  %v4202_v35 = vpop.permute.xlu0 %4201  ;;  %v1423_v45 = vpop.f32.mrf.mxu2 }
 0x2df   : > { %4281 = vrot.lane.b32.xlu1 %v4280_v28, %s6517_s17  ;;  %v4203_v19 = vunpack.i.l.bf16 %v4202_v35  ;;  %v4204_v55 = vunpack.i.h.bf16 %v4202_v35 }
 0x2e1   : > { %v5823_v4 = vsel %vm1927_vm8, %v1907_v58, %v4203_v19  ;;  %v4310_v19 = vpack.i.bf16 %v1674_v42, %v1640_v15 }
 0x2f0   : > { %v4192_v41 = vpop.permute.xlu2 %4191 }
 0x2f1   : > { %v4193_v34 = vunpack.i.l.bf16 %v4192_v41 }
 0x2f3   : > { %v4212_v61 = vpop.permute.xlu1 %4211  ;;  %v1908_v31 = vsel %vm923_vm3, %v1520_v16, %v4193_v34 }
 0x2f4   : > { %v4214_v40 = vunpack.i.h.bf16 %v4212_v61  ;;  %v4213_v33 = vunpack.i.l.bf16 %v4212_v61  ;;  %v5826_v28 = vsel %vm1927_vm8, %v1908_v31, %v4204_v55  ;;  %v1424_v55 = vadd.f32 %v5682_v48, %v1423_v45 }
 0x2f5   : > { %v4285_v12 = vpack.i.bf16 %v5826_v28, %v5823_v4  ;;  %v4194_v61 = vunpack.i.h.bf16 %v4192_v41  ;;  %v1422_v31 = vadd.f32 %v5682_v48, %v1421_v49 }
 0x2f6   : > { %v2225_v35 = vsel %vm2220_vm10, %v2192_v9, %v4213_v33  ;;  %v2226_v36 = vsel %vm2220_vm10, %v2193_v27, %v4214_v40  ;;  %v5847_v33 = vmax.f32 %v1424_v55, 0.0  ;;  %v1591_v55 = vsel %vm483_vm1, 0.0, %v1533_v52 }
 0x2f7   : > { %v2255_v13 = vpack.c.bf16 %v2226_v36, %v2225_v35  ;;  %4286 = vrot.lane.b32.xlu2 %v4285_v12, %s4569_s29  ;;  %4306 = vrot.lane.b32.xlu1 %v4285_v12, %s6519_s28  ;;  %v1909_v12 = vsel %vm923_vm3, %v1587_v8, %v4194_v61  ;;  %v5852_v36 = vmax.f32 %v1422_v31, 0.0 }
 0x2f8   : > { %v1642_v63 = vrot.slane %v5847_v33, 1 }
 0x2f9   : > { %3550 = vmatmul.msk.bf16.gmra.mxu1 %vm2299_vm11, %v2255_v13  ;;  %v4320_v45 = vpack.i.bf16 %v5852_v36, %v5752_v50 }
 0x2fa   : > { %v1675_v11 = vsel %vm585_vm0, %v1642_v63, 0.0 }
 0x2fb   : > { %v4217_v34 = vpop.permute.xlu1 %4216 }
 0x2fc   : > { %v4219_v15 = vunpack.i.h.bf16 %v4217_v34  ;;  %v4218_v42 = vunpack.i.l.bf16 %v4217_v34 }
 0x2fe   : > { %v2195_v34 = vsel %vm1217_vm6, %v5531_v44, %v4219_v15  ;;  %v2194_v50 = vsel %vm1217_vm6, %v5528_v2, %v4218_v42 }
 0x2ff   : > { %4291 = vrot.lane.b32.xlu2 %v4290_v1, %s4564_s26  ;;  %4311 = vrot.lane.b32.xlu1 %v4310_v19, %s6517_s17 }
 0x310   : > { %v4207_v16 = vpop.permute.xlu0 %4206 }
 0x311   : > { %v4208_v58 = vunpack.i.l.bf16 %v4207_v16  ;;  %v4209_v1 = vunpack.i.h.bf16 %v4207_v16 }
 0x313   : > { %v4222_v40 = vpop.permute.xlu1 %4221  ;;  %v1910_v35 = vsel %vm923_vm3, %v5643_v21, %v4208_v58  ;;  %v1641_v21 = vrot.slane %v5852_v36, 1  ;;  %v1917_v54 = vsel %vm923_vm3, %v1591_v55, %v4209_v1 }
 0x314   : > { %v4224_v9 = vunpack.i.h.bf16 %v4222_v40  ;;  %v4223_v27 = vunpack.i.l.bf16 %v4222_v40 }
 0x315   : > { %v1643_v13 = vsel %vm585_vm0, %v1641_v21, %v1642_v63 }
 0x316   : > { %v5855_v41 = vsel %vm1927_vm8, %v1909_v12, %v4223_v27  ;;  %v5858_v48 = vsel %vm1927_vm8, %v1910_v35, %v4224_v9  ;;  %v4345_v49 = vpack.i.bf16 %v1675_v11, %v1643_v13  ;;  %v1592_v11 = vsel %vm483_vm1, 0.0, %v1536_v60 }
 0x317   : > { %v4340_v10 = vpack.i.bf16 %v5858_v48, %v5855_v41 }
 0x318   : > { %v4227_v18 = vpop.permute.xlu0 %4226 }
 0x319   : > { %4341 = vrot.lane.b32.xlu0 %v4340_v10, %s6519_s28  ;;  %4316 = vrot.lane.b32.xlu2 %v4340_v10, %s4569_s29  ;;  %v4228_v19 = vunpack.i.l.bf16 %v4227_v18 }
 0x31b   : > { %v1918_v52 = vsel %vm923_vm3, %v5562_v6, %v4228_v19  ;;  %v4247_v2 = vpop.permute.xlu1 %4246  ;;  %v4229_v6 = vunpack.i.h.bf16 %v4227_v18 }
 0x31c   : > { %v4248_v63 = vunpack.i.l.bf16 %v4247_v2  ;;  %v4249_v15 = vunpack.i.h.bf16 %v4247_v2 }
 0x31d   : > { %v1919_v42 = vsel %vm923_vm3, %v1592_v11, %v4229_v6 }
 0x31e   : > { %v5904_v19 = vsel %vm1927_vm8, %v1919_v42, %v4248_v63 }
 0x320   : > { %v4232_v61 = vpop.permute.xlu2 %4231  ;;  %v4242_v58 = vpop.permute.xlu0 %4241 }
 0x321   : > { %v4234_v31 = vunpack.i.h.bf16 %v4232_v61  ;;  %v4233_v40 = vunpack.i.l.bf16 %v4232_v61  ;;  %v4244_v8 = vunpack.i.h.bf16 %v4242_v58  ;;  %v4243_v9 = vunpack.i.l.bf16 %v4242_v58  ;;  %4346 = vrot.lane.b32.xlu0 %v4345_v49, %s6517_s17  ;;  %4321 = vrot.lane.b32.xlu2 %v4320_v45, %s4564_s26 }
 0x323   : > { %v2227_v16 = vsel %vm2220_vm10, %v2194_v50, %v4233_v40  ;;  %v2228_v27 = vsel %vm2220_vm10, %v2195_v34, %v4234_v31  ;;  %v5885_v12 = vsel %vm1927_vm8, %v1917_v54, %v4243_v9  ;;  %v5888_v35 = vsel %vm1927_vm8, %v1918_v52, %v4244_v8 }
 0x324   : > { %v2256_v10 = vpack.c.bf16 %v2228_v27, %v2227_v16  ;;  %v5892_v44 = vpack.i.bf16 %v5888_v35, %v5885_v12 }
 0x326   : > { %3551 = vmatmul.msk.bf16.gmra.mxu1 %vm2299_vm11, %v2256_v10  ;;  %4331 = vrot.lane.b32.xlu1 %v5892_v44, %s6519_s28 }
 0x328   : > { %v4237_v21 = vpop.permute.xlu2 %4236  ;;  %v4262_v60 = vpop.permute.xlu0 %4261 }
 0x329   : > { %v4238_v13 = vunpack.i.l.bf16 %v4237_v21  ;;  %v4239_v45 = vunpack.i.h.bf16 %v4237_v21  ;;  %v4263_v55 = vunpack.i.l.bf16 %v4262_v60  ;;  %v4264_v40 = vunpack.i.h.bf16 %v4262_v60 }
 0x32b   : > { %v1920_v1 = vsel %vm923_vm3, %v5624_v30, %v4238_v13  ;;  %v1588_v30 = vsel %vm483_vm1, 0.0, %v1524_v51 }
 0x32c   : > { %v5907_v49 = vsel %vm1927_vm8, %v1920_v1, %v4249_v15  ;;  %v1911_v58 = vsel %vm923_vm3, %v1588_v30, %v4239_v45 }
 0x32d   : > { %v4335_v18 = vpack.i.bf16 %v5907_v49, %v5904_v19  ;;  %v5921_v9 = vsel %vm1927_vm8, %v1911_v58, %v4263_v55 }
 0x32f   : > { %4336 = vrot.lane.b32.xlu2 %v4335_v18, %s4569_s29 }
 0x330   : > { %v4252_v56 = vpop.permute.xlu2 %4251  ;;  %v4267_v21 = vpop.permute.xlu0 %4266 }
 0x331   : > { %v4254_v50 = vunpack.i.h.bf16 %v4252_v56  ;;  %v4253_v51 = vunpack.i.l.bf16 %v4252_v56  ;;  %v4268_v13 = vunpack.i.l.bf16 %v4267_v21 }
 0x333   : > { %v2196_v27 = vsel %vm1217_vm6, %v5574_v26, %v4253_v51  ;;  %v1593_v26 = vsel %vm483_vm1, 0.0, %v1539_v47  ;;  %v1922_v60 = vsel %vm923_vm3, %v5716_v23, %v4268_v13 }
 0x337   : > { %1740 = vrot.lane.b32.xlu2 %v5847_v33, %s4564_s26 }
 0x338   : > { %v4257_v61 = vpop.permute.xlu2 %4256 }
 0x339   : > { %v4258_v31 = vunpack.i.l.bf16 %v4257_v61  ;;  %v4259_v11 = vunpack.i.h.bf16 %v4257_v61 }
 0x33b   : > { %v1912_v8 = vsel %vm923_vm3, %v5671_v62, %v4258_v31  ;;  %v2197_v62 = vsel %vm1217_vm6, %v5577_v46, %v4254_v50 }
 0x33c   : > { %v5924_v34 = vsel %vm1927_vm8, %v1912_v8, %v4264_v40 }
 0x33d   : > { %v4365_v29 = vpack.i.bf16 %v5924_v34, %v5921_v9 }
 0x33f   : > { %4366 = vrot.lane.b32.xlu0 %v4365_v29, %s6519_s28  ;;  %4351 = vrot.lane.b32.xlu1 %v4365_v29, %s4569_s29  ;;  %v4297_v29 = vpop.permute.xlu0 %4296 }
 0x341   : > { %v4272_v54 = vpop.permute.xlu1 %4271 }
 0x342   : > { %v4274_v52 = vunpack.i.h.bf16 %v4272_v54  ;;  %v4273_v16 = vunpack.i.l.bf16 %v4272_v54  ;;  %v1589_v54 = vsel %vm483_vm1, 0.0, %v1527_v37  ;;  %v2361_v37 = vpop.f32.mrf.mxu1 }
 0x344   : > { %v2229_v10 = vsel %vm2220_vm10, %v2196_v27, %v4273_v16  ;;  %v2230_v2 = vsel %vm2220_vm10, %v2197_v62, %v4274_v52  ;;  %v4299_v52 = vunpack.i.h.bf16 %v4297_v29 }
 0x345   : > { %v2257_v6 = vpack.c.bf16 %v2230_v2, %v2229_v10 }
 0x347   : > { %4356 = vrot.lane.b32.xlu1 %v4335_v18, %s6519_s28  ;;  %3552 = vmatmul.msk.bf16.gmra.mxu1 %vm2299_vm11, %v2257_v6  ;;  %v1921_v18 = vsel %vm923_vm3, %v1593_v26, %v4259_v11  ;;  %v4302_v6 = vpop.permute.xlu0 %4301 }
 0x349   : > { %v4277_v63 = vpop.permute.xlu1 %4276 }
 0x34a   : > { %v4279_v15 = vunpack.i.h.bf16 %v4277_v63  ;;  %v4278_v42 = vunpack.i.l.bf16 %v4277_v63  ;;  %v4303_v63 = vunpack.i.l.bf16 %v4302_v6 }
 0x34c   : > { %v2199_v61 = vsel %vm1217_vm6, %v5735_v17, %v4279_v15  ;;  %v2198_v58 = vsel %vm1217_vm6, %v5732_v5, %v4278_v42  ;;  %v4269_v5 = vunpack.i.h.bf16 %v4267_v21  ;;  %v4298_v17 = vunpack.i.l.bf16 %v4297_v29 }
 0x34d   : > { %v1594_v15 = vsel %vm483_vm1, 0.0, %v1542_v59  ;;  %v1590_v29 = vsel %vm483_vm1, 0.0, %v1530_v22 }
 0x34e   : > { %v1913_v16 = vsel %vm923_vm3, %v1589_v54, %v4269_v5 }
 0x34f   : > { %v5967_v27 = vsel %vm1927_vm8, %v1913_v16, %v4298_v17 }
 0x351   : > { %v4282_v1 = vpop.permute.xlu1 %4281  ;;  %v4287_v45 = vpop.permute.xlu2 %4286 }
 0x352   : > { %v4284_v46 = vunpack.i.h.bf16 %v4282_v1  ;;  %v4283_v56 = vunpack.i.l.bf16 %v4282_v1  ;;  %v4289_v30 = vunpack.i.h.bf16 %v4287_v45  ;;  %v4288_v55 = vunpack.i.l.bf16 %v4287_v45 }
 0x354   : > { %v5949_v43 = vsel %vm1927_vm8, %v1921_v18, %v4283_v56  ;;  %v5952_v47 = vsel %vm1927_vm8, %v1922_v60, %v4284_v46  ;;  %v2231_v23 = vsel %vm2220_vm10, %v2198_v58, %v4288_v55  ;;  %v2232_v40 = vsel %vm2220_vm10, %v2199_v61, %v4289_v30  ;;  %v2363_v58 = vpop.f32.mrf.mxu1 }
 0x355   : > { %v4360_v31 = vpack.i.bf16 %v5952_v47, %v5949_v43  ;;  %v2258_v8 = vpack.c.bf16 %v2232_v40, %v2231_v23  ;;  %v1924_v46 = vsel %vm923_vm3, %v5795_v14, %v4303_v63  ;;  %v4327_v23 = vpop.permute.xlu0 %4326 }
 0x356   : > { %v4329_v5 = vunpack.i.h.bf16 %v4327_v23 }
 0x357   : > { %4361 = vrot.lane.b32.xlu2 %v4360_v31, %s4569_s29  ;;  %3553 = vmatmul.msk.bf16.gmra.mxu1 %vm2299_vm11, %v2258_v8 }
 0x359   : > { %v4292_v50 = vpop.permute.xlu2 %4291 }
 0x35a   : > { %v4293_v51 = vunpack.i.l.bf16 %v4292_v50 }
 0x35c   : > { %v1914_v62 = vsel %vm923_vm3, %v5721_v3, %v4293_v51  ;;  %v4294_v3 = vunpack.i.h.bf16 %v4292_v50  ;;  %v2366_v51 = vpop.f32.mrf.mxu1 }
 0x35d   : > { %v5970_v10 = vsel %vm1927_vm8, %v1914_v62, %v4299_v52 }
 0x35e   : > { %v4370_v2 = vpack.i.bf16 %v5970_v10, %v5967_v27  ;;  %v1923_v56 = vsel %vm923_vm3, %v1594_v15, %v4294_v3 }
 0x35f   : > { %4376 = vrot.lane.b32.xlu2 %v4360_v31, %s6519_s28 }
 0x360   : > { %4371 = vrot.lane.b32.xlu1 %v4370_v2, %s4569_s29 }
 0x364   : > { %v2368_v57 = vpop.f32.mrf.mxu1 }
 0x368   : > { %4386 = vrot.lane.b32.xlu1 %v4370_v2, %s6519_s28  ;;  %v1545_v2 = vrot.slane %v5852_v36, 7 }
 0x369   : > { %v4307_v24 = vpop.permute.xlu1 %4306 }
 0x36a   : > { %v4309_v21 = vunpack.i.h.bf16 %v4307_v24  ;;  %v4308_v13 = vunpack.i.l.bf16 %v4307_v24  ;;  %v1546_v24 = vrot.slane %v5847_v33, 7 }
 0x36c   : > { %v2201_v18 = vsel %vm1217_vm6, %v5767_v25, %v4309_v21  ;;  %v2200_v30 = vsel %vm1217_vm6, %v5764_v38, %v4308_v13  ;;  %v4304_v38 = vunpack.i.h.bf16 %v4302_v6  ;;  %v4328_v25 = vunpack.i.l.bf16 %v4327_v23 }
 0x36d   : > { %v1547_v15 = vsel %vm483_vm1, %v1545_v2, %v1546_v24 }
 0x36e   : > { %v1915_v17 = vsel %vm923_vm3, %v1590_v29, %v4304_v38 }
 0x36f   : > { %v1950_v54 = vsel %vm1927_vm8, %v1915_v17, %v4328_v25 }
 0x371   : > { %v4312_v11 = vpop.permute.xlu1 %4311 }
 0x372   : > { %v4314_v42 = vunpack.i.h.bf16 %v4312_v11  ;;  %v4313_v1 = vunpack.i.l.bf16 %v4312_v11  ;;  %v1595_v11 = vsel %vm483_vm1, 0.0, %v1545_v2 }
 0x373   : > { %v4317_v26 = vpop.permute.xlu2 %4316 }
 0x374   : > { %v4319_v45 = vunpack.i.h.bf16 %v4317_v26  ;;  %v4318_v60 = vunpack.i.l.bf16 %v4317_v26  ;;  %v5988_v20 = vsel %vm1927_vm8, %v1923_v56, %v4313_v1  ;;  %v5991_v59 = vsel %vm1927_vm8, %v1924_v46, %v4314_v42 }
 0x375   : > { %v4380_v55 = vpack.i.bf16 %v5991_v59, %v5988_v20 }
 0x376   : > { %v2233_v14 = vsel %vm2220_vm10, %v2200_v30, %v4318_v60  ;;  %v2234_v61 = vsel %vm2220_vm10, %v2201_v18, %v4319_v45  ;;  %v2371_v63 = vpop.f32.mrf.mxu1 }
 0x377   : > { %v2259_v31 = vpack.c.bf16 %v2234_v61, %v2233_v14  ;;  %4381 = vrot.lane.b32.xlu0 %v4380_v55, %s4569_s29 }
 0x379   : > { %3554 = vmatmul.msk.bf16.gmra.mxu1 %vm2299_vm11, %v2259_v31 }
 0x37b   : > { %v4322_v40 = vpop.permute.xlu2 %4321 }
 0x37c   : > { %v4323_v8 = vunpack.i.l.bf16 %v4322_v40  ;;  %v4324_v3 = vunpack.i.h.bf16 %v4322_v40 }
 0x37e   : > { %v1916_v50 = vsel %vm923_vm3, %v5775_v53, %v4323_v8  ;;  %v6017_v53 = vld [vmem:[%s6508_s4] ss:$0 sm:$0xff]  ;;  %v1925_v1 = vsel %vm923_vm3, %v1595_v11, %v4324_v3  ;;  %v2373_v61 = vpop.f32.mrf.mxu1 }
 0x37f   : > { %v1951_v52 = vsel %vm1927_vm8, %v1916_v50, %v4329_v5  ;;  %4396 = vrot.lane.b32.xlu0 %v4380_v55, %s6519_s28  ;;  %v2367_v6 = vadd.f32 %v6017_v53, %v2366_v51  ;;  %v2362_v21 = vadd.f32 %v6017_v53, %v2361_v37  ;;  %v2364_v30 = vadd.f32 %v6017_v53, %v2363_v58 }
 0x380   : > { %v4390_v16 = vpack.i.bf16 %v1951_v52, %v1950_v54  ;;  %v2372_v58 = vadd.f32 %v6017_v53, %v2371_v63 }
 0x381   : > { %v2443_v33 = vmax.f32 %v2367_v6, 0.0  ;;  %v2441_v32 = vmax.f32 %v2362_v21, 0.0  ;;  %v2442_v5 = vmax.f32 %v2364_v30, 0.0 }
 0x382   : > { %4391 = vrot.lane.b32.xlu2 %v4390_v16, %s4569_s29 }
 0x383   : > { %v2473_v45 = vmax.f32 %v2441_v32, %v2443_v33 }
 0x385   : > { %v2497_v8 = vrot.slane %v2473_v45, 1 }
 0x387   : > { %4411 = vrot.lane.b32.xlu0 %v5892_v44, %s4569_s29  ;;  %v2513_v50 = vmax.f32 %v2473_v45, %v2497_v8 }
 0x389   : > { %v4337_v22 = vpop.permute.xlu2 %4336  ;;  %v2577_v2 = vrot.slane %v2513_v50, 2 }
 0x38a   : > { %4406 = vrot.lane.b32.xlu2 %v4390_v16, %s6519_s28  ;;  %v4339_v55 = vunpack.i.h.bf16 %v4337_v22  ;;  %v4338_v14 = vunpack.i.l.bf16 %v4337_v22  ;;  %v2561_v16 = vrot.slane %v2513_v50, 1 }
 0x38b   : > { %v6012_v62 = vpop.permute.xlu0 %4341 }
 0x38c   : > { %v2681_v3 = vsel %vm483_vm1, %v2513_v50, %v2561_v16 }
 0x38d   : > { %v2689_v11 = vsel %vm1333_vm4, %v2681_v3, %v2577_v2 }
 0x391   : > { %v1741_v44 = vpop.permute.xlu2 %1740 }
 0x392   : > { %4421 = vrot.lane.b32.xlu2 %v4420_v0, %s4569_s29  ;;  %v1926_v26 = vsel %vm923_vm3, %v1547_v15, %v1741_v44  ;;  %v2369_v0 = vadd.f32 %v6017_v53, %v2368_v57  ;;  %v2445_v57 = vmax.f32 %v2372_v58, 0.0  ;;  %v2374_v44 = vadd.f32 %v6017_v53, %v2373_v61 }
 0x393   : > { %v4347_v13 = vpop.permute.xlu0 %4346 }
 0x394   : > { %v4349_v36 = vunpack.i.h.bf16 %v4347_v13  ;;  %v4348_v42 = vunpack.i.l.bf16 %v4347_v13  ;;  %v2444_v38 = vmax.f32 %v2369_v0, 0.0  ;;  %v2446_v33 = vmax.f32 %v2374_v44, 0.0 }
 0x396   : > { %v1960_v46 = vsel %vm1927_vm8, %v1925_v1, %v4348_v42  ;;  %v1961_v56 = vsel %vm1927_vm8, %v1926_v26, %v4349_v36  ;;  %v2474_v17 = vmax.f32 %v2442_v5, %v2444_v38  ;;  %v2593_v42 = vrot.slane %v2513_v50, 3 }
 0x397   : > { %v4400_v39 = vpack.i.bf16 %v1961_v56, %v1960_v46  ;;  %v4344_v56 = vunpack.i.h.bf16 %v6012_v62 }
 0x398   : > { %v4332_v37 = vpop.permute.xlu1 %4331  ;;  %v2698_v32 = vsel %vm2697_vm12, %v2689_v11, %v2593_v42 }
 0x399   : > { %v4334_v60 = vunpack.i.h.bf16 %v4332_v37  ;;  %v4333_v18 = vunpack.i.l.bf16 %v4332_v37  ;;  %4401 = vrot.lane.b32.xlu1 %v4400_v39, %s4569_s29 }
 0x39b   : > { %v2211_v31 = vsel %vm1217_vm6, %v1951_v52, %v4334_v60  ;;  %v2210_v23 = vsel %vm1217_vm6, %v1950_v54, %v4333_v18  ;;  %v2529_v52 = vrot.slane %v2474_v17, 1 }
 0x39c   : > { %v2243_v25 = vsel %vm2220_vm10, %v2210_v23, %v4338_v14  ;;  %v2244_v40 = vsel %vm2220_vm10, %v2211_v31, %v4339_v55  ;;  %v2203_v14 = vsel %vm1217_vm6, %v5826_v28, %v4344_v56 }
 0x39d   : > { %v2264_v29 = vpack.c.bf16 %v2244_v40, %v2243_v25  ;;  %v2545_v24 = vmax.f32 %v2474_v17, %v2529_v52 }
 0x39f   : > { %3559 = vmatmul.msk.bf16.vlgmr.msra.gmra.mxu3 %vm2299_vm11, %v2264_v29  ;;  %v2617_v63 = vrot.slane %v2545_v24, 4  ;;  %v2633_v46 = vrot.slane %v2545_v24, 5  ;;  %v2649_v31 = vrot.slane %v2545_v24, 6  ;;  %v2665_v58 = vrot.slane %v2545_v24, 7 }
 0x3a1   : > { %4416 = vrot.lane.b32.xlu1 %v4400_v39, %s6519_s28  ;;  %v4343_v39 = vunpack.i.l.bf16 %v6012_v62  ;;  %v2706_v45 = vsel %vm2348_vm9, %v2698_v32, %v2617_v63 }
 0x3a2   : > { %v2715_v23 = vsel %vm2714_vm13, %v2706_v45, %v2633_v46 }
 0x3a3   : > { %v2376_v51 = vpop.f32.mrf.mxu1  ;;  %v2202_v62 = vsel %vm1217_vm6, %v5823_v4, %v4343_v39  ;;  %v2724_v28 = vsel %vm2723_vm14, %v2715_v23, %v2649_v31 }
 0x3a4   : > { %v2377_v54 = vadd.f32 %v6017_v53, %v2376_v51  ;;  %v6067_v2 = vsel %vm585_vm0, %v2724_v28, %v2665_v58 }
 0x3a6   : > { %v2447_v22 = vmax.f32 %v2377_v54, 0.0 }
 0x3a8   : > { %v2475_v6 = vmax.f32 %v2445_v57, %v2447_v22 }
 0x3aa   : > { %v2498_v21 = vrot.slane %v2475_v6, 1 }
 0x3ab   : > { %v2378_v13 = vpop.f32.mrf.mxu1 }
 0x3ac   : > { %v2514_v15 = vmax.f32 %v2475_v6, %v2498_v21  ;;  %v2379_v36 = vadd.f32 %v6017_v53, %v2378_v13 }
 0x3ae   : > { %v2562_v1 = vrot.slane %v2514_v15, 1  ;;  %v2448_v26 = vmax.f32 %v2379_v36, 0.0  ;;  %v2578_v0 = vrot.slane %v2514_v15, 2  ;;  %v2594_v8 = vrot.slane %v2514_v15, 3 }
 0x3af   : > { %v2782_v36 = vrot.slane %v6067_v2, 1 }
 0x3b0   : > { %v2476_v37 = vmax.f32 %v2446_v33, %v2448_v26  ;;  %v2682_v60 = vsel %vm483_vm1, %v2514_v15, %v2562_v1 }
 0x3b1   : > { %v4352_v18 = vpop.permute.xlu1 %4351  ;;  %v2690_v38 = vsel %vm1333_vm4, %v2682_v60, %v2578_v0  ;;  %v4362_v52 = vpop.permute.xlu2 %4361 }
 0x3b2   : > { %v2530_v30 = vrot.slane %v2476_v37, 1  ;;  %v4354_v55 = vunpack.i.h.bf16 %v4352_v18  ;;  %v4353_v61 = vunpack.i.l.bf16 %v4352_v18  ;;  %v2699_v51 = vsel %vm2697_vm12, %v2690_v38, %v2594_v8  ;;  %v4367_v39 = vpop.permute.xlu0 %4366 }
 0x3b3   : > { %v4364_v24 = vunpack.i.h.bf16 %v4362_v52  ;;  %v4363_v21 = vunpack.i.l.bf16 %v4362_v52  ;;  %v4369_v0 = vunpack.i.h.bf16 %v4367_v39 }
 0x3b4   : > { %v2546_v25 = vmax.f32 %v2476_v37, %v2530_v30  ;;  %v2236_v40 = vsel %vm2220_vm10, %v2203_v14, %v4354_v55  ;;  %v2235_v29 = vsel %vm2220_vm10, %v2202_v62, %v4353_v61  ;;  %v4368_v37 = vunpack.i.l.bf16 %v4367_v39 }
 0x3b5   : > { %v2260_v50 = vpack.c.bf16 %v2236_v40, %v2235_v29  ;;  %v2205_v55 = vsel %vm1217_vm6, %v5858_v48, %v4369_v0 }
 0x3b6   : > { %v2618_v5 = vrot.slane %v2546_v25, 4  ;;  %v2634_v17 = vrot.slane %v2546_v25, 5  ;;  %v2650_v4 = vrot.slane %v2546_v25, 6  ;;  %v2666_v57 = vrot.slane %v2546_v25, 7 }
 0x3b7   : > { %3555 = vmatmul.msk.bf16.gmra.mxu1 %vm2299_vm11, %v2260_v50  ;;  %v2204_v14 = vsel %vm1217_vm6, %v5855_v41, %v4368_v37 }
 0x3b8   : > { %v2707_v54 = vsel %vm2348_vm9, %v2699_v51, %v2618_v5 }
 0x3b9   : > { %v4357_v16 = vpop.permute.xlu1 %4356  ;;  %v2716_v22 = vsel %vm2714_vm13, %v2707_v54, %v2634_v17  ;;  %v4377_v61 = vpop.permute.xlu2 %4376 }
 0x3ba   : > { %v4359_v6 = vunpack.i.h.bf16 %v4357_v16  ;;  %v4358_v3 = vunpack.i.l.bf16 %v4357_v16  ;;  %v2725_v44 = vsel %vm2723_vm14, %v2716_v22, %v2650_v4 }
 0x3bb   : > { %v6071_v13 = vsel %vm585_vm0, %v2725_v44, %v2666_v57 }
 0x3bc   : > { %v2213_v11 = vsel %vm1217_vm6, %v5888_v35, %v4359_v6  ;;  %v2212_v63 = vsel %vm1217_vm6, %v5885_v12, %v4358_v3  ;;  %v4425_v15 = vpack.i.bf16 %v6071_v13, %v6067_v2  ;;  %v2783_v26 = vrot.slane %v6071_v13, 1 }
 0x3bd   : > { %v2245_v42 = vsel %vm2220_vm10, %v2212_v63, %v4363_v21  ;;  %v2246_v33 = vsel %vm2220_vm10, %v2213_v11, %v4364_v24  ;;  %v2798_v35 = vsel %vm585_vm0, %v2782_v36, 0.0 }
 0x3be   : > { %4426 = vrot.lane.b32.xlu0 %v4425_v15, %s4564_s26  ;;  %v2265_v1 = vpack.c.bf16 %v2246_v33, %v2245_v42  ;;  %v2799_v12 = vsel %vm585_vm0, %v2783_v26, 0.0  ;;  %v4378_v26 = vunpack.i.l.bf16 %v4377_v61 }
 0x3bf   : > { %v4430_v46 = vpack.i.bf16 %v2799_v12, %v2798_v35  ;;  %v4379_v12 = vunpack.i.h.bf16 %v4377_v61 }
 0x3c0   : > { %3560 = vmatmul.msk.bf16.gmra.mxu3 %vm2299_vm11, %v2265_v1 }
 0x3c1   : > { %4431 = vrot.lane.b32.xlu2 %v4430_v46, %s6517_s17 }
 0x3c4   : > { %v2381_v56 = vpop.f32.mrf.mxu1 }
 0x3c5   : > { %v2382_v60 = vadd.f32 %v6017_v53, %v2381_v56 }
 0x3c7   : > { %v2449_v40 = vmax.f32 %v2382_v60, 0.0  ;;  %v2214_v60 = vsel %vm1217_vm6, %v5904_v19, %v4378_v26 }
 0x3cc   : > { %v2383_v32 = vpop.f32.mrf.mxu1 }
 0x3cd   : > { %v2384_v5 = vadd.f32 %v6017_v53, %v2383_v32 }
 0x3cf   : > { %v2450_v4 = vmax.f32 %v2384_v5, 0.0 }
 0x3d2   : > { %v4372_v45 = vpop.permute.xlu1 %4371 }
 0x3d3   : > { %v4374_v18 = vunpack.i.h.bf16 %v4372_v45  ;;  %v4373_v30 = vunpack.i.l.bf16 %v4372_v45 }
 0x3d4   : > { %v2386_v31 = vpop.f32.mrf.mxu1 }
 0x3d5   : > { %v2387_v23 = vadd.f32 %v6017_v53, %v2386_v31  ;;  %v2237_v62 = vsel %vm2220_vm10, %v2204_v14, %v4373_v30  ;;  %v2238_v38 = vsel %vm2220_vm10, %v2205_v55, %v4374_v18  ;;  %v2215_v30 = vsel %vm1217_vm6, %v5907_v49, %v4379_v12 }
 0x3d6   : > { %v2261_v25 = vpack.c.bf16 %v2238_v38, %v2237_v62 }
 0x3d7   : > { %v2451_v8 = vmax.f32 %v2387_v23, 0.0 }
 0x3d8   : > { %3556 = vmatmul.msk.bf16.gmra.mxu1 %vm2299_vm11, %v2261_v25 }
 0x3d9   : > { %v2477_v29 = vmax.f32 %v2449_v40, %v2451_v8 }
 0x3da   : > { %v4387_v48 = vpop.permute.xlu1 %4386 }
 0x3db   : > { %v2499_v17 = vrot.slane %v2477_v29, 1  ;;  %v4389_v50 = vunpack.i.h.bf16 %v4387_v48  ;;  %v4388_v41 = vunpack.i.l.bf16 %v4387_v48 }
 0x3dc   : > { %v4392_v28 = vpop.permute.xlu2 %4391  ;;  %v2388_v58 = vpop.f32.mrf.mxu1 }
 0x3dd   : > { %v2515_v51 = vmax.f32 %v2477_v29, %v2499_v17  ;;  %v2389_v52 = vadd.f32 %v6017_v53, %v2388_v58  ;;  %v4394_v16 = vunpack.i.h.bf16 %v4392_v28  ;;  %v4393_v57 = vunpack.i.l.bf16 %v4392_v28 }
 0x3de   : > { %v2207_v6 = vsel %vm1217_vm6, %v5924_v34, %v4389_v50  ;;  %v2206_v3 = vsel %vm1217_vm6, %v5921_v9, %v4388_v41 }
 0x3df   : > { %v2563_v54 = vrot.slane %v2515_v51, 1  ;;  %v2452_v22 = vmax.f32 %v2389_v52, 0.0  ;;  %v2579_v44 = vrot.slane %v2515_v51, 2  ;;  %v2239_v63 = vsel %vm2220_vm10, %v2206_v3, %v4393_v57 }
 0x3e0   : > { %v2240_v15 = vsel %vm2220_vm10, %v2207_v6, %v4394_v16  ;;  %v2595_v33 = vrot.slane %v2515_v51, 3 }
 0x3e1   : > { %v2478_v24 = vmax.f32 %v2450_v4, %v2452_v22  ;;  %v2683_v21 = vsel %vm483_vm1, %v2515_v51, %v2563_v54  ;;  %v2262_v1 = vpack.c.bf16 %v2240_v15, %v2239_v63 }
 0x3e2   : > { %v2691_v42 = vsel %vm1333_vm4, %v2683_v21, %v2579_v44 }
 0x3e3   : > { %v2531_v11 = vrot.slane %v2478_v24, 1  ;;  %v2700_v9 = vsel %vm2697_vm12, %v2691_v42, %v2595_v33 }
 0x3e4   : > { %v4407_v62 = vpop.permute.xlu2 %4406 }
 0x3e5   : > { %v2547_v36 = vmax.f32 %v2478_v24, %v2531_v11  ;;  %v4409_v38 = vunpack.i.h.bf16 %v4407_v62  ;;  %v4408_v25 = vunpack.i.l.bf16 %v4407_v62 }
 0x3e7   : > { %v2619_v35 = vrot.slane %v2547_v36, 4  ;;  %v2635_v34 = vrot.slane %v2547_v36, 5  ;;  %v2651_v56 = vrot.slane %v2547_v36, 6  ;;  %v2667_v37 = vrot.slane %v2547_v36, 7 }
 0x3e8   : > { %3557 = vmatmul.msk.bf16.gmra.mxu1 %vm2299_vm11, %v2262_v1  ;;  %v2209_v5 = vsel %vm1217_vm6, %v5970_v10, %v4409_v38  ;;  %v2208_v48 = vsel %vm1217_vm6, %v5967_v27, %v4408_v25 }
 0x3e9   : > { %v4382_v46 = vpop.permute.xlu0 %4381  ;;  %v2708_v32 = vsel %vm2348_vm9, %v2700_v9, %v2619_v35 }
 0x3ea   : > { %v4384_v39 = vunpack.i.h.bf16 %v4382_v46  ;;  %v4383_v0 = vunpack.i.l.bf16 %v4382_v46  ;;  %v2717_v45 = vsel %vm2714_vm13, %v2708_v32, %v2635_v34 }
 0x3eb   : > { %v2726_v18 = vsel %vm2723_vm14, %v2717_v45, %v2651_v56 }
 0x3ec   : > { %v6117_v55 = vsel %vm585_vm0, %v2726_v18, %v2667_v37  ;;  %v2247_v14 = vsel %vm2220_vm10, %v2214_v60, %v4383_v0  ;;  %v2248_v61 = vsel %vm2220_vm10, %v2215_v30, %v4384_v39  ;;  %v4422_v44 = vpop.permute.xlu2 %4421 }
 0x3ed   : > { %2810 = vrot.lane.b32.xlu1 %v6117_v55, %s4564_s26  ;;  %v2784_v31 = vrot.slane %v6117_v55, 1  ;;  %v2266_v23 = vpack.c.bf16 %v2248_v61, %v2247_v14  ;;  %v4424_v21 = vunpack.i.h.bf16 %v4422_v44  ;;  %v4423_v11 = vunpack.i.l.bf16 %v4422_v44 }
 0x3ef   : > { %v2800_v19 = vsel %vm585_vm0, %v2784_v31, 0.0  ;;  %3561 = vmatmul.msk.bf16.gmra.mxu3 %vm2299_vm11, %v2266_v23 }
 0x3f0   : > { %2842 = vrot.lane.b32.xlu0 %v2800_v19, %s6517_s17 }
 0x3f1   : > { %v4397_v49 = vpop.permute.xlu0 %4396 }
 0x3f2   : > { %v4399_v28 = vunpack.i.h.bf16 %v4397_v49  ;;  %v4398_v58 = vunpack.i.l.bf16 %v4397_v49 }
 0x3f4   : > { %v2216_v54 = vsel %vm1217_vm6, %v5949_v43, %v4398_v58  ;;  %v2217_v10 = vsel %vm1217_vm6, %v5952_v47, %v4399_v28 }
 0x3f6   : > { %v2391_v36 = vpop.f32.mrf.mxu1 }
 0x3f9   : > { %v4412_v40 = vpop.permute.xlu0 %4411 }
 0x3fa   : > { %v4414_v8 = vunpack.i.h.bf16 %v4412_v40  ;;  %v4413_v29 = vunpack.i.l.bf16 %v4412_v40 }
 0x3fc   : > { %v2241_v17 = vsel %vm2220_vm10, %v2208_v48, %v4413_v29  ;;  %v2242_v50 = vsel %vm2220_vm10, %v2209_v5, %v4414_v8 }
 0x3fd   : > { %v2263_v41 = vpack.c.bf16 %v2242_v50, %v2241_v17 }
 0x3fe   : > { %v2393_v42 = vpop.f32.mrf.mxu1 }
 0x3ff   : > { %3558 = vmatmul.msk.bf16.gmra.mxu1 %vm2299_vm11, %v2263_v41  ;;  %v2394_v32 = vadd.f32 %v6017_v53, %v2393_v42 }
 0x401   : > { %v2454_v45 = vmax.f32 %v2394_v32, 0.0 }
 0x40b   : > { %v4402_v51 = vpop.permute.xlu1 %4401 }
 0x40c   : > { %v4404_v52 = vunpack.i.h.bf16 %v4402_v51  ;;  %v4403_v4 = vunpack.i.l.bf16 %v4402_v51 }
 0x40e   : > { %v2249_v27 = vsel %vm2220_vm10, %v2216_v54, %v4403_v4  ;;  %v2250_v16 = vsel %vm2220_vm10, %v2217_v10, %v4404_v52 }
 0x40f   : > { %v2267_v57 = vpack.c.bf16 %v2250_v16, %v2249_v27 }
 0x411   : > { %3562 = vmatmul.msk.bf16.gmra.mxu3 %vm2299_vm11, %v2267_v57 }
 0x413   : > { %v4417_v22 = vpop.permute.xlu1 %4416 }
 0x414   : > { %v4419_v6 = vunpack.i.h.bf16 %v4417_v22  ;;  %v4418_v3 = vunpack.i.l.bf16 %v4417_v22 }
 0x416   : > { %v2218_v24 = vsel %vm1217_vm6, %v5988_v20, %v4418_v3  ;;  %v2219_v43 = vsel %vm1217_vm6, %v5991_v59, %v4419_v6  ;;  %v2392_v20 = vadd.f32 %v6017_v53, %v2391_v36 }
 0x417   : > { %v2251_v47 = vsel %vm2220_vm10, %v2218_v24, %v4423_v11  ;;  %v2252_v63 = vsel %vm2220_vm10, %v2219_v43, %v4424_v21 }
 0x418   : > { %v2268_v15 = vpack.c.bf16 %v2252_v63, %v2251_v47  ;;  %v2453_v12 = vmax.f32 %v2392_v20, 0.0 }
 0x421   : > { %3563 = vmatmul.msk.bf16.gmra.mxu3 %vm2299_vm11, %v2268_v15 }
 0x422   : > { %v2416_v26 = vpop.f32.mrf.mxu3 }
 0x42a   : > { %v6150_v9 = vpop.f32.mrf.mxu3 }
 0x434   : > { %v2396_v33 = vpop.f32.mrf.mxu1 }
 0x435   : > { %v2397_v35 = vadd.f32 %v6017_v53, %v2396_v33 }
 0x437   : > { %v2455_v34 = vmax.f32 %v2397_v35, 0.0 }
 0x439   : > { %v2479_v46 = vmax.f32 %v2453_v12, %v2455_v34 }
 0x43b   : > { %v2500_v39 = vrot.slane %v2479_v46, 1 }
 0x43c   : > { %v2398_v1 = vpop.f32.mrf.mxu1 }
 0x43d   : > { %v2399_v56 = vadd.f32 %v6017_v53, %v2398_v1  ;;  %v2516_v60 = vmax.f32 %v2479_v46, %v2500_v39 }
 0x43f   : > { %v2456_v0 = vmax.f32 %v2399_v56, 0.0  ;;  %v2564_v61 = vrot.slane %v2516_v60, 1  ;;  %v2580_v49 = vrot.slane %v2516_v60, 2  ;;  %v2596_v50 = vrot.slane %v2516_v60, 3 }
 0x441   : > { %v2480_v18 = vmax.f32 %v2454_v45, %v2456_v0  ;;  %v2684_v25 = vsel %vm483_vm1, %v2516_v60, %v2564_v61 }
 0x442   : > { %v2692_v5 = vsel %vm1333_vm4, %v2684_v25, %v2580_v49 }
 0x443   : > { %v2421_v30 = vpop.f32.mrf.mxu3  ;;  %v2532_v31 = vrot.slane %v2480_v18, 1  ;;  %v2701_v52 = vsel %vm2697_vm12, %v2692_v5, %v2596_v50 }
 0x444   : > { %v2422_v57 = vadd.f32 %v6017_v53, %v2421_v30  ;;  %v4427_v30 = vpop.permute.xlu0 %4426 }
 0x445   : > { %v2548_v40 = vmax.f32 %v2480_v18, %v2532_v31  ;;  %v2758_v18 = vrot.slane %v6067_v2, 7 }
 0x446   : > { %v2465_v47 = vmax.f32 %v2422_v57, 0.0 }
 0x447   : > { %v2620_v41 = vrot.slane %v2548_v40, 4  ;;  %v2636_v4 = vrot.slane %v2548_v40, 5  ;;  %v2652_v11 = vrot.slane %v2548_v40, 6  ;;  %v2668_v34 = vrot.slane %v2548_v40, 7 }
 0x449   : > { %v2709_v16 = vsel %vm2348_vm9, %v2701_v52, %v2620_v41  ;;  %v4432_v41 = vpop.permute.xlu2 %4431 }
 0x44a   : > { %v2718_v21 = vsel %vm2714_vm13, %v2709_v16, %v2636_v4  ;;  %v2419_v4 = vadd.f32 %v6017_v53, %v6150_v9 }
 0x44b   : > { %v2423_v29 = vpop.f32.mrf.mxu3  ;;  %v2727_v33 = vsel %vm2723_vm14, %v2718_v21, %v2652_v11  ;;  %v4434_v21 = vunpack.i.h.bf16 %v4432_v41 }
 0x44c   : > { %v2424_v12 = vadd.f32 %v6017_v53, %v2423_v29  ;;  %v6173_v0 = vsel %vm585_vm0, %v2727_v33, %v2668_v34 }
 0x44e   : > { %v2466_v25 = vmax.f32 %v2424_v12, 0.0 }
 0x455   : > { %v2401_v59 = vpop.f32.mrf.mxu1 }
 0x456   : > { %v2402_v14 = vadd.f32 %v6017_v53, %v2401_v59  ;;  %v2417_v59 = vadd.f32 %v6017_v53, %v2416_v26 }
 0x458   : > { %v2457_v62 = vmax.f32 %v2402_v14, 0.0 }
 0x45d   : > { %v2403_v37 = vpop.f32.mrf.mxu1 }
 0x45e   : > { %v2404_v48 = vadd.f32 %v6017_v53, %v2403_v37 }
 0x460   : > { %v2458_v54 = vmax.f32 %v2404_v48, 0.0 }
 0x465   : > { %v2406_v23 = vpop.f32.mrf.mxu1 }
 0x466   : > { %v2407_v19 = vadd.f32 %v6017_v53, %v2406_v23  ;;  %v2759_v23 = vrot.slane %v6071_v13, 7 }
 0x468   : > { %v2459_v38 = vmax.f32 %v2407_v19, 0.0  ;;  %v2775_v16 = vsel %vm483_vm1, 0.0, %v2759_v23 }
 0x46a   : > { %v2481_v8 = vmax.f32 %v2457_v62, %v2459_v38  ;;  %v2785_v62 = vrot.slane %v6173_v0, 1  ;;  %v2463_v38 = vmax.f32 %v2417_v59, 0.0 }
 0x46c   : > { %v2501_v17 = vrot.slane %v2481_v8, 1 }
 0x46d   : > { %v2408_v28 = vpop.f32.mrf.mxu1 }
 0x46e   : > { %v2517_v58 = vmax.f32 %v2481_v8, %v2501_v17  ;;  %v2409_v51 = vadd.f32 %v6017_v53, %v2408_v28  ;;  %v4428_v8 = vunpack.i.l.bf16 %v4427_v30  ;;  %v4429_v17 = vunpack.i.h.bf16 %v4427_v30 }
 0x470   : > { %v2565_v10 = vrot.slane %v2517_v58, 1  ;;  %v2460_v27 = vmax.f32 %v2409_v51, 0.0  ;;  %v2581_v22 = vrot.slane %v2517_v58, 2  ;;  %v2597_v42 = vrot.slane %v2517_v58, 3 }
 0x471   : > { %v2801_v51 = vsel %vm585_vm0, %v2785_v62, 0.0 }
 0x472   : > { %v2482_v6 = vmax.f32 %v2458_v54, %v2460_v27  ;;  %v2685_v3 = vsel %vm483_vm1, %v2517_v58, %v2565_v10  ;;  %v2426_v44 = vpop.f32.mrf.mxu3  ;;  %v2774_v54 = vsel %vm483_vm1, 0.0, %v2758_v18 }
 0x473   : > { %v2427_v43 = vadd.f32 %v6017_v53, %v2426_v44  ;;  %v2693_v63 = vsel %vm1333_vm4, %v2685_v3, %v2581_v22  ;;  %v2862_v57 = vsel %vm923_vm3, %v2774_v54, %v4428_v8  ;;  %v2863_v3 = vsel %vm923_vm3, %v2775_v16, %v4429_v17 }
 0x474   : > { %v2533_v24 = vrot.slane %v2482_v6, 1  ;;  %v2702_v46 = vsel %vm2697_vm12, %v2693_v63, %v2597_v42  ;;  %v2464_v63 = vmax.f32 %v2419_v4, 0.0 }
 0x475   : > { %v2467_v36 = vmax.f32 %v2427_v43, 0.0 }
 0x476   : > { %v2549_v15 = vmax.f32 %v2482_v6, %v2533_v24  ;;  %v4433_v6 = vunpack.i.l.bf16 %v4432_v41 }
 0x477   : > { %v2485_v20 = vmax.f32 %v2465_v47, %v2467_v36 }
 0x478   : > { %v2621_v1 = vrot.slane %v2549_v15, 4  ;;  %v2637_v35 = vrot.slane %v2549_v15, 5  ;;  %v2653_v32 = vrot.slane %v2549_v15, 6  ;;  %v2669_v45 = vrot.slane %v2549_v15, 7 }
 0x479   : > { %v2503_v56 = vrot.slane %v2485_v20, 1  ;;  %v6202_v42 = vsel %vm1927_vm8, %v2862_v57, %v4433_v6 }
 0x47a   : > { %v2710_v39 = vsel %vm2348_vm9, %v2702_v46, %v2621_v1  ;;  %v2428_v37 = vpop.f32.mrf.mxu3 }
 0x47b   : > { %v2719_v60 = vsel %vm2714_vm13, %v2710_v39, %v2637_v35  ;;  %v2519_v14 = vmax.f32 %v2485_v20, %v2503_v56  ;;  %v2429_v26 = vadd.f32 %v6017_v53, %v2428_v37  ;;  %v6205_v35 = vsel %vm1927_vm8, %v2863_v3, %v4434_v21 }
 0x47c   : > { %v2411_v61 = vpop.f32.mrf.mxu1  ;;  %v2728_v31 = vsel %vm2723_vm14, %v2719_v60, %v2653_v32  ;;  %v4455_v56 = vpack.i.bf16 %v6205_v35, %v6202_v42 }
 0x47d   : > { %v2412_v19 = vadd.f32 %v6017_v53, %v2411_v61  ;;  %v6182_v49 = vsel %vm585_vm0, %v2728_v31, %v2669_v45  ;;  %v2567_v40 = vrot.slane %v2519_v14, 1  ;;  %v2468_v2 = vmax.f32 %v2429_v26, 0.0 }
 0x47e   : > { %v4435_v5 = vpack.i.bf16 %v6182_v49, %v6173_v0  ;;  %v2786_v48 = vrot.slane %v6182_v49, 1  ;;  %v2583_v13 = vrot.slane %v2519_v14, 2  ;;  %v2599_v9 = vrot.slane %v2519_v14, 3 }
 0x47f   : > { %v2461_v29 = vmax.f32 %v2412_v19, 0.0  ;;  %v2486_v50 = vmax.f32 %v2466_v25, %v2468_v2  ;;  %v2687_v28 = vsel %vm483_vm1, %v2519_v14, %v2567_v40 }
 0x480   : > { %4436 = vrot.lane.b32.xlu1 %v4435_v5, %s4564_s26  ;;  %v2802_v52 = vsel %vm585_vm0, %v2786_v48, 0.0  ;;  %v2695_v44 = vsel %vm1333_vm4, %v2687_v28, %v2583_v13  ;;  %v2811_v13 = vpop.permute.xlu1 %2810 }
 0x481   : > { %v2483_v58 = vmax.f32 %v2461_v29, %v2463_v38  ;;  %v2535_v10 = vrot.slane %v2486_v50, 1  ;;  %v4440_v27 = vpack.i.bf16 %v2802_v52, %v2801_v51  ;;  %v2704_v20 = vsel %vm2697_vm12, %v2695_v44, %v2599_v9 }
 0x482   : > { %v2760_v29 = vrot.slane %v6117_v55, 7 }
 0x483   : > { %v2502_v22 = vrot.slane %v2483_v58, 1  ;;  %v2551_v24 = vmax.f32 %v2486_v50, %v2535_v10  ;;  %4441 = vrot.lane.b32.xlu2 %v4440_v27, %s6517_s17  ;;  %v2843_v50 = vpop.permute.xlu0 %2842 }
 0x484   : > { %v2413_v43 = vpop.f32.mrf.mxu1 }
 0x485   : > { %v2518_v11 = vmax.f32 %v2483_v58, %v2502_v22  ;;  %v2414_v47 = vadd.f32 %v6017_v53, %v2413_v43  ;;  %v2623_v15 = vrot.slane %v2551_v24, 4  ;;  %v2639_v36 = vrot.slane %v2551_v24, 5 }
 0x486   : > { %v2655_v37 = vrot.slane %v2551_v24, 6  ;;  %v2671_v14 = vrot.slane %v2551_v24, 7  ;;  %v2776_v58 = vsel %vm483_vm1, 0.0, %v2760_v29 }
 0x487   : > { %v2566_v33 = vrot.slane %v2518_v11, 1  ;;  %v2462_v1 = vmax.f32 %v2414_v47, 0.0  ;;  %v2712_v34 = vsel %vm2348_vm9, %v2704_v20, %v2623_v15  ;;  %v2582_v59 = vrot.slane %v2518_v11, 2 }
 0x488   : > { %v2721_v32 = vsel %vm2714_vm13, %v2712_v34, %v2639_v36  ;;  %v2598_v30 = vrot.slane %v2518_v11, 3  ;;  %v2864_v55 = vsel %vm923_vm3, %v2776_v58, %v2811_v13 }
 0x489   : > { %v2484_v12 = vmax.f32 %v2462_v1, %v2464_v63  ;;  %v2686_v46 = vsel %vm483_vm1, %v2518_v11, %v2566_v33  ;;  %v2730_v18 = vsel %vm2723_vm14, %v2721_v32, %v2655_v37  ;;  %v6237_v52 = vsel %vm1927_vm8, %v2864_v55, %v2843_v50 }
 0x48a   : > { %v2694_v45 = vsel %vm1333_vm4, %v2686_v46, %v2582_v59  ;;  %v6218_v23 = vsel %vm585_vm0, %v2730_v18, %v2671_v14  ;;  %v4460_v54 = vpack.i.bf16 %v6237_v52, %v6205_v35 }
 0x48b   : > { %v2534_v39 = vrot.slane %v2484_v12, 1  ;;  %4456 = vrot.lane.b32.xlu2 %v4455_v56, %s6519_s28  ;;  %v2703_v31 = vsel %vm2697_vm12, %v2694_v45, %v2598_v30  ;;  %v2788_v8 = vrot.slane %v6218_v23, 1  ;;  %v2748_v30 = vld [vmem:[%s6509_s5 + $0x20] sm:$0xf]  ;;  %s6529_s28 = smov 24  }
 0x48c   : > { %v2976_v14 = vunpack.c.l.b16 %v2748_v30 }
 0x48d   : > { %v2550_v60 = vmax.f32 %v2484_v12, %v2534_v39  ;;  %v2804_v28 = vsel %vm585_vm0, %v2788_v8, 0.0 }
 0x48f   : > { %v2622_v26 = vrot.slane %v2550_v60, 4  ;;  %v2638_v61 = vrot.slane %v2550_v60, 5  ;;  %v2654_v19 = vrot.slane %v2550_v60, 6  ;;  %v2670_v38 = vrot.slane %v2550_v60, 7 }
 0x491   : > { %v2711_v62 = vsel %vm2348_vm9, %v2703_v31, %v2622_v26  ;;  %v2981_v26 = vpack.c.b16 %v2976_v14, %v2976_v14  ;;  %v3694_v31 = vld [vmem:[%s6509_s5 + $0x18] sm:$0xff] }
 0x492   : > { %v2720_v25 = vsel %vm2714_vm13, %v2711_v62, %v2638_v61  ;;  %v3692_v62 = vld [vmem:[%s6509_s5 + $0x8] sm:$0xff] }
 0x493   : > { %v2729_v2 = vsel %vm2723_vm14, %v2720_v25, %v2654_v19  ;;  %v2999_v61 = vsel %vm2348_vm9, %v2981_v26, 0  ;;  %v3693_v19 = vld [vmem:[%s6509_s5 + $0x10] sm:$0xff]  ;;  %v2761_v25 = vrot.slane %v6173_v0, 7 }
 0x494   : > { %v2431_v40 = vpop.f32.mrf.mxu3  ;;  %v6226_v5 = vsel %vm585_vm0, %v2729_v2, %v2670_v38  ;;  %3004 = vmatpush.bf16.msrb.mxu2 %v2999_v61  ;;  %v2762_v38 = vrot.slane %v6182_v49, 7 }
 0x495   : > { %v4445_v48 = vpack.i.bf16 %v6218_v23, %v6226_v5  ;;  %v2787_v17 = vrot.slane %v6226_v5, 1  ;;  %v2432_v10 = vadd.f32 %v6017_v53, %v2431_v40  ;;  %v2777_v50 = vsel %vm483_vm1, 0.0, %v2761_v25 }
 0x497   : > { %4446 = vrot.lane.b32.xlu0 %v4445_v48, %s4564_s26  ;;  %v2803_v41 = vsel %vm585_vm0, %v2787_v17, 0.0  ;;  %v2469_v57 = vmax.f32 %v2432_v10, 0.0  ;;  %v3691_v48 = vld [vmem:[%s6509_s5] sm:$0xff] }
 0x498   : > { %v4450_v51 = vpack.i.bf16 %v2804_v28, %v2803_v41  ;;  %3005 = vmatpush.bf16.msrb.mxu2 %v3694_v31  ;;  %v2778_v41 = vsel %vm483_vm1, 0.0, %v2762_v38 }
 0x49a   : > { %4451 = vrot.lane.b32.xlu1 %v4450_v51, %s6517_s17 }
 0x49c   : > { %v2433_v4 = vpop.f32.mrf.mxu3  ;;  %3006 = vmatpush.bf16.msrb.mxu2 %v3693_v19 }
 0x49d   : > { %v2434_v3 = vadd.f32 %v6017_v53, %v2433_v4  ;;  %v2764_v4 = vrot.slane %v6218_v23, 7 }
 0x49f   : > { %4461 = vrot.lane.b32.xlu0 %v4460_v54, %s4569_s29  ;;  %v2470_v9 = vmax.f32 %v2434_v3, 0.0  ;;  %v2763_v54 = vrot.slane %v6226_v5, 7  ;;  %v2780_v3 = vsel %vm483_vm1, 0.0, %v2764_v4 }
 0x4a0   : > { %3007 = vmatpush.bf16.msrb.mxu2 %v3692_v62 }
 0x4a4   : > { %v2436_v27 = vpop.f32.mrf.mxu3  ;;  %3008 = vmatpush.bf16.msrb.mxu2 %v3691_v48 }
 0x4a5   : > { %v2437_v16 = vadd.f32 %v6017_v53, %v2436_v27 }
 0x4a7   : > { %v2471_v22 = vmax.f32 %v2437_v16, 0.0 }
 0x4a9   : > { %v2487_v6 = vmax.f32 %v2469_v57, %v2471_v22 }
 0x4ab   : > { %v2504_v44 = vrot.slane %v2487_v6, 1 }
 0x4ac   : > { %v2438_v24 = vpop.f32.mrf.mxu3 }
 0x4ad   : > { %v2520_v43 = vmax.f32 %v2487_v6, %v2504_v44  ;;  %v2439_v21 = vadd.f32 %v6017_v53, %v2438_v24  ;;  %v2779_v6 = vsel %vm483_vm1, 0.0, %v2763_v54 }
 0x4af   : > { %v2568_v11 = vrot.slane %v2520_v43, 1  ;;  %v2472_v47 = vmax.f32 %v2439_v21, 0.0  ;;  %v2584_v63 = vrot.slane %v2520_v43, 2  ;;  %v2600_v34 = vrot.slane %v2520_v43, 3 }
 0x4b1   : > { %v2488_v15 = vmax.f32 %v2470_v9, %v2472_v47  ;;  %v2688_v36 = vsel %vm483_vm1, %v2520_v43, %v2568_v11 }
 0x4b2   : > { %v2696_v20 = vsel %vm1333_vm4, %v2688_v36, %v2584_v63 }
 0x4b3   : > { %v2536_v33 = vrot.slane %v2488_v15, 1  ;;  %v2705_v46 = vsel %vm2697_vm12, %v2696_v20, %v2600_v34 }
 0x4b5   : > { %v2552_v1 = vmax.f32 %v2488_v15, %v2536_v33 }
 0x4b7   : > { %v2624_v59 = vrot.slane %v2552_v1, 4  ;;  %v2640_v12 = vrot.slane %v2552_v1, 5  ;;  %v2656_v56 = vrot.slane %v2552_v1, 6  ;;  %v2672_v53 = vrot.slane %v2552_v1, 7 }
 0x4b9   : > { %v2713_v32 = vsel %vm2348_vm9, %v2705_v46, %v2624_v59 }
 0x4ba   : > { %v2722_v39 = vsel %vm2714_vm13, %v2713_v32, %v2640_v12 }
 0x4bb   : > { %v2731_v37 = vsel %vm2723_vm14, %v2722_v39, %v2656_v56 }
 0x4bc   : > { %v6254_v45 = vsel %vm585_vm0, %v2731_v37, %v2672_v53 }
 0x4bd   : > { %2820 = vrot.lane.b32.xlu1 %v6254_v45, %s4564_s26  ;;  %v2789_v60 = vrot.slane %v6254_v45, 1  ;;  %v2765_v46 = vrot.slane %v6254_v45, 7  ;;  %s6530_s26 = smov 16  }
 0x4bf   : > { %v2805_v18 = vsel %vm585_vm0, %v2789_v60, 0.0  ;;  %v2781_v56 = vsel %vm483_vm1, 0.0, %v2765_v46  ;;  %vm3171_vm0 = vcmask 523264  }
 0x4c0   : > { %2852 = vrot.lane.b32.xlu2 %v2805_v18, %s6517_s17 }
 0x4dd   : > { %v4442_v40 = vpop.permute.xlu2 %4441 }
 0x4de   : > { %v4444_v17 = vunpack.i.h.bf16 %v4442_v40  ;;  %v4443_v13 = vunpack.i.l.bf16 %v4442_v40 }
 0x4e5   : > { %v4457_v57 = vpop.permute.xlu2 %4456 }
 0x4e6   : > { %v4459_v9 = vunpack.i.h.bf16 %v4457_v57  ;;  %v4458_v11 = vunpack.i.l.bf16 %v4457_v57 }
 0x4e8   : > { %v2937_v1 = vsel %vm1217_vm6, %v6202_v42, %v4459_v9  ;;  %v2936_v20 = vsel %vm1217_vm6, %v5590_v7, %v4458_v11 }
 0x4f2   : > { %v4437_v2 = vpop.permute.xlu1 %4436 }
 0x4f3   : > { %v4439_v8 = vunpack.i.h.bf16 %v4437_v2  ;;  %v4438_v29 = vunpack.i.l.bf16 %v4437_v2 }
 0x4f5   : > { %v2866_v28 = vsel %vm923_vm3, %v2778_v41, %v4439_v8  ;;  %v2865_v49 = vsel %vm923_vm3, %v2777_v50, %v4438_v29 }
 0x4f6   : > { %v6284_v0 = vsel %vm1927_vm8, %v2865_v49, %v4443_v13  ;;  %v6287_v58 = vsel %vm1927_vm8, %v2866_v28, %v4444_v17 }
 0x4f7   : > { %v4470_v51 = vpack.i.bf16 %v6287_v58, %v6284_v0  ;;  %v4465_v55 = vpack.i.bf16 %v6284_v0, %v6237_v52 }
 0x4f9   : > { %4471 = vrot.lane.b32.xlu1 %v4470_v51, %s4569_s29  ;;  %4466 = vrot.lane.b32.xlu0 %v4465_v55, %s6529_s28 }
 0x509   : > { %v4447_v10 = vpop.permute.xlu0 %4446 }
 0x50a   : > { %v4449_v27 = vunpack.i.h.bf16 %v4447_v10  ;;  %v4448_v16 = vunpack.i.l.bf16 %v4447_v10 }
 0x50c   : > { %v4452_v22 = vpop.permute.xlu1 %4451  ;;  %v2868_v43 = vsel %vm923_vm3, %v2780_v3, %v4449_v27  ;;  %v2867_v21 = vsel %vm923_vm3, %v2779_v6, %v4448_v16  ;;  %v4497_v6 = vld [vmem:[%s6510_s6] ss:$0 sm:$0xff] }
 0x50d   : > { %v4454_v44 = vunpack.i.h.bf16 %v4452_v22  ;;  %v4453_v24 = vunpack.i.l.bf16 %v4452_v22 }
 0x50f   : > { %v2876_v23 = vsel %vm1927_vm8, %v2867_v21, %v4453_v24  ;;  %v2877_v5 = vsel %vm1927_vm8, %v2868_v43, %v4454_v44 }
 0x510   : > { %v4480_v47 = vpack.i.bf16 %v2877_v5, %v2876_v23  ;;  %v4475_v63 = vpack.i.bf16 %v2876_v23, %v6287_v58 }
 0x511   : > { %v4462_v15 = vpop.permute.xlu0 %4461 }
 0x512   : > { %v4464_v36 = vunpack.i.h.bf16 %v4462_v15  ;;  %v4463_v33 = vunpack.i.l.bf16 %v4462_v15  ;;  %4481 = vrot.lane.b32.xlu0 %v4480_v47, %s4569_s29  ;;  %4476 = vrot.lane.b32.xlu2 %v4475_v63, %s6529_s28 }
 0x514   : > { %v2944_v34 = vsel %vm2220_vm10, %v2936_v20, %v4463_v33  ;;  %v2945_v59 = vsel %vm2220_vm10, %v2937_v1, %v4464_v36 }
 0x515   : > { %v2952_v12 = vpack.c.bf16 %v2945_v59, %v2944_v34 }
 0x517   : > { %3580 = vmatmul.msk.bf16.vlgmr.msrb.gmra.mxu2 %vm2299_vm11, %v2952_v12 }
 0x51a   : > { %v2853_v53 = vpop.permute.xlu2 %2852 }
 0x52f   : > { %v2821_v32 = vpop.permute.xlu1 %2820 }
 0x530   : > { %v2869_v39 = vsel %vm923_vm3, %v2781_v56, %v2821_v32 }
 0x531   : > { %v2878_v42 = vsel %vm1927_vm8, %v2869_v39, %v2853_v53 }
 0x532   : > { %v4490_v37 = vpack.i.bf16 %v5590_v7, %v2878_v42  ;;  %v4485_v60 = vpack.i.bf16 %v2878_v42, %v2877_v5 }
 0x534   : > { %4491 = vrot.lane.b32.xlu2 %v4490_v37, %s4569_s29  ;;  %4486 = vrot.lane.b32.xlu1 %v4485_v60, %s6529_s28 }
 0x56b   : > { %v4472_v18 = vpop.permute.xlu1 %4471  ;;  %v4467_v30 = vpop.permute.xlu0 %4466 }
 0x56c   : > { %v4474_v14 = vunpack.i.h.bf16 %v4472_v18  ;;  %v4473_v26 = vunpack.i.l.bf16 %v4472_v18  ;;  %v4469_v45 = vunpack.i.h.bf16 %v4467_v30  ;;  %v4468_v61 = vunpack.i.l.bf16 %v4467_v30  ;;  %v4477_v25 = vpop.permute.xlu2 %4476 }
 0x56d   : > { %v4479_v40 = vunpack.i.h.bf16 %v4477_v25  ;;  %v4478_v2 = vunpack.i.l.bf16 %v4477_v25 }
 0x56e   : > { %v2939_v31 = vsel %vm1217_vm6, %v6237_v52, %v4469_v45  ;;  %v2938_v19 = vsel %vm1217_vm6, %v6205_v35, %v4468_v61 }
 0x56f   : > { %v2946_v62 = vsel %vm2220_vm10, %v2938_v19, %v4473_v26  ;;  %v2947_v7 = vsel %vm2220_vm10, %v2939_v31, %v4474_v14  ;;  %v2941_v17 = vsel %vm1217_vm6, %v6287_v58, %v4479_v40  ;;  %v2940_v52 = vsel %vm1217_vm6, %v6284_v0, %v4478_v2 }
 0x570   : > { %v2953_v38 = vpack.c.bf16 %v2947_v7, %v2946_v62 }
 0x572   : > { %3581 = vmatmul.msk.bf16.gmra.mxu2 %vm2299_vm11, %v2953_v38 }
 0x584   : > { %v4482_v8 = vpop.permute.xlu0 %4481 }
 0x585   : > { %v4484_v29 = vunpack.i.h.bf16 %v4482_v8  ;;  %v4483_v48 = vunpack.i.l.bf16 %v4482_v8 }
 0x587   : > { %v2948_v35 = vsel %vm2220_vm10, %v2940_v52, %v4483_v48  ;;  %v2949_v13 = vsel %vm2220_vm10, %v2941_v17, %v4484_v29 }
 0x588   : > { %v2954_v50 = vpack.c.bf16 %v2949_v13, %v2948_v35 }
 0x58a   : > { %3582 = vmatmul.msk.bf16.gmra.mxu2 %vm2299_vm11, %v2954_v50 }
 0x58e   : > { %v4492_v41 = vpop.permute.xlu2 %4491 }
 0x58f   : > { %v4494_v55 = vunpack.i.h.bf16 %v4492_v41  ;;  %v4493_v4 = vunpack.i.l.bf16 %v4492_v41 }
 0x59a   : > { %v3010_v16 = vpop.f32.mrf.mxu2 }
 0x59b   : > { %v3011_v32 = vadd.f32 %v4497_v6, %v3010_v16 }
 0x59d   : > { %v3030_v39 = vmax.f32 %v3011_v32, 0.0  ;;  %v3697_v32 = vld [vmem:[%s6511_s7 + $0x10] sm:$0xff] }
 0x5a2   : > { %v3012_v57 = vpop.f32.mrf.mxu2 }
 0x5a3   : > { %v3013_v46 = vadd.f32 %v4497_v6, %v3012_v57 }
 0x5a5   : > { %v3031_v53 = vmax.f32 %v3013_v46, 0.0 }
 0x5a6   : > { %v4487_v28 = vpop.permute.xlu1 %4486 }
 0x5a7   : > { %v4489_v49 = vunpack.i.h.bf16 %v4487_v28  ;;  %v4488_v51 = vunpack.i.l.bf16 %v4487_v28  ;;  %v3038_v42 = vmax.f32 %v3030_v39, %v3031_v53  ;;  %v3696_v39 = vld [vmem:[%s6511_s7 + $0x8] sm:$0xff] }
 0x5a9   : > { %v2943_v54 = vsel %vm1217_vm6, %v2877_v5, %v4489_v49  ;;  %v2942_v58 = vsel %vm1217_vm6, %v2876_v23, %v4488_v51  ;;  %v3046_v26 = vrot.slane %v3038_v42, 1 }
 0x5aa   : > { %v2950_v10 = vsel %vm2220_vm10, %v2942_v58, %v4493_v4  ;;  %v2951_v0 = vsel %vm2220_vm10, %v2943_v54, %v4494_v55 }
 0x5ab   : > { %v2955_v27 = vpack.c.bf16 %v2951_v0, %v2950_v10  ;;  %v3054_v7 = vmax.f32 %v3038_v42, %v3046_v26  ;;  %v3695_v42 = vld [vmem:[%s6511_s7] sm:$0xff]  ;;  %v3706_v26 = vld [vmem:[%s6511_s7 + $0x58] sm:$0xff] }
 0x5ad   : > { %3583 = vmatmul.msk.bf16.gmra.mxu2 %vm2299_vm11, %v2955_v27  ;;  %v3062_v2 = vrot.slane %v3054_v7, 1  ;;  %v3070_v35 = vrot.slane %v3054_v7, 2  ;;  %v3078_v54 = vrot.slane %v3054_v7, 3 }
 0x5af   : > { %v3086_v50 = vsel %vm483_vm1, %v3054_v7, %v3062_v2  ;;  %v3704_v7 = vld [vmem:[%s6511_s7 + $0x48] sm:$0xff] }
 0x5b0   : > { %v3090_v4 = vsel %vm1333_vm4, %v3086_v50, %v3070_v35 }
 0x5b1   : > { %v3094_v10 = vsel %vm2697_vm12, %v3090_v4, %v3078_v54 }
 0x5b2   : > { %v3134_v16 = vrot.slane %v3094_v10, 3  ;;  %v3118_v57 = vrot.slane %v3094_v10, 2 }
 0x5f5   : > { %v3015_v22 = vpop.f32.mrf.mxu2 }
 0x5f6   : > { %v3016_v3 = vadd.f32 %v4497_v6, %v3015_v22  ;;  %v3102_v22 = vrot.slane %v3094_v10, 1 }
 0x5f8   : > { %v3032_v43 = vmax.f32 %v3016_v3, 0.0 }
 0x5fd   : > { %v3017_v44 = vpop.f32.mrf.mxu2 }
 0x5fe   : > { %v3018_v24 = vadd.f32 %v4497_v6, %v3017_v44 }
 0x600   : > { %v3033_v21 = vmax.f32 %v3018_v24, 0.0 }
 0x602   : > { %v3039_v9 = vmax.f32 %v3032_v43, %v3033_v21 }
 0x604   : > { %v3047_v11 = vrot.slane %v3039_v9, 1 }
 0x606   : > { %v3055_v23 = vmax.f32 %v3039_v9, %v3047_v11 }
 0x608   : > { %v3063_v5 = vrot.slane %v3055_v23, 1  ;;  %v3071_v47 = vrot.slane %v3055_v23, 2  ;;  %v3079_v63 = vrot.slane %v3055_v23, 3 }
 0x60a   : > { %v3087_v15 = vsel %vm483_vm1, %v3055_v23, %v3063_v5 }
 0x60b   : > { %v3091_v36 = vsel %vm1333_vm4, %v3087_v15, %v3071_v47  ;;  %v3702_v15 = vld [vmem:[%s6511_s7 + $0x38] sm:$0xff] }
 0x60c   : > { %v6345_v33 = vsel %vm2697_vm12, %v3091_v36, %v3079_v63  ;;  %3305 = vmatpush.bf16.msrb.mxu3 %v3702_v15  ;;  %v3701_v36 = vld [vmem:[%s6511_s7 + $0x30] sm:$0xff] }
 0x60d   : > { %v3135_v1 = vrot.slane %v6345_v33, 3  ;;  %v3119_v20 = vrot.slane %v6345_v33, 2  ;;  %v3103_v34 = vrot.slane %v6345_v33, 1  ;;  %v3020_v59 = vpop.f32.mrf.mxu2 }
 0x60e   : > { %v3021_v30 = vadd.f32 %v4497_v6, %v3020_v59 }
 0x60f   : > { %3140 = vrot.lane.b32.xlu2 %v3135_v1, %s4569_s29  ;;  %3124 = vrot.lane.b32.xlu1 %v3119_v20, %s4570_s16  ;;  %v3699_v1 = vld [vmem:[%s6511_s7 + $0x20] sm:$0xff]  ;;  %v3698_v20 = vld [vmem:[%s6511_s7 + $0x18] sm:$0xff] }
 0x610   : > { %3108 = vrot.lane.b32.xlu0 %v3103_v34, %s6530_s26  ;;  %v3034_v19 = vmax.f32 %v3021_v30, 0.0  ;;  %3306 = vmatpush.bf16.msrb.mxu3 %v3701_v36  ;;  %v3707_v30 = vld [vmem:[%s6511_s7 + $0x60] sm:$0xff] }
 0x615   : > { %v3022_v12 = vpop.f32.mrf.mxu2 }
 0x616   : > { %v3023_v37 = vadd.f32 %v4497_v6, %v3022_v12 }
 0x618   : > { %v3035_v45 = vmax.f32 %v3023_v37, 0.0  ;;  %v3710_v37 = vld [vmem:[%s6511_s7 + $0x78] sm:$0xff] }
 0x61a   : > { %v3040_v38 = vmax.f32 %v3034_v19, %v3035_v45 }
 0x61c   : > { %v3048_v8 = vrot.slane %v3040_v38, 1 }
 0x61e   : > { %v3056_v41 = vmax.f32 %v3040_v38, %v3048_v8  ;;  %v3703_v8 = vld [vmem:[%s6511_s7 + $0x40] sm:$0xff] }
 0x620   : > { %v3064_v58 = vrot.slane %v3056_v41, 1  ;;  %v3072_v0 = vrot.slane %v3056_v41, 2  ;;  %v3080_v3 = vrot.slane %v3056_v41, 3 }
 0x622   : > { %v3088_v27 = vsel %vm483_vm1, %v3056_v41, %v3064_v58  ;;  %v3711_v58 = vld [vmem:[%s6513_s9] sm:$0xff] }
 0x630   : > { %v3025_v56 = vpop.f32.mrf.mxu2 }
 0x631   : > { %v3026_v60 = vadd.f32 %v4497_v6, %v3025_v56 }
 0x633   : > { %v3036_v61 = vmax.f32 %v3026_v60, 0.0  ;;  %v3709_v60 = vld [vmem:[%s6511_s7 + $0x70] sm:$0xff] }
 0x638   : > { %v3027_v18 = vpop.f32.mrf.mxu2 }
 0x639   : > { %v3028_v14 = vadd.f32 %v4497_v6, %v3027_v18  ;;  %v3092_v6 = vsel %vm1333_vm4, %v3088_v27, %v3072_v0  ;;  %v3708_v18 = vld [vmem:[%s6511_s7 + $0x68] sm:$0xff]  ;;  %v3717_v0 = vld [vmem:[%s6515_s11 + $0x10] sm:$0xff] }
 0x63a   : > { %v6368_v44 = vsel %vm2697_vm12, %v3092_v6, %v3080_v3  ;;  %v3716_v27 = vld [vmem:[%s6515_s11 + $0x8] sm:$0xff] }
 0x63b   : > { %v3037_v31 = vmax.f32 %v3028_v14, 0.0  ;;  %v3120_v24 = vrot.slane %v6368_v44, 2  ;;  %v3104_v43 = vrot.slane %v6368_v44, 1  ;;  %v3136_v63 = vrot.slane %v6368_v44, 3 }
 0x63d   : > { %v3041_v62 = vmax.f32 %v3036_v61, %v3037_v31  ;;  %v3705_v31 = vld [vmem:[%s6511_s7 + $0x50] sm:$0xff] }
 0x63f   : > { %v3049_v25 = vrot.slane %v3041_v62, 1 }
 0x641   : > { %v3057_v40 = vmax.f32 %v3041_v62, %v3049_v25 }
 0x643   : > { %v3065_v29 = vrot.slane %v3057_v40, 1  ;;  %v3073_v48 = vrot.slane %v3057_v40, 2  ;;  %v3081_v17 = vrot.slane %v3057_v40, 3 }
 0x645   : > { %v3089_v52 = vsel %vm483_vm1, %v3057_v40, %v3065_v29  ;;  %vm3432_vm1 = vcmask 253952  }
 0x646   : > { %v3093_v13 = vsel %vm1333_vm4, %v3089_v52, %v3073_v48 }
 0x647   : > { %v3097_v28 = vsel %vm2697_vm12, %v3093_v13, %v3081_v17 }
 0x648   : > { %v3137_v49 = vrot.slane %v3097_v28, 3  ;;  %v3121_v51 = vrot.slane %v3097_v28, 2  ;;  %v3105_v55 = vrot.slane %v3097_v28, 1 }
 0x64a   : > { %3144 = vrot.lane.b32.xlu2 %v3137_v49, %s4569_s29  ;;  %3128 = vrot.lane.b32.xlu1 %v3121_v51, %s4570_s16  ;;  %v3714_v49 = vld [vmem:[%s6513_s9 + $0x18] sm:$0xff]  ;;  %v3713_v51 = vld [vmem:[%s6513_s9 + $0x10] sm:$0xff] }
 0x64b   : > { %3112 = vrot.lane.b32.xlu0 %v3105_v55, %s6530_s26  ;;  %v3712_v55 = vld [vmem:[%s6513_s9 + $0x8] sm:$0xff] }
 0x652   : > { %3138 = vrot.lane.b32.xlu2 %v3134_v16, %s4569_s29  ;;  %3122 = vrot.lane.b32.xlu1 %v3118_v57, %s4570_s16  ;;  %v3715_v16 = vld [vmem:[%s6515_s11] sm:$0xff] }
 0x653   : > { %3106 = vrot.lane.b32.xlu0 %v3102_v22, %s6530_s26  ;;  %v3208_v57 = vld [vmem:[%s6512_s8] sm:$0x1] }
 0x65a   : > { %3126 = vrot.lane.b32.xlu2 %v3120_v24, %s4570_s16  ;;  %3110 = vrot.lane.b32.xlu1 %v3104_v43, %s6530_s26  ;;  %s4515_s16 = scalar_lea.hbm %s4514_s15, 1 }
 0x65b   : > { %p4516_p11 = scmp.ne.s32.totalorder %s4514_s15, %s4515_s16  ;;  %p4521_p1 = scmp.lt.s32.totalorder %s4519_s25, %s4515_s16 }
 0x65d   : > { %p4517_p12 = pnand %p4516_p11, %p4675_p5  ;;  %p4522_p2 = por %p4521_p1, %p4520_p0 }
 0x65f   : > { %p4518_p13 = pneg %p4517_p12 }
 0x661   : > { %p4523_p3 = pnand %p4522_p2, %p4518_p13 }
 0x669   : > { %v3141_v23 = vpop.permute.xlu2 %3140 }
 0x681   : > { %v3125_v21 = vpop.permute.xlu1 %3124 }
 0x682   : > { %v3109_v9 = vpop.permute.xlu0 %3108 }
 0x683   : > { %v3151_v11 = vsel %vm1927_vm8, %v6345_v33, %v3109_v9  ;;  %v3700_v33 = vld [vmem:[%s6511_s7 + $0x28] sm:$0xff] }
 0x684   : > { %v3156_v5 = vsel %vm3154_vm15, %v3151_v11, %v3125_v21  ;;  %3307 = vmatpush.bf16.msrb.mxu3 %v3700_v33  ;;  %v3341_v21 = vld [vmem:[%s6514_s10] sm:$0x1] }
 0x685   : > { %v3160_v47 = vsel %vm2220_vm10, %v3156_v5, %v3141_v23 }
 0x686   : > { %3164 = vrot.lane.b32.xlu0 %v3160_v47, %s4571_s19 }
 0x688   : > { %3308 = vmatpush.bf16.msrb.mxu3 %v3699_v1 }
 0x68c   : > { %3309 = vmatpush.bf16.msrb.mxu3 %v3698_v20 }
 0x68e   : > { %3142 = vrot.lane.b32.xlu0 %v3136_v63, %s4569_s29  ;;  %s404_s29 = sand.u32 1, %s4553_s22  }
 0x68f   : > { %s405_s0 = scalar_lea.vmem [#allocation2], %s404_s29  ;;  %s3435_s17 = scalar_lea.sflag [#allocation3], %s404_s29 }
 0x690   : > { %3310 = vmatpush.bf16.msrb.mxu3 %v3697_v32  ;;  %s3445_s28 = sshll.u32 %s405_s0, 4  ;;  %s3446_s28 = int_to_ptr.vmem [resolvable:$true] %s3445_s28 }
 0x694   : > { %3311 = vmatpush.bf16.msrb.mxu3 %v3696_v39 }
 0x698   : > { %3312 = vmatpush.bf16.msrb.mxu3 %v3695_v42 }
 0x69c   : > { %3318 = vmatpush.bf16.msra.mxu3 %v3710_v37 }
 0x6a0   : > { %3319 = vmatpush.bf16.msra.mxu3 %v3709_v60 }
 0x6a4   : > { %v3145_v46 = vpop.permute.xlu2 %3144  ;;  %3320 = vmatpush.bf16.msra.mxu3 %v3708_v18 }
 0x6a8   : > { %3321 = vmatpush.bf16.msra.mxu3 %v3707_v30 }
 0x6ac   : > { %3322 = vmatpush.bf16.msra.mxu3 %v3706_v26  ;;  %v3139_v62 = vpop.permute.xlu2 %3138 }
 0x6b0   : > { %3323 = vmatpush.bf16.msra.mxu3 %v3705_v31 }
 0x6b4   : > { %3324 = vmatpush.bf16.msra.mxu3 %v3704_v7  ;;  %v3127_v52 = vpop.permute.xlu2 %3126 }
 0x6b8   : > { %3325 = vmatpush.bf16.msra.mxu3 %v3703_v8 }
 0x6bc   : > { %v3129_v34 = vpop.permute.xlu1 %3128 }
 0x6bd   : > { %v3113_v59 = vpop.permute.xlu0 %3112 }
 0x6be   : > { %v3153_v12 = vsel %vm1927_vm8, %v3097_v28, %v3113_v59 }
 0x6bf   : > { %v3158_v56 = vsel %vm3154_vm15, %v3153_v12, %v3129_v34 }
 0x6c0   : > { %v3162_v53 = vsel %vm2220_vm10, %v3158_v56, %v3145_v46 }
 0x6c1   : > { %3168 = vrot.lane.b32.xlu1 %v3162_v53, %s4571_s19 }
 0x6c4   : > { %v3123_v45 = vpop.permute.xlu1 %3122 }
 0x6c5   : > { %v3107_v14 = vpop.permute.xlu0 %3106 }
 0x6c6   : > { %v3150_v61 = vsel %vm1927_vm8, %v3094_v10, %v3107_v14  ;;  %v3718_v10 = vld [vmem:[%s6515_s11 + $0x18] sm:$0xff] }
 0x6c7   : > { %v3155_v19 = vsel %vm3154_vm15, %v3150_v61, %v3123_v45  ;;  %3423 = vmatpush.bf16.msra.mxu2 %v3718_v10 }
 0x6c8   : > { %v3159_v38 = vsel %vm2220_vm10, %v3155_v19, %v3139_v62 }
 0x6cb   : > { %3424 = vmatpush.bf16.msra.mxu2 %v3717_v0 }
 0x6cc   : > { %v3111_v29 = vpop.permute.xlu1 %3110 }
 0x6cd   : > { %v3152_v48 = vsel %vm1927_vm8, %v6368_v44, %v3111_v29 }
 0x6ce   : > { %v3157_v35 = vsel %vm3154_vm15, %v3152_v48, %v3127_v52 }
 0x6cf   : > { %3425 = vmatpush.bf16.msra.mxu2 %v3716_v27 }
 0x6d3   : > { %3426 = vmatpush.bf16.msra.mxu2 %v3715_v16 }
 0x6f8   : > { %v3165_v25 = vpop.permute.xlu0 %3164 }
 0x6f9   : > { %v3172_v40 = vsel %vm3171_vm0, %v3159_v38, %v3165_v25 }
 0x6fa   : > { %v3174_v2 = vpack.c.bf16 %v3172_v40, %v3172_v40 }
 0x6fc   : > { %3313 = vmatmul.bf16.vlgmr.msrb.gmra.mxu3 %v3174_v2 }
 0x6fd   : > { %3373 = vmatpush.bf16.msrb.mxu3 %v3714_v49 }
 0x700   : > { %v3143_v17 = vpop.permute.xlu0 %3142 }
 0x701   : > { %v3161_v13 = vsel %vm2220_vm10, %v3157_v35, %v3143_v17  ;;  %3374 = vmatpush.bf16.msrb.mxu3 %v3713_v51 }
 0x705   : > { %3375 = vmatpush.bf16.msrb.mxu3 %v3712_v55 }
 0x709   : > { %3376 = vmatpush.bf16.msrb.mxu3 %v3711_v58 }
 0x733   : > { %v3169_v50 = vpop.permute.xlu1 %3168 }
 0x734   : > { %v3173_v41 = vsel %vm3171_vm0, %v3161_v13, %v3169_v50 }
 0x735   : > { %v3175_v28 = vpack.c.bf16 %v3173_v41, %v3173_v41 }
 0x737   : > { %3326 = vmatmul.bf16.vlgmr.msra.gmra.mxu3 %v3175_v28 }
 0x77f   : > { %v3314_v4 = vpop.f32.mrf.mxu3 }
 0x780   : > { %v3315_v22 = vadd.f32 %v3314_v4, %v3208_v57 }
 0x787   : > { %v3316_v54 = vpop.f32.mrf.mxu3 }
 0x7ba   : > { %v3327_v6 = vpop.f32.mrf.mxu3 }
 0x7bb   : > { %v3328_v3 = vadd.f32 %v3327_v6, %v3315_v22 }
 0x7bd   : > { %v3331_v44 = vmax.f32 %v3328_v3, 0.0 }
 0x7bf   : > { %v3332_v24 = vpack.c.bf16 %v3331_v44, %v3331_v44 }
 0x7c1   : > { %3664 = vmatmul.msk.bf16.vlgmr.msrb.gmra.mxu3 %vm3171_vm0, %v3332_v24 }
 0x7c2   : > { %v3329_v43 = vpop.f32.mrf.mxu3 }
 0x844   : > { %v3378_v9 = vpop.f32.mrf.mxu3 }
 0x845   : > { %v3379_v11 = vadd.f32 %v3378_v9, %v3341_v21 }
 0x847   : > { %v3382_v23 = vmax.f32 %v3379_v11, 0.0 }
 0x849   : > { %v3383_v5 = vpack.c.bf16 %v3382_v23, %v3382_v23 }
 0x84b   : > { %3681 = vmatmul.msk.bf16.vlgmr.msra.gmra.mxu2 %vm3171_vm0, %v3383_v5 }
 0x84c   : > { %v3380_v47 = vpop.f32.mrf.mxu3 }
 0x8ce   : > { %v3428_v63 = vpop.f32.mrf.mxu2 }
 0x8cf   : > { %3433 = vst.msk [vmem:[%s405_s0] sm:$0x1] %vm3432_vm1, %v3428_v63 }
 0x8d0   : > { %4526 = shalt.err (!%p4523_p3)
}
 0x8d1   : > { %3727 = dma.vmem_to_hbm [thread:$0]  (%p4675_p5), %s3446_s28, 16, %s3448_s1, %s3435_s17  }
 0x8d6   : > { %v3430_v15 = vpop.f32.mrf.mxu2 }
 0x8d7 PF: > { %p3733_p4 = scmp.ge.s32.totalorder %s4561_s24, 2  ;;  %s3459_s29 = sand.u32 1, %s4549_s21  }
 0x8d8   : > { %s3460_s2 = scalar_lea.sflag [#allocation3], %s3459_s29 }
 0x8d9   : > { %p3730_p7 = pnand %p3733_p4, %p4679_p6 }
 0x8db   : > { %p3731_p8 = pneg %p3730_p7 }
 0x8dd   : > { %4544 = dma.done.wait (%p3731_p8), %s3460_s2, 16  }
 0x8de   : > { %4546 = vsyncadd (%p3731_p8), %s3460_s2, 4294967280  ;;  %p22_p9 = scmp.ge.s32.totalorder %s4662_s27, 4   ;;  %s6531_s21 = smov %s4553_s22 }
 0x8df   : > { %s6532_s22 = smov %s4557_s23  ;;  %s6533_s23 = smov %s4673_s30 }
 0x8e0   : > { %s6534_s24 = smov %s4662_s27  ;;  %24 = sbr.rel (!%p22_p9) target bundleno = 7 (0x7), region = 103 }
 0x8e5   :  { %3465 = vsyncpa [#allocation3], 1 }
 0x8e6   :  { %3467 = vsyncpa [#allocation3 + $0x1], 1 }

</bundles_post_ra>
